<compile_context>
chip_gen: v5e
topology: v5e:2x2
jax: 0.10.0
libtpu: 0.0.40
codegen_flags: <defaults>
</compile_context>

<pallas_src>
import functools

import jax
import jax.numpy as jnp
from jax.experimental import pallas as pl
from jax.experimental.pallas import tpu as pltpu


def _round_up(x, m):
    return ((x + m - 1) // m) * m


def _pick_time_chunk(T, Bp, E, Hp, Ap, max_chunk=256, vmem_budget_bytes=8 << 20):
    """Largest time-chunk whose chunk-local f32 buffers fit a conservative VMEM
    budget (stays well under the 32 MiB default scoped limit, incl. v7x)."""
    per_step = 4 * Bp * (E + 4 * Hp + Hp + Ap)  # emb + gates_x + h_seq + logits
    cap = max(1, min(max_chunk, vmem_budget_bytes // max(per_step, 1)))
    cap = min(cap, T)
    # Prefer an exact divisor near the cap (no tail padding / per-step masking).
    for c in range(cap, max(cap // 2, 1) - 1, -1):
        if T % c == 0:
            return c
    return cap


# ---------------------------------------------------------------------------
# Fused kernel: per time-chunk
#   1) gates_x = emb_chunk @ W_ih^T + bias          (one MXU matmul)
#   2) serial recurrence, h/c carried in vregs      (h @ W_hh^T + gating)
#   3) logits  = h_chunk @ W_lin^T + b_lin          (one lane-dense MXU matmul)
# Final (h_N, c_N) written once, on the last chunk.
# ---------------------------------------------------------------------------
def _prednet_kernel(emb_ref, h0_ref, c0_ref, wih_ref, whh_ref, bias_ref,
                    wlin_ref, blin_ref,
                    logits_ref, hN_ref, cN_ref,
                    h_carry, c_carry, gx_scr, hseq_scr,
                    *, T_valid, need_mask, unroll):
    chunk = pl.program_id(0)
    Tc, Bp, E = emb_ref.shape
    Hp = h_carry.shape[-1]

    # Load initial hidden state on the first chunk only.
    @pl.when(chunk == 0)
    def _():
        h_carry[...] = h0_ref[...]
        c_carry[...] = c0_ref[...]

    # 1) Hoisted input projection for this chunk (off the serial critical path).
    gx = jnp.dot(emb_ref[...].reshape(Tc * Bp, E), wih_ref[...],
                 preferred_element_type=jnp.float32) + bias_ref[...]
    gx_scr[...] = gx.reshape(Tc, Bp, 4 * Hp)

    whh = whh_ref[...]

    # 2) Serial recurrence: h/c live in vregs across the (bounded-)unrolled loop.
    def step(t, carry):
        h, c = carry
        gates = gx_scr[t] + jnp.dot(h, whh, preferred_element_type=jnp.float32)
        # Each gate occupies its own Hp(=128k)-lane block -> lane-aligned slices.
        i_g = jax.nn.sigmoid(gates[:, 0 * Hp:1 * Hp])
        f_g = jax.nn.sigmoid(gates[:, 1 * Hp:2 * Hp])
        g_g = jnp.tanh(gates[:, 2 * Hp:3 * Hp])
        o_g = jax.nn.sigmoid(gates[:, 3 * Hp:4 * Hp])
        c_new = f_g * c + i_g * g_g
        h_new = o_g * jnp.tanh(c_new)
        if need_mask:  # only traced when T was padded to a multiple of Tc
            valid = (chunk * Tc + t) < T_valid
            h_new = jnp.where(valid, h_new, h)
            c_new = jnp.where(valid, c_new, c)
        hseq_scr[t] = h_new
        return (h_new, c_new)

    h_fin, c_fin = jax.lax.fori_loop(
        0, Tc, step, (h_carry[...], c_carry[...]), unroll=unroll)
    h_carry[...] = h_fin
    c_carry[...] = c_fin

    # 3) Deferred output projection: lane-dense (N = Ap >= 128) store.
    logits = jnp.dot(hseq_scr[...].reshape(Tc * Bp, Hp), wlin_ref[...],
                     preferred_element_type=jnp.float32) + blin_ref[...]
    logits_ref[...] = logits.reshape(Tc, Bp, -1)

    # Final hidden/cell state: written once, on the last chunk only.
    @pl.when(chunk == pl.num_programs(0) - 1)
    def _():
        hN_ref[...] = h_carry[...]
        cN_ref[...] = c_carry[...]


def prednet_lstm_fused(emb_tbe, h0, c0, wih_pad, whh_pad, bias_pad,
                       wlin_pad, blin_pad):
    """emb_tbe: (T, Bp, E) f32; h0/c0: (Bp, Hp); padded/pre-transposed weights.
    Returns (logits (T, Bp, Ap), h_n (Bp, Hp), c_n (Bp, Hp))."""
    T, Bp, E = emb_tbe.shape
    Hp = h0.shape[-1]
    Ap = wlin_pad.shape[-1]

    Tc = _pick_time_chunk(T, Bp, E, Hp, Ap)
    n_chunks = pl.cdiv(T, Tc)
    Tp = n_chunks * Tc
    need_mask = (Tp != T)
    if need_mask:
        emb_tbe = jnp.pad(emb_tbe, ((0, Tp - T), (0, 0), (0, 0)))

    kernel = functools.partial(_prednet_kernel, T_valid=T, need_mask=need_mask,
                               unroll=min(Tc, 8))

    def const(shape):
        return pl.BlockSpec(shape, lambda c, _n=len(shape): (0,) * _n)

    grid_spec = pltpu.PrefetchScalarGridSpec(
        num_scalar_prefetch=0,
        grid=(n_chunks,),
        in_specs=[
            pl.BlockSpec((Tc, Bp, E), lambda c: (c, 0, 0)),   # emb chunk
            const((Bp, Hp)),                                  # h0
            const((Bp, Hp)),                                  # c0
            const((E, 4 * Hp)),                               # W_ih^T (padded)
            const((Hp, 4 * Hp)),                              # W_hh^T (padded)
            const((1, 4 * Hp)),                               # b_ih + b_hh (padded)
            const((Hp, Ap)),                                  # W_lin^T (padded)
            const((1, Ap)),                                   # b_lin (padded)
        ],
        out_specs=[
            pl.BlockSpec((Tc, Bp, Ap), lambda c: (c, 0, 0)),  # logits chunk
            const((Bp, Hp)),                                  # h_n
            const((Bp, Hp)),                                  # c_n
        ],
        scratch_shapes=[
            pltpu.VMEM((Bp, Hp), jnp.float32),                # h carry (across chunks)
            pltpu.VMEM((Bp, Hp), jnp.float32),                # c carry
            pltpu.VMEM((Tc, Bp, 4 * Hp), jnp.float32),        # gates_x chunk
            pltpu.VMEM((Tc, Bp, Hp), jnp.float32),            # h_seq chunk
        ],
    )

    out_shapes = (
        jax.ShapeDtypeStruct((Tp, Bp, Ap), jnp.float32),
        jax.ShapeDtypeStruct((Bp, Hp), jnp.float32),
        jax.ShapeDtypeStruct((Bp, Hp), jnp.float32),
    )

    logits, h_n, c_n = pl.pallas_call(
        kernel,
        out_shape=out_shapes,
        grid_spec=grid_spec,
        compiler_params=pltpu.CompilerParams(
            dimension_semantics=("arbitrary",)),   # sequential recurrence
    )(emb_tbe, h0, c0, wih_pad, whh_pad, bias_pad, wlin_pad, blin_pad)

    if need_mask:
        logits = logits[:T]
    return logits, h_n, c_n


class PredNetPallas:
    """Deterministically-initialized PredNet with a fused Pallas LSTM kernel."""

    def __init__(self, alphabet, emb_dim=32, hid_dim=32, key=None):
        if key is None:
            key = jax.random.PRNGKey(0)
        ks = jax.random.split(key, 7)
        self.alphabet = alphabet
        self.emb_dim = emb_dim
        self.hid_dim = hid_dim

        s = 1.0 / jnp.sqrt(hid_dim)
        # Embedding table ~ N(0, 1) (PyTorch default for nn.Embedding).
        self.emb_table = jax.random.normal(ks[0], (alphabet, emb_dim), jnp.float32)
        # LSTM weights, uniform(-1/sqrt(H), 1/sqrt(H)) like PyTorch.
        self.w_ih = jax.random.uniform(ks[1], (4 * hid_dim, emb_dim),
                                       jnp.float32, -s, s)
        self.w_hh = jax.random.uniform(ks[2], (4 * hid_dim, hid_dim),
                                       jnp.float32, -s, s)
        self.b_ih = jax.random.uniform(ks[3], (4 * hid_dim,), jnp.float32, -s, s)
        self.b_hh = jax.random.uniform(ks[4], (4 * hid_dim,), jnp.float32, -s, s)
        # Linear layer.
        sl = 1.0 / jnp.sqrt(hid_dim)
        self.w_lin = jax.random.uniform(ks[5], (alphabet, hid_dim),
                                        jnp.float32, -sl, sl)
        self.b_lin = jax.random.uniform(ks[6], (alphabet,), jnp.float32, -sl, sl)

        # ---- Pre-transposed, lane/sublane-padded kernel weights (built once). ----
        H, E, A = hid_dim, emb_dim, alphabet
        Hp = _round_up(H, 128)
        Ap = max(128, _round_up(A, 128))
        self.Hp, self.Ap = Hp, Ap

        wih_t = self.w_ih.T                     # (E, 4H), gates [i|f|g|o]
        whh_t = self.w_hh.T                     # (H, 4H)
        bias = self.b_ih + self.b_hh            # (4H,)

        wih_pad = jnp.zeros((E, 4 * Hp), jnp.float32)
        whh_pad = jnp.zeros((Hp, 4 * Hp), jnp.float32)
        bias_pad = jnp.zeros((1, 4 * Hp), jnp.float32)
        for g in range(4):
            wih_pad = wih_pad.at[:, g * Hp:g * Hp + H].set(wih_t[:, g * H:(g + 1) * H])
            whh_pad = whh_pad.at[:H, g * Hp:g * Hp + H].set(whh_t[:, g * H:(g + 1) * H])
            bias_pad = bias_pad.at[:, g * Hp:g * Hp + H].set(bias[g * H:(g + 1) * H])
        self.wih_pad, self.whh_pad, self.bias_pad = wih_pad, whh_pad, bias_pad

        wlin_pad = jnp.zeros((Hp, Ap), jnp.float32).at[:H, :A].set(self.w_lin.T)
        blin_pad = jnp.zeros((1, Ap), jnp.float32).at[:, :A].set(self.b_lin)
        self.wlin_pad, self.blin_pad = wlin_pad, blin_pad

    def __call__(self, x, hidden=None):
        """x: int32 token ids (B, T).  Returns (logits (B,T,A), (h_n, c_n))."""
        B, T = x.shape
        H, E, A = self.hid_dim, self.emb_dim, self.alphabet
        Hp, Ap = self.Hp, self.Ap
        Bp = max(8, _round_up(B, 8))

        if hidden is None:
            h0 = jnp.zeros((B, H), jnp.float32)
            c0 = jnp.zeros((B, H), jnp.float32)
        else:
            h0 = hidden[0].reshape(B, H).astype(jnp.float32)
            c0 = hidden[1].reshape(B, H).astype(jnp.float32)

        if T == 0:
            return jnp.zeros((B, 0, A), jnp.float32), (h0[None], c0[None])

        h0p = jnp.zeros((Bp, Hp), jnp.float32).at[:B, :H].set(h0)
        c0p = jnp.zeros((Bp, Hp), jnp.float32).at[:B, :H].set(c0)

        # Embedding gather directly in (T, Bp, E) layout (only the tiny int-id
        # array is transposed; no HBM transpose of the embedded activations).
        x_pad = jnp.pad(x, ((0, Bp - B), (0, 0)))
        emb_tbe = jnp.take(self.emb_table, x_pad.T, axis=0)   # (T, Bp, E)
        # TODO(synk): dropout omitted (eval-mode semantics => identity).

        logits_tba, h_n, c_n = prednet_lstm_fused(
            emb_tbe, h0p, c0p, self.wih_pad, self.whh_pad, self.bias_pad,
            self.wlin_pad, self.blin_pad)

        # Slice off lane/batch padding; only the small module output is
        # transposed (all large intermediates stayed in kernel layout).
        logits = jnp.transpose(logits_tba[:, :B, :A], (1, 0, 2))
        return logits, (h_n[:B, :H][None], c_n[:B, :H][None])

    def reference(self, x, hidden=None):
        """Pure-JAX reference (lax.scan) mirroring torch.nn.LSTM semantics."""
        B, T = x.shape
        emb = jnp.take(self.emb_table, x, axis=0)              # (B, T, E)
        emb_tbe = jnp.transpose(emb, (1, 0, 2))                 # (T, B, E)
        if hidden is None:
            h0 = jnp.zeros((B, self.hid_dim), jnp.float32)
            c0 = jnp.zeros((B, self.hid_dim), jnp.float32)
        else:
            h0 = hidden[0].reshape(B, self.hid_dim)
            c0 = hidden[1].reshape(B, self.hid_dim)
        Wih, Whh = self.w_ih.T, self.w_hh.T
        bias = self.b_ih + self.b_hh

        def step(carry, x_t):
            h, c = carry
            gates = x_t @ Wih + h @ Whh + bias
            i, f, g, o = jnp.split(gates, 4, axis=-1)
            i, f, o = jax.nn.sigmoid(i), jax.nn.sigmoid(f), jax.nn.sigmoid(o)
            g = jnp.tanh(g)
            c = f * c + i * g
            h = o * jnp.tanh(c)
            return (h, c), h @ self.w_lin.T + self.b_lin

        (hT, cT), outs = jax.lax.scan(step, (h0, c0), emb_tbe)
        return jnp.transpose(outs, (1, 0, 2)), (hT[None], cT[None])


if __name__ == "__main__":
    key = jax.random.PRNGKey(0)
    k_tok, k_params = jax.random.split(key)

    alphabet, emb_dim, hid_dim = 6, 32, 32
    B, T = 2, 8

    model = PredNetPallas(alphabet, emb_dim=emb_dim, hid_dim=hid_dim,
                          key=k_params)
    x = jax.random.randint(k_tok, (B, T), 0, alphabet, dtype=jnp.int32)

    logits, (h_n, c_n) = model(x)
    jax.block_until_ready(logits)
    jax.block_until_ready(h_n)
    jax.block_until_ready(c_n)

    # Sanity-check against pure-JAX reference.
    ref_logits, (ref_h, ref_c) = model.reference(x)
    assert logits.shape == (B, T, alphabet)
    assert h_n.shape == (1, B, hid_dim) and c_n.shape == (1, B, hid_dim)
    assert jnp.allclose(logits, ref_logits, atol=2e-3, rtol=2e-3)
    assert jnp.allclose(h_n, ref_h, atol=2e-3, rtol=2e-3)
    assert jnp.allclose(c_n, ref_c, atol=2e-3, rtol=2e-3)

    print("KERNEL_OK")
</pallas_src>

<mosaic_0001>
module attributes {stable_mosaic.version = 11 : i64} {
  func.func @_prednet_kernel(%arg0: i32, %arg1: memref<8x8x32xf32, #tpu.memory_space<vmem>>, %arg2: memref<8x128xf32, #tpu.memory_space<vmem>>, %arg3: memref<8x128xf32, #tpu.memory_space<vmem>>, %arg4: memref<32x512xf32, #tpu.memory_space<vmem>>, %arg5: memref<128x512xf32, #tpu.memory_space<vmem>>, %arg6: memref<1x512xf32, #tpu.memory_space<vmem>>, %arg7: memref<128x128xf32, #tpu.memory_space<vmem>>, %arg8: memref<1x128xf32, #tpu.memory_space<vmem>>, %arg9: memref<8x8x128xf32, #tpu.memory_space<vmem>>, %arg10: memref<8x128xf32, #tpu.memory_space<vmem>>, %arg11: memref<8x128xf32, #tpu.memory_space<vmem>>, %arg12: memref<8x128xf32, #tpu.memory_space<vmem>>, %arg13: memref<8x128xf32, #tpu.memory_space<vmem>>, %arg14: memref<8x8x512xf32, #tpu.memory_space<vmem>>, %arg15: memref<8x8x128xf32, #tpu.memory_space<vmem>>) attributes {dimension_semantics = [#tpu.dimension_semantics<arbitrary>], iteration_bounds = array<i64: 1>, scalar_prefetch = 0 : i64, scratch_operands = 4 : i64, tpu.core_type = #tpu.core_type<tc>, window_params = [{transform_indices = @transform_0, window_bounds = array<i64: 8, 8, 32>}, {pipeline_mode = #tpu.pipeline_mode<synchronous>, transform_indices = @transform_1, window_bounds = array<i64: 8, 128>}, {pipeline_mode = #tpu.pipeline_mode<synchronous>, transform_indices = @transform_2, window_bounds = array<i64: 8, 128>}, {pipeline_mode = #tpu.pipeline_mode<synchronous>, transform_indices = @transform_3, window_bounds = array<i64: 32, 512>}, {pipeline_mode = #tpu.pipeline_mode<synchronous>, transform_indices = @transform_4, window_bounds = array<i64: 128, 512>}, {pipeline_mode = #tpu.pipeline_mode<synchronous>, transform_indices = @transform_5, window_bounds = array<i64: 1, 512>}, {pipeline_mode = #tpu.pipeline_mode<synchronous>, transform_indices = @transform_6, window_bounds = array<i64: 128, 128>}, {pipeline_mode = #tpu.pipeline_mode<synchronous>, transform_indices = @transform_7, window_bounds = array<i64: 1, 128>}, {transform_indices = @transform_8, window_bounds = array<i64: 8, 8, 128>}, {pipeline_mode = #tpu.pipeline_mode<synchronous>, transform_indices = @transform_9, window_bounds = array<i64: 8, 128>}, {pipeline_mode = #tpu.pipeline_mode<synchronous>, transform_indices = @transform_10, window_bounds = array<i64: 8, 128>}]} {
    %c0_i32 = arith.constant 0 : i32
    %0 = arith.cmpi eq, %arg0, %c0_i32 : i32
    %1 = arith.extui %0 : i1 to i32
    %c0_i32_0 = arith.constant 0 : i32
    %2 = arith.cmpi ne, %1, %c0_i32_0 : i32
    scf.if %2 {
      %c0_98 = arith.constant 0 : index
      %c0_99 = arith.constant 0 : index
      %301 = vector.load %arg2[%c0_98, %c0_99] : memref<8x128xf32, #tpu.memory_space<vmem>>, vector<8x128xf32>
      %c0_100 = arith.constant 0 : index
      %c0_101 = arith.constant 0 : index
      %302 = vector.load %arg12[%c0_100, %c0_101] : memref<8x128xf32, #tpu.memory_space<vmem>>, vector<8x128xf32>
      tpu.vector_store %arg12[%c0_100, %c0_101], %301 {strides = array<i32>} : memref<8x128xf32, #tpu.memory_space<vmem>>, vector<8x128xf32>,
      %c0_102 = arith.constant 0 : index
      %c0_103 = arith.constant 0 : index
      %303 = vector.load %arg3[%c0_102, %c0_103] : memref<8x128xf32, #tpu.memory_space<vmem>>, vector<8x128xf32>
      %c0_104 = arith.constant 0 : index
      %c0_105 = arith.constant 0 : index
      %304 = vector.load %arg13[%c0_104, %c0_105] : memref<8x128xf32, #tpu.memory_space<vmem>>, vector<8x128xf32>
      tpu.vector_store %arg13[%c0_104, %c0_105], %303 {strides = array<i32>} : memref<8x128xf32, #tpu.memory_space<vmem>>, vector<8x128xf32>,
    } else {
    }
    %c0 = arith.constant 0 : index
    %c0_1 = arith.constant 0 : index
    %c0_2 = arith.constant 0 : index
    %3 = vector.load %arg1[%c0, %c0_1, %c0_2] : memref<8x8x32xf32, #tpu.memory_space<vmem>>, vector<8x8x32xf32>
    %4 = vector.shape_cast %3 : vector<8x8x32xf32> to vector<64x32xf32>
    %c0_3 = arith.constant 0 : index
    %c0_4 = arith.constant 0 : index
    %5 = vector.load %arg4[%c0_3, %c0_4] : memref<32x512xf32, #tpu.memory_space<vmem>>, vector<32x512xf32>
    %cst = arith.constant dense<0.000000e+00> : vector<64x512xf32>
    %6 = tpu.matmul %4, %5, %cst {dimension_numbers = #tpu.dot_dimension_numbers<[1], [0], [0], [1], [0, 0, 1, 1], [], []>} : vector<64x32xf32>, vector<32x512xf32>, vector<64x512xf32> -> vector<64x512xf32>
    %c0_5 = arith.constant 0 : index
    %c0_6 = arith.constant 0 : index
    %7 = vector.load %arg6[%c0_5, %c0_6] : memref<1x512xf32, #tpu.memory_space<vmem>>, vector<1x512xf32>
    %8 = vector.broadcast %7 : vector<1x512xf32> to vector<64x512xf32>
    %9 = arith.addf %6, %8 : vector<64x512xf32>
    %10 = vector.shape_cast %9 : vector<64x512xf32> to vector<8x8x512xf32>
    %c0_7 = arith.constant 0 : index
    %c0_8 = arith.constant 0 : index
    %c0_9 = arith.constant 0 : index
    %11 = vector.load %arg14[%c0_7, %c0_8, %c0_9] : memref<8x8x512xf32, #tpu.memory_space<vmem>>, vector<8x8x512xf32>
    tpu.vector_store %arg14[%c0_7, %c0_8, %c0_9], %10 {strides = array<i32>} : memref<8x8x512xf32, #tpu.memory_space<vmem>>, vector<8x8x512xf32>,
    %c0_10 = arith.constant 0 : index
    %c0_11 = arith.constant 0 : index
    %12 = vector.load %arg5[%c0_10, %c0_11] : memref<128x512xf32, #tpu.memory_space<vmem>>, vector<128x512xf32>
    %c0_12 = arith.constant 0 : index
    %c0_13 = arith.constant 0 : index
    %13 = vector.load %arg12[%c0_12, %c0_13] : memref<8x128xf32, #tpu.memory_space<vmem>>, vector<8x128xf32>
    %c0_14 = arith.constant 0 : index
    %c0_15 = arith.constant 0 : index
    %14 = vector.load %arg13[%c0_14, %c0_15] : memref<8x128xf32, #tpu.memory_space<vmem>>, vector<8x128xf32>
    %c0_i32_16 = arith.constant 0 : i32
    %15 = arith.index_cast %c0_i32_16 : i32 to index
    %c0_17 = arith.constant 0 : index
    %c0_18 = arith.constant 0 : index
    %16 = vector.load %arg14[%15, %c0_17, %c0_18] : memref<8x8x512xf32, #tpu.memory_space<vmem>>, vector<1x8x512xf32>
    %17 = vector.shape_cast %16 : vector<1x8x512xf32> to vector<8x512xf32>
    %cst_19 = arith.constant dense<0.000000e+00> : vector<8x512xf32>
    %18 = tpu.matmul %13, %12, %cst_19 {dimension_numbers = #tpu.dot_dimension_numbers<[1], [0], [0], [1], [0, 0, 1, 1], [], []>} : vector<8x128xf32>, vector<128x512xf32>, vector<8x512xf32> -> vector<8x512xf32>
    %19 = arith.addf %17, %18 : vector<8x512xf32>
    %20 = vector.extract_strided_slice %19 {offsets = [0, 0], sizes = [8, 128], strides = [1, 1]} : vector<8x512xf32> to vector<8x128xf32>
    %21 = arith.negf %20 : vector<8x128xf32>
    %22 = math.exp %21 : vector<8x128xf32>
    %cst_20 = arith.constant 1.000000e+00 : f32
    %23 = vector.broadcast %cst_20 : f32 to vector<8x128xf32>
    %24 = arith.addf %23, %22 : vector<8x128xf32>
    %25 = arith.divf %23, %24 : vector<8x128xf32>
    %26 = vector.extract_strided_slice %19 {offsets = [0, 128], sizes = [8, 128], strides = [1, 1]} : vector<8x512xf32> to vector<8x128xf32>
    %27 = arith.negf %26 : vector<8x128xf32>
    %28 = math.exp %27 : vector<8x128xf32>
    %cst_21 = arith.constant 1.000000e+00 : f32
    %29 = vector.broadcast %cst_21 : f32 to vector<8x128xf32>
    %30 = arith.addf %29, %28 : vector<8x128xf32>
    %31 = arith.divf %29, %30 : vector<8x128xf32>
    %32 = vector.extract_strided_slice %19 {offsets = [0, 256], sizes = [8, 128], strides = [1, 1]} : vector<8x512xf32> to vector<8x128xf32>
    %33 = math.tanh %32 : vector<8x128xf32>
    %34 = vector.extract_strided_slice %19 {offsets = [0, 384], sizes = [8, 128], strides = [1, 1]} : vector<8x512xf32> to vector<8x128xf32>
    %35 = arith.negf %34 : vector<8x128xf32>
    %36 = math.exp %35 : vector<8x128xf32>
    %cst_22 = arith.constant 1.000000e+00 : f32
    %37 = vector.broadcast %cst_22 : f32 to vector<8x128xf32>
    %38 = arith.addf %37, %36 : vector<8x128xf32>
    %39 = arith.divf %37, %38 : vector<8x128xf32>
    %40 = arith.mulf %31, %14 : vector<8x128xf32>
    %41 = arith.mulf %25, %33 : vector<8x128xf32>
    %42 = arith.addf %40, %41 : vector<8x128xf32>
    %43 = math.tanh %42 : vector<8x128xf32>
    %44 = arith.mulf %39, %43 : vector<8x128xf32>
    %45 = arith.index_cast %c0_i32_16 : i32 to index
    %c0_23 = arith.constant 0 : index
    %c0_24 = arith.constant 0 : index
    %46 = vector.load %arg15[%45, %c0_23, %c0_24] : memref<8x8x128xf32, #tpu.memory_space<vmem>>, vector<1x8x128xf32>
    %47 = vector.shape_cast %46 : vector<1x8x128xf32> to vector<8x128xf32>
    %48 = vector.shape_cast %44 : vector<8x128xf32> to vector<1x8x128xf32>
    tpu.vector_store %arg15[%45, %c0_23, %c0_24], %48 {strides = array<i32>} : memref<8x8x128xf32, #tpu.memory_space<vmem>>, vector<1x8x128xf32>,
    %c1_i32 = arith.constant 1 : i32
    %49 = arith.index_cast %c1_i32 : i32 to index
    %c0_25 = arith.constant 0 : index
    %c0_26 = arith.constant 0 : index
    %50 = vector.load %arg14[%49, %c0_25, %c0_26] : memref<8x8x512xf32, #tpu.memory_space<vmem>>, vector<1x8x512xf32>
    %51 = vector.shape_cast %50 : vector<1x8x512xf32> to vector<8x512xf32>
    %cst_27 = arith.constant dense<0.000000e+00> : vector<8x512xf32>
    %52 = tpu.matmul %44, %12, %cst_27 {dimension_numbers = #tpu.dot_dimension_numbers<[1], [0], [0], [1], [0, 0, 1, 1], [], []>} : vector<8x128xf32>, vector<128x512xf32>, vector<8x512xf32> -> vector<8x512xf32>
    %53 = arith.addf %51, %52 : vector<8x512xf32>
    %54 = vector.extract_strided_slice %53 {offsets = [0, 0], sizes = [8, 128], strides = [1, 1]} : vector<8x512xf32> to vector<8x128xf32>
    %55 = arith.negf %54 : vector<8x128xf32>
    %56 = math.exp %55 : vector<8x128xf32>
    %cst_28 = arith.constant 1.000000e+00 : f32
    %57 = vector.broadcast %cst_28 : f32 to vector<8x128xf32>
    %58 = arith.addf %57, %56 : vector<8x128xf32>
    %59 = arith.divf %57, %58 : vector<8x128xf32>
    %60 = vector.extract_strided_slice %53 {offsets = [0, 128], sizes = [8, 128], strides = [1, 1]} : vector<8x512xf32> to vector<8x128xf32>
    %61 = arith.negf %60 : vector<8x128xf32>
    %62 = math.exp %61 : vector<8x128xf32>
    %cst_29 = arith.constant 1.000000e+00 : f32
    %63 = vector.broadcast %cst_29 : f32 to vector<8x128xf32>
    %64 = arith.addf %63, %62 : vector<8x128xf32>
    %65 = arith.divf %63, %64 : vector<8x128xf32>
    %66 = vector.extract_strided_slice %53 {offsets = [0, 256], sizes = [8, 128], strides = [1, 1]} : vector<8x512xf32> to vector<8x128xf32>
    %67 = math.tanh %66 : vector<8x128xf32>
    %68 = vector.extract_strided_slice %53 {offsets = [0, 384], sizes = [8, 128], strides = [1, 1]} : vector<8x512xf32> to vector<8x128xf32>
    %69 = arith.negf %68 : vector<8x128xf32>
    %70 = math.exp %69 : vector<8x128xf32>
    %cst_30 = arith.constant 1.000000e+00 : f32
    %71 = vector.broadcast %cst_30 : f32 to vector<8x128xf32>
    %72 = arith.addf %71, %70 : vector<8x128xf32>
    %73 = arith.divf %71, %72 : vector<8x128xf32>
    %74 = arith.mulf %65, %42 : vector<8x128xf32>
    %75 = arith.mulf %59, %67 : vector<8x128xf32>
    %76 = arith.addf %74, %75 : vector<8x128xf32>
    %77 = math.tanh %76 : vector<8x128xf32>
    %78 = arith.mulf %73, %77 : vector<8x128xf32>
    %79 = arith.index_cast %c1_i32 : i32 to index
    %c0_31 = arith.constant 0 : index
    %c0_32 = arith.constant 0 : index
    %80 = vector.load %arg15[%79, %c0_31, %c0_32] : memref<8x8x128xf32, #tpu.memory_space<vmem>>, vector<1x8x128xf32>
    %81 = vector.shape_cast %80 : vector<1x8x128xf32> to vector<8x128xf32>
    %82 = vector.shape_cast %78 : vector<8x128xf32> to vector<1x8x128xf32>
    tpu.vector_store %arg15[%79, %c0_31, %c0_32], %82 {strides = array<i32>} : memref<8x8x128xf32, #tpu.memory_space<vmem>>, vector<1x8x128xf32>,
    %c2_i32 = arith.constant 2 : i32
    %83 = arith.index_cast %c2_i32 : i32 to index
    %c0_33 = arith.constant 0 : index
    %c0_34 = arith.constant 0 : index
    %84 = vector.load %arg14[%83, %c0_33, %c0_34] : memref<8x8x512xf32, #tpu.memory_space<vmem>>, vector<1x8x512xf32>
    %85 = vector.shape_cast %84 : vector<1x8x512xf32> to vector<8x512xf32>
    %cst_35 = arith.constant dense<0.000000e+00> : vector<8x512xf32>
    %86 = tpu.matmul %78, %12, %cst_35 {dimension_numbers = #tpu.dot_dimension_numbers<[1], [0], [0], [1], [0, 0, 1, 1], [], []>} : vector<8x128xf32>, vector<128x512xf32>, vector<8x512xf32> -> vector<8x512xf32>
    %87 = arith.addf %85, %86 : vector<8x512xf32>
    %88 = vector.extract_strided_slice %87 {offsets = [0, 0], sizes = [8, 128], strides = [1, 1]} : vector<8x512xf32> to vector<8x128xf32>
    %89 = arith.negf %88 : vector<8x128xf32>
    %90 = math.exp %89 : vector<8x128xf32>
    %cst_36 = arith.constant 1.000000e+00 : f32
    %91 = vector.broadcast %cst_36 : f32 to vector<8x128xf32>
    %92 = arith.addf %91, %90 : vector<8x128xf32>
    %93 = arith.divf %91, %92 : vector<8x128xf32>
    %94 = vector.extract_strided_slice %87 {offsets = [0, 128], sizes = [8, 128], strides = [1, 1]} : vector<8x512xf32> to vector<8x128xf32>
    %95 = arith.negf %94 : vector<8x128xf32>
    %96 = math.exp %95 : vector<8x128xf32>
    %cst_37 = arith.constant 1.000000e+00 : f32
    %97 = vector.broadcast %cst_37 : f32 to vector<8x128xf32>
    %98 = arith.addf %97, %96 : vector<8x128xf32>
    %99 = arith.divf %97, %98 : vector<8x128xf32>
    %100 = vector.extract_strided_slice %87 {offsets = [0, 256], sizes = [8, 128], strides = [1, 1]} : vector<8x512xf32> to vector<8x128xf32>
    %101 = math.tanh %100 : vector<8x128xf32>
    %102 = vector.extract_strided_slice %87 {offsets = [0, 384], sizes = [8, 128], strides = [1, 1]} : vector<8x512xf32> to vector<8x128xf32>
    %103 = arith.negf %102 : vector<8x128xf32>
    %104 = math.exp %103 : vector<8x128xf32>
    %cst_38 = arith.constant 1.000000e+00 : f32
    %105 = vector.broadcast %cst_38 : f32 to vector<8x128xf32>
    %106 = arith.addf %105, %104 : vector<8x128xf32>
    %107 = arith.divf %105, %106 : vector<8x128xf32>
    %108 = arith.mulf %99, %76 : vector<8x128xf32>
    %109 = arith.mulf %93, %101 : vector<8x128xf32>
    %110 = arith.addf %108, %109 : vector<8x128xf32>
    %111 = math.tanh %110 : vector<8x128xf32>
    %112 = arith.mulf %107, %111 : vector<8x128xf32>
    %113 = arith.index_cast %c2_i32 : i32 to index
    %c0_39 = arith.constant 0 : index
    %c0_40 = arith.constant 0 : index
    %114 = vector.load %arg15[%113, %c0_39, %c0_40] : memref<8x8x128xf32, #tpu.memory_space<vmem>>, vector<1x8x128xf32>
    %115 = vector.shape_cast %114 : vector<1x8x128xf32> to vector<8x128xf32>
    %116 = vector.shape_cast %112 : vector<8x128xf32> to vector<1x8x128xf32>
    tpu.vector_store %arg15[%113, %c0_39, %c0_40], %116 {strides = array<i32>} : memref<8x8x128xf32, #tpu.memory_space<vmem>>, vector<1x8x128xf32>,
    %c3_i32 = arith.constant 3 : i32
    %117 = arith.index_cast %c3_i32 : i32 to index
    %c0_41 = arith.constant 0 : index
    %c0_42 = arith.constant 0 : index
    %118 = vector.load %arg14[%117, %c0_41, %c0_42] : memref<8x8x512xf32, #tpu.memory_space<vmem>>, vector<1x8x512xf32>
    %119 = vector.shape_cast %118 : vector<1x8x512xf32> to vector<8x512xf32>
    %cst_43 = arith.constant dense<0.000000e+00> : vector<8x512xf32>
    %120 = tpu.matmul %112, %12, %cst_43 {dimension_numbers = #tpu.dot_dimension_numbers<[1], [0], [0], [1], [0, 0, 1, 1], [], []>} : vector<8x128xf32>, vector<128x512xf32>, vector<8x512xf32> -> vector<8x512xf32>
    %121 = arith.addf %119, %120 : vector<8x512xf32>
    %122 = vector.extract_strided_slice %121 {offsets = [0, 0], sizes = [8, 128], strides = [1, 1]} : vector<8x512xf32> to vector<8x128xf32>
    %123 = arith.negf %122 : vector<8x128xf32>
    %124 = math.exp %123 : vector<8x128xf32>
    %cst_44 = arith.constant 1.000000e+00 : f32
    %125 = vector.broadcast %cst_44 : f32 to vector<8x128xf32>
    %126 = arith.addf %125, %124 : vector<8x128xf32>
    %127 = arith.divf %125, %126 : vector<8x128xf32>
    %128 = vector.extract_strided_slice %121 {offsets = [0, 128], sizes = [8, 128], strides = [1, 1]} : vector<8x512xf32> to vector<8x128xf32>
    %129 = arith.negf %128 : vector<8x128xf32>
    %130 = math.exp %129 : vector<8x128xf32>
    %cst_45 = arith.constant 1.000000e+00 : f32
    %131 = vector.broadcast %cst_45 : f32 to vector<8x128xf32>
    %132 = arith.addf %131, %130 : vector<8x128xf32>
    %133 = arith.divf %131, %132 : vector<8x128xf32>
    %134 = vector.extract_strided_slice %121 {offsets = [0, 256], sizes = [8, 128], strides = [1, 1]} : vector<8x512xf32> to vector<8x128xf32>
    %135 = math.tanh %134 : vector<8x128xf32>
    %136 = vector.extract_strided_slice %121 {offsets = [0, 384], sizes = [8, 128], strides = [1, 1]} : vector<8x512xf32> to vector<8x128xf32>
    %137 = arith.negf %136 : vector<8x128xf32>
    %138 = math.exp %137 : vector<8x128xf32>
    %cst_46 = arith.constant 1.000000e+00 : f32
    %139 = vector.broadcast %cst_46 : f32 to vector<8x128xf32>
    %140 = arith.addf %139, %138 : vector<8x128xf32>
    %141 = arith.divf %139, %140 : vector<8x128xf32>
    %142 = arith.mulf %133, %110 : vector<8x128xf32>
    %143 = arith.mulf %127, %135 : vector<8x128xf32>
    %144 = arith.addf %142, %143 : vector<8x128xf32>
    %145 = math.tanh %144 : vector<8x128xf32>
    %146 = arith.mulf %141, %145 : vector<8x128xf32>
    %147 = arith.index_cast %c3_i32 : i32 to index
    %c0_47 = arith.constant 0 : index
    %c0_48 = arith.constant 0 : index
    %148 = vector.load %arg15[%147, %c0_47, %c0_48] : memref<8x8x128xf32, #tpu.memory_space<vmem>>, vector<1x8x128xf32>
    %149 = vector.shape_cast %148 : vector<1x8x128xf32> to vector<8x128xf32>
    %150 = vector.shape_cast %146 : vector<8x128xf32> to vector<1x8x128xf32>
    tpu.vector_store %arg15[%147, %c0_47, %c0_48], %150 {strides = array<i32>} : memref<8x8x128xf32, #tpu.memory_space<vmem>>, vector<1x8x128xf32>,
    %c4_i32 = arith.constant 4 : i32
    %151 = arith.index_cast %c4_i32 : i32 to index
    %c0_49 = arith.constant 0 : index
    %c0_50 = arith.constant 0 : index
    %152 = vector.load %arg14[%151, %c0_49, %c0_50] : memref<8x8x512xf32, #tpu.memory_space<vmem>>, vector<1x8x512xf32>
    %153 = vector.shape_cast %152 : vector<1x8x512xf32> to vector<8x512xf32>
    %cst_51 = arith.constant dense<0.000000e+00> : vector<8x512xf32>
    %154 = tpu.matmul %146, %12, %cst_51 {dimension_numbers = #tpu.dot_dimension_numbers<[1], [0], [0], [1], [0, 0, 1, 1], [], []>} : vector<8x128xf32>, vector<128x512xf32>, vector<8x512xf32> -> vector<8x512xf32>
    %155 = arith.addf %153, %154 : vector<8x512xf32>
    %156 = vector.extract_strided_slice %155 {offsets = [0, 0], sizes = [8, 128], strides = [1, 1]} : vector<8x512xf32> to vector<8x128xf32>
    %157 = arith.negf %156 : vector<8x128xf32>
    %158 = math.exp %157 : vector<8x128xf32>
    %cst_52 = arith.constant 1.000000e+00 : f32
    %159 = vector.broadcast %cst_52 : f32 to vector<8x128xf32>
    %160 = arith.addf %159, %158 : vector<8x128xf32>
    %161 = arith.divf %159, %160 : vector<8x128xf32>
    %162 = vector.extract_strided_slice %155 {offsets = [0, 128], sizes = [8, 128], strides = [1, 1]} : vector<8x512xf32> to vector<8x128xf32>
    %163 = arith.negf %162 : vector<8x128xf32>
    %164 = math.exp %163 : vector<8x128xf32>
    %cst_53 = arith.constant 1.000000e+00 : f32
    %165 = vector.broadcast %cst_53 : f32 to vector<8x128xf32>
    %166 = arith.addf %165, %164 : vector<8x128xf32>
    %167 = arith.divf %165, %166 : vector<8x128xf32>
    %168 = vector.extract_strided_slice %155 {offsets = [0, 256], sizes = [8, 128], strides = [1, 1]} : vector<8x512xf32> to vector<8x128xf32>
    %169 = math.tanh %168 : vector<8x128xf32>
    %170 = vector.extract_strided_slice %155 {offsets = [0, 384], sizes = [8, 128], strides = [1, 1]} : vector<8x512xf32> to vector<8x128xf32>
    %171 = arith.negf %170 : vector<8x128xf32>
    %172 = math.exp %171 : vector<8x128xf32>
    %cst_54 = arith.constant 1.000000e+00 : f32
    %173 = vector.broadcast %cst_54 : f32 to vector<8x128xf32>
    %174 = arith.addf %173, %172 : vector<8x128xf32>
    %175 = arith.divf %173, %174 : vector<8x128xf32>
    %176 = arith.mulf %167, %144 : vector<8x128xf32>
    %177 = arith.mulf %161, %169 : vector<8x128xf32>
    %178 = arith.addf %176, %177 : vector<8x128xf32>
    %179 = math.tanh %178 : vector<8x128xf32>
    %180 = arith.mulf %175, %179 : vector<8x128xf32>
    %181 = arith.index_cast %c4_i32 : i32 to index
    %c0_55 = arith.constant 0 : index
    %c0_56 = arith.constant 0 : index
    %182 = vector.load %arg15[%181, %c0_55, %c0_56] : memref<8x8x128xf32, #tpu.memory_space<vmem>>, vector<1x8x128xf32>
    %183 = vector.shape_cast %182 : vector<1x8x128xf32> to vector<8x128xf32>
    %184 = vector.shape_cast %180 : vector<8x128xf32> to vector<1x8x128xf32>
    tpu.vector_store %arg15[%181, %c0_55, %c0_56], %184 {strides = array<i32>} : memref<8x8x128xf32, #tpu.memory_space<vmem>>, vector<1x8x128xf32>,
    %c5_i32 = arith.constant 5 : i32
    %185 = arith.index_cast %c5_i32 : i32 to index
    %c0_57 = arith.constant 0 : index
    %c0_58 = arith.constant 0 : index
    %186 = vector.load %arg14[%185, %c0_57, %c0_58] : memref<8x8x512xf32, #tpu.memory_space<vmem>>, vector<1x8x512xf32>
    %187 = vector.shape_cast %186 : vector<1x8x512xf32> to vector<8x512xf32>
    %cst_59 = arith.constant dense<0.000000e+00> : vector<8x512xf32>
    %188 = tpu.matmul %180, %12, %cst_59 {dimension_numbers = #tpu.dot_dimension_numbers<[1], [0], [0], [1], [0, 0, 1, 1], [], []>} : vector<8x128xf32>, vector<128x512xf32>, vector<8x512xf32> -> vector<8x512xf32>
    %189 = arith.addf %187, %188 : vector<8x512xf32>
    %190 = vector.extract_strided_slice %189 {offsets = [0, 0], sizes = [8, 128], strides = [1, 1]} : vector<8x512xf32> to vector<8x128xf32>
    %191 = arith.negf %190 : vector<8x128xf32>
    %192 = math.exp %191 : vector<8x128xf32>
    %cst_60 = arith.constant 1.000000e+00 : f32
    %193 = vector.broadcast %cst_60 : f32 to vector<8x128xf32>
    %194 = arith.addf %193, %192 : vector<8x128xf32>
    %195 = arith.divf %193, %194 : vector<8x128xf32>
    %196 = vector.extract_strided_slice %189 {offsets = [0, 128], sizes = [8, 128], strides = [1, 1]} : vector<8x512xf32> to vector<8x128xf32>
    %197 = arith.negf %196 : vector<8x128xf32>
    %198 = math.exp %197 : vector<8x128xf32>
    %cst_61 = arith.constant 1.000000e+00 : f32
    %199 = vector.broadcast %cst_61 : f32 to vector<8x128xf32>
    %200 = arith.addf %199, %198 : vector<8x128xf32>
    %201 = arith.divf %199, %200 : vector<8x128xf32>
    %202 = vector.extract_strided_slice %189 {offsets = [0, 256], sizes = [8, 128], strides = [1, 1]} : vector<8x512xf32> to vector<8x128xf32>
    %203 = math.tanh %202 : vector<8x128xf32>
    %204 = vector.extract_strided_slice %189 {offsets = [0, 384], sizes = [8, 128], strides = [1, 1]} : vector<8x512xf32> to vector<8x128xf32>
    %205 = arith.negf %204 : vector<8x128xf32>
    %206 = math.exp %205 : vector<8x128xf32>
    %cst_62 = arith.constant 1.000000e+00 : f32
    %207 = vector.broadcast %cst_62 : f32 to vector<8x128xf32>
    %208 = arith.addf %207, %206 : vector<8x128xf32>
    %209 = arith.divf %207, %208 : vector<8x128xf32>
    %210 = arith.mulf %201, %178 : vector<8x128xf32>
    %211 = arith.mulf %195, %203 : vector<8x128xf32>
    %212 = arith.addf %210, %211 : vector<8x128xf32>
    %213 = math.tanh %212 : vector<8x128xf32>
    %214 = arith.mulf %209, %213 : vector<8x128xf32>
    %215 = arith.index_cast %c5_i32 : i32 to index
    %c0_63 = arith.constant 0 : index
    %c0_64 = arith.constant 0 : index
    %216 = vector.load %arg15[%215, %c0_63, %c0_64] : memref<8x8x128xf32, #tpu.memory_space<vmem>>, vector<1x8x128xf32>
    %217 = vector.shape_cast %216 : vector<1x8x128xf32> to vector<8x128xf32>
    %218 = vector.shape_cast %214 : vector<8x128xf32> to vector<1x8x128xf32>
    tpu.vector_store %arg15[%215, %c0_63, %c0_64], %218 {strides = array<i32>} : memref<8x8x128xf32, #tpu.memory_space<vmem>>, vector<1x8x128xf32>,
    %c6_i32 = arith.constant 6 : i32
    %219 = arith.index_cast %c6_i32 : i32 to index
    %c0_65 = arith.constant 0 : index
    %c0_66 = arith.constant 0 : index
    %220 = vector.load %arg14[%219, %c0_65, %c0_66] : memref<8x8x512xf32, #tpu.memory_space<vmem>>, vector<1x8x512xf32>
    %221 = vector.shape_cast %220 : vector<1x8x512xf32> to vector<8x512xf32>
    %cst_67 = arith.constant dense<0.000000e+00> : vector<8x512xf32>
    %222 = tpu.matmul %214, %12, %cst_67 {dimension_numbers = #tpu.dot_dimension_numbers<[1], [0], [0], [1], [0, 0, 1, 1], [], []>} : vector<8x128xf32>, vector<128x512xf32>, vector<8x512xf32> -> vector<8x512xf32>
    %223 = arith.addf %221, %222 : vector<8x512xf32>
    %224 = vector.extract_strided_slice %223 {offsets = [0, 0], sizes = [8, 128], strides = [1, 1]} : vector<8x512xf32> to vector<8x128xf32>
    %225 = arith.negf %224 : vector<8x128xf32>
    %226 = math.exp %225 : vector<8x128xf32>
    %cst_68 = arith.constant 1.000000e+00 : f32
    %227 = vector.broadcast %cst_68 : f32 to vector<8x128xf32>
    %228 = arith.addf %227, %226 : vector<8x128xf32>
    %229 = arith.divf %227, %228 : vector<8x128xf32>
    %230 = vector.extract_strided_slice %223 {offsets = [0, 128], sizes = [8, 128], strides = [1, 1]} : vector<8x512xf32> to vector<8x128xf32>
    %231 = arith.negf %230 : vector<8x128xf32>
    %232 = math.exp %231 : vector<8x128xf32>
    %cst_69 = arith.constant 1.000000e+00 : f32
    %233 = vector.broadcast %cst_69 : f32 to vector<8x128xf32>
    %234 = arith.addf %233, %232 : vector<8x128xf32>
    %235 = arith.divf %233, %234 : vector<8x128xf32>
    %236 = vector.extract_strided_slice %223 {offsets = [0, 256], sizes = [8, 128], strides = [1, 1]} : vector<8x512xf32> to vector<8x128xf32>
    %237 = math.tanh %236 : vector<8x128xf32>
    %238 = vector.extract_strided_slice %223 {offsets = [0, 384], sizes = [8, 128], strides = [1, 1]} : vector<8x512xf32> to vector<8x128xf32>
    %239 = arith.negf %238 : vector<8x128xf32>
    %240 = math.exp %239 : vector<8x128xf32>
    %cst_70 = arith.constant 1.000000e+00 : f32
    %241 = vector.broadcast %cst_70 : f32 to vector<8x128xf32>
    %242 = arith.addf %241, %240 : vector<8x128xf32>
    %243 = arith.divf %241, %242 : vector<8x128xf32>
    %244 = arith.mulf %235, %212 : vector<8x128xf32>
    %245 = arith.mulf %229, %237 : vector<8x128xf32>
    %246 = arith.addf %244, %245 : vector<8x128xf32>
    %247 = math.tanh %246 : vector<8x128xf32>
    %248 = arith.mulf %243, %247 : vector<8x128xf32>
    %249 = arith.index_cast %c6_i32 : i32 to index
    %c0_71 = arith.constant 0 : index
    %c0_72 = arith.constant 0 : index
    %250 = vector.load %arg15[%249, %c0_71, %c0_72] : memref<8x8x128xf32, #tpu.memory_space<vmem>>, vector<1x8x128xf32>
    %251 = vector.shape_cast %250 : vector<1x8x128xf32> to vector<8x128xf32>
    %252 = vector.shape_cast %248 : vector<8x128xf32> to vector<1x8x128xf32>
    tpu.vector_store %arg15[%249, %c0_71, %c0_72], %252 {strides = array<i32>} : memref<8x8x128xf32, #tpu.memory_space<vmem>>, vector<1x8x128xf32>,
    %c7_i32 = arith.constant 7 : i32
    %253 = arith.index_cast %c7_i32 : i32 to index
    %c0_73 = arith.constant 0 : index
    %c0_74 = arith.constant 0 : index
    %254 = vector.load %arg14[%253, %c0_73, %c0_74] : memref<8x8x512xf32, #tpu.memory_space<vmem>>, vector<1x8x512xf32>
    %255 = vector.shape_cast %254 : vector<1x8x512xf32> to vector<8x512xf32>
    %cst_75 = arith.constant dense<0.000000e+00> : vector<8x512xf32>
    %256 = tpu.matmul %248, %12, %cst_75 {dimension_numbers = #tpu.dot_dimension_numbers<[1], [0], [0], [1], [0, 0, 1, 1], [], []>} : vector<8x128xf32>, vector<128x512xf32>, vector<8x512xf32> -> vector<8x512xf32>
    %257 = arith.addf %255, %256 : vector<8x512xf32>
    %258 = vector.extract_strided_slice %257 {offsets = [0, 0], sizes = [8, 128], strides = [1, 1]} : vector<8x512xf32> to vector<8x128xf32>
    %259 = arith.negf %258 : vector<8x128xf32>
    %260 = math.exp %259 : vector<8x128xf32>
    %cst_76 = arith.constant 1.000000e+00 : f32
    %261 = vector.broadcast %cst_76 : f32 to vector<8x128xf32>
    %262 = arith.addf %261, %260 : vector<8x128xf32>
    %263 = arith.divf %261, %262 : vector<8x128xf32>
    %264 = vector.extract_strided_slice %257 {offsets = [0, 128], sizes = [8, 128], strides = [1, 1]} : vector<8x512xf32> to vector<8x128xf32>
    %265 = arith.negf %264 : vector<8x128xf32>
    %266 = math.exp %265 : vector<8x128xf32>
    %cst_77 = arith.constant 1.000000e+00 : f32
    %267 = vector.broadcast %cst_77 : f32 to vector<8x128xf32>
    %268 = arith.addf %267, %266 : vector<8x128xf32>
    %269 = arith.divf %267, %268 : vector<8x128xf32>
    %270 = vector.extract_strided_slice %257 {offsets = [0, 256], sizes = [8, 128], strides = [1, 1]} : vector<8x512xf32> to vector<8x128xf32>
    %271 = math.tanh %270 : vector<8x128xf32>
    %272 = vector.extract_strided_slice %257 {offsets = [0, 384], sizes = [8, 128], strides = [1, 1]} : vector<8x512xf32> to vector<8x128xf32>
    %273 = arith.negf %272 : vector<8x128xf32>
    %274 = math.exp %273 : vector<8x128xf32>
    %cst_78 = arith.constant 1.000000e+00 : f32
    %275 = vector.broadcast %cst_78 : f32 to vector<8x128xf32>
    %276 = arith.addf %275, %274 : vector<8x128xf32>
    %277 = arith.divf %275, %276 : vector<8x128xf32>
    %278 = arith.mulf %269, %246 : vector<8x128xf32>
    %279 = arith.mulf %263, %271 : vector<8x128xf32>
    %280 = arith.addf %278, %279 : vector<8x128xf32>
    %281 = math.tanh %280 : vector<8x128xf32>
    %282 = arith.mulf %277, %281 : vector<8x128xf32>
    %283 = arith.index_cast %c7_i32 : i32 to index
    %c0_79 = arith.constant 0 : index
    %c0_80 = arith.constant 0 : index
    %284 = vector.load %arg15[%283, %c0_79, %c0_80] : memref<8x8x128xf32, #tpu.memory_space<vmem>>, vector<1x8x128xf32>
    %285 = vector.shape_cast %284 : vector<1x8x128xf32> to vector<8x128xf32>
    %286 = vector.shape_cast %282 : vector<8x128xf32> to vector<1x8x128xf32>
    tpu.vector_store %arg15[%283, %c0_79, %c0_80], %286 {strides = array<i32>} : memref<8x8x128xf32, #tpu.memory_space<vmem>>, vector<1x8x128xf32>,
    %c8_i32 = arith.constant 8 : i32
    %c0_81 = arith.constant 0 : index
    %c0_82 = arith.constant 0 : index
    %287 = vector.load %arg12[%c0_81, %c0_82] : memref<8x128xf32, #tpu.memory_space<vmem>>, vector<8x128xf32>
    tpu.vector_store %arg12[%c0_81, %c0_82], %282 {strides = array<i32>} : memref<8x128xf32, #tpu.memory_space<vmem>>, vector<8x128xf32>,
    %c0_83 = arith.constant 0 : index
    %c0_84 = arith.constant 0 : index
    %288 = vector.load %arg13[%c0_83, %c0_84] : memref<8x128xf32, #tpu.memory_space<vmem>>, vector<8x128xf32>
    tpu.vector_store %arg13[%c0_83, %c0_84], %280 {strides = array<i32>} : memref<8x128xf32, #tpu.memory_space<vmem>>, vector<8x128xf32>,
    %c0_85 = arith.constant 0 : index
    %c0_86 = arith.constant 0 : index
    %c0_87 = arith.constant 0 : index
    %289 = vector.load %arg15[%c0_85, %c0_86, %c0_87] : memref<8x8x128xf32, #tpu.memory_space<vmem>>, vector<8x8x128xf32>
    %290 = vector.shape_cast %289 : vector<8x8x128xf32> to vector<64x128xf32>
    %c0_88 = arith.constant 0 : index
    %c0_89 = arith.constant 0 : index
    %291 = vector.load %arg7[%c0_88, %c0_89] : memref<128x128xf32, #tpu.memory_space<vmem>>, vector<128x128xf32>
    %cst_90 = arith.constant dense<0.000000e+00> : vector<64x128xf32>
    %292 = tpu.matmul %290, %291, %cst_90 {dimension_numbers = #tpu.dot_dimension_numbers<[1], [0], [0], [1], [0, 0, 1, 1], [], []>} : vector<64x128xf32>, vector<128x128xf32>, vector<64x128xf32> -> vector<64x128xf32>
    %c0_91 = arith.constant 0 : index
    %c0_92 = arith.constant 0 : index
    %293 = vector.load %arg8[%c0_91, %c0_92] : memref<1x128xf32, #tpu.memory_space<vmem>>, vector<1x128xf32>
    %294 = vector.broadcast %293 : vector<1x128xf32> to vector<64x128xf32>
    %295 = arith.addf %292, %294 : vector<64x128xf32>
    %296 = vector.shape_cast %295 : vector<64x128xf32> to vector<8x8x128xf32>
    %c0_93 = arith.constant 0 : index
    %c0_94 = arith.constant 0 : index
    %c0_95 = arith.constant 0 : index
    %297 = vector.load %arg9[%c0_93, %c0_94, %c0_95] : memref<8x8x128xf32, #tpu.memory_space<vmem>>, vector<8x8x128xf32>
    tpu.vector_store %arg9[%c0_93, %c0_94, %c0_95], %296 {strides = array<i32>} : memref<8x8x128xf32, #tpu.memory_space<vmem>>, vector<8x8x128xf32>,
    %c0_i32_96 = arith.constant 0 : i32
    %298 = arith.cmpi eq, %arg0, %c0_i32_96 : i32
    %299 = arith.extui %298 : i1 to i32
    %c0_i32_97 = arith.constant 0 : i32
    %300 = arith.cmpi ne, %299, %c0_i32_97 : i32
    scf.if %300 {
      %c0_98 = arith.constant 0 : index
      %c0_99 = arith.constant 0 : index
      %301 = vector.load %arg12[%c0_98, %c0_99] : memref<8x128xf32, #tpu.memory_space<vmem>>, vector<8x128xf32>
      %c0_100 = arith.constant 0 : index
      %c0_101 = arith.constant 0 : index
      %302 = vector.load %arg10[%c0_100, %c0_101] : memref<8x128xf32, #tpu.memory_space<vmem>>, vector<8x128xf32>
      tpu.vector_store %arg10[%c0_100, %c0_101], %301 {strides = array<i32>} : memref<8x128xf32, #tpu.memory_space<vmem>>, vector<8x128xf32>,
      %c0_102 = arith.constant 0 : index
      %c0_103 = arith.constant 0 : index
      %303 = vector.load %arg13[%c0_102, %c0_103] : memref<8x128xf32, #tpu.memory_space<vmem>>, vector<8x128xf32>
      %c0_104 = arith.constant 0 : index
      %c0_105 = arith.constant 0 : index
      %304 = vector.load %arg11[%c0_104, %c0_105] : memref<8x128xf32, #tpu.memory_space<vmem>>, vector<8x128xf32>
      tpu.vector_store %arg11[%c0_104, %c0_105], %303 {strides = array<i32>} : memref<8x128xf32, #tpu.memory_space<vmem>>, vector<8x128xf32>,
    } else {
    }
    return
  }
  func.func @transform_0(%arg0: i32) -> (i32, i32, i32) {
    %c0_i32 = arith.constant 0 : i32
    %c0_i32_0 = arith.constant 0 : i32
    %c0_i32_1 = arith.constant 0 : i32
    return %arg0, %c0_i32, %c0_i32_0 : i32, i32, i32
  }
  func.func @transform_1(%arg0: i32) -> (i32, i32) {
    %c0_i32 = arith.constant 0 : i32
    %c0_i32_0 = arith.constant 0 : i32
    %c0_i32_1 = arith.constant 0 : i32
    return %c0_i32, %c0_i32_0 : i32, i32
  }
  func.func @transform_2(%arg0: i32) -> (i32, i32) {
    %c0_i32 = arith.constant 0 : i32
    %c0_i32_0 = arith.constant 0 : i32
    %c0_i32_1 = arith.constant 0 : i32
    return %c0_i32, %c0_i32_0 : i32, i32
  }
  func.func @transform_3(%arg0: i32) -> (i32, i32) {
    %c0_i32 = arith.constant 0 : i32
    %c0_i32_0 = arith.constant 0 : i32
    %c0_i32_1 = arith.constant 0 : i32
    return %c0_i32, %c0_i32_0 : i32, i32
  }
  func.func @transform_4(%arg0: i32) -> (i32, i32) {
    %c0_i32 = arith.constant 0 : i32
    %c0_i32_0 = arith.constant 0 : i32
    %c0_i32_1 = arith.constant 0 : i32
    return %c0_i32, %c0_i32_0 : i32, i32
  }
  func.func @transform_5(%arg0: i32) -> (i32, i32) {
    %c0_i32 = arith.constant 0 : i32
    %c0_i32_0 = arith.constant 0 : i32
    %c0_i32_1 = arith.constant 0 : i32
    return %c0_i32, %c0_i32_0 : i32, i32
  }
  func.func @transform_6(%arg0: i32) -> (i32, i32) {
    %c0_i32 = arith.constant 0 : i32
    %c0_i32_0 = arith.constant 0 : i32
    %c0_i32_1 = arith.constant 0 : i32
    return %c0_i32, %c0_i32_0 : i32, i32
  }
  func.func @transform_7(%arg0: i32) -> (i32, i32) {
    %c0_i32 = arith.constant 0 : i32
    %c0_i32_0 = arith.constant 0 : i32
    %c0_i32_1 = arith.constant 0 : i32
    return %c0_i32, %c0_i32_0 : i32, i32
  }
  func.func @transform_8(%arg0: i32) -> (i32, i32, i32) {
    %c0_i32 = arith.constant 0 : i32
    %c0_i32_0 = arith.constant 0 : i32
    %c0_i32_1 = arith.constant 0 : i32
    return %arg0, %c0_i32, %c0_i32_0 : i32, i32, i32
  }
  func.func @transform_9(%arg0: i32) -> (i32, i32) {
    %c0_i32 = arith.constant 0 : i32
    %c0_i32_0 = arith.constant 0 : i32
    %c0_i32_1 = arith.constant 0 : i32
    return %c0_i32, %c0_i32_0 : i32, i32
  }
  func.func @transform_10(%arg0: i32) -> (i32, i32) {
    %c0_i32 = arith.constant 0 : i32
    %c0_i32_0 = arith.constant 0 : i32
    %c0_i32_1 = arith.constant 0 : i32
    return %c0_i32, %c0_i32_0 : i32, i32
  }
}

</mosaic_0001>

<bundles_post_ra>
// kernel: tpu_custom_call.1
= control target key start
LH: loop header
LB: loop body
LE: loop exit
PB: predicated region body
PF: predicated region fallthrough
CT: control target
= control target key end

     0   :  { %16 = vsyncpa [#allocation7], 0  ;;  %s3468_s0 = inlined_call_operand.hbm [shape: f32[8,8,32], index: 0, kind: input, shape index: {}]   ;;  %s3469_s1 = inlined_call_operand.hbm [shape: f32[8,128], index: 1, kind: input, shape index: {}]   ;;  %s3470_s2 = inlined_call_operand.hbm [shape: f32[8,128], index: 2, kind: input, shape index: {}]   ;;  %s3471_s3 = inlined_call_operand.hbm [shape: f32[32,512], index: 3, kind: input, shape index: {}]   ;;  %s3472_s4 = inlined_call_operand.hbm [shape: f32[128,512], index: 4, kind: input, shape index: {}]   ;;  %s3473_s5 = inlined_call_operand.vmem [shape: f32[1,512], index: 5, kind: input, shape index: {}]   ;;  %s3474_s6 = inlined_call_operand.hbm [shape: f32[128,128], index: 6, kind: input, shape index: {}]   ;;  %s3475_s7 = inlined_call_operand.vmem [shape: f32[1,128], index: 7, kind: input, shape index: {}]   ;;  %s3476_s8 = inlined_call_operand.hbm [shape: f32[8,8,128], index: 8, kind: output, shape index: {0}]   ;;  %s3477_s9 = inlined_call_operand.hbm [shape: f32[8,128], index: 9, kind: output, shape index: {1}]   ;;  %s3478_s10 = inlined_call_operand.hbm [shape: f32[8,128], index: 10, kind: output, shape index: {2}]  }
   0x1   :  { %17 = vsyncpa [#allocation10], 0 }
   0x2   :  { %18 = vsyncpa [#allocation13], 0 }
   0x3   :  { %19 = vsyncpa [#allocation16], 0 }
   0x4   :  { %20 = vsyncpa [#allocation8], 0  ;;  %s40_s15 = sshll.u32 %s3469_s1, 4  ;;  %s41_s15 = int_to_ptr.hbm [resolvable:$true] %s40_s15 }
   0x5   :  { %21 = vsyncpa [#allocation19], 0  ;;  %s2320_s16 = smov [#allocation9]   ;;  %s61_s20 = sshll.u32 %s3471_s3, 4  ;;  %s62_s20 = int_to_ptr.hbm [resolvable:$true] %s61_s20 }
   0x6   :  { %s42_s17 = sshll.u32 %s2320_s16, 4  ;;  %s2321_s21 = smov [#allocation12]   ;;  %s43_s17 = int_to_ptr.vmem [resolvable:$true] %s42_s17 }
   0x7   :  { %45 = dma.hbm_to_vmem [thread:$0]  %s41_s15, 128, %s43_s17, [#allocation10]  }
   0x8   :  { %s63_s22 = sshll.u32 %s2321_s21, 4  ;;  %s2322_s23 = smov 512   ;;  %s64_s22 = int_to_ptr.vmem [resolvable:$true] %s63_s22 }
   0x9   :  { %s2323_s24 = smov 32   ;;  %s26_s1 = sshll.u32 %s3468_s0, 4  ;;  %s27_s1 = int_to_ptr.hbm [resolvable:$true] %s26_s1 }
   0xa   :  { %69 = dma.hbm_to_vmem [thread:$0]  %s62_s20, 2048, %s64_s22, [#allocation13], %s2322_s23, %s2322_s23, %s2323_s24  }
   0xb   :  { %s2324_s27 = smov [#allocation6]   ;;  %s51_s3 = sshll.u32 %s3470_s2, 4  ;;  %s52_s3 = int_to_ptr.hbm [resolvable:$true] %s51_s3 }
   0xc   :  { %s28_s28 = sshll.u32 %s2324_s27, 4  ;;  %s2325_s11 = smov 128   ;;  %s29_s28 = int_to_ptr.vmem [resolvable:$true] %s28_s28 }
   0xd   :  { %s2326_s12 = smov 8   ;;  %s2327_s13 = smov [#allocation11]  }
   0xe   :  { %34 = dma.hbm_to_vmem [thread:$0]  %s27_s1, 1024, %s29_s28, [#allocation7], %s2325_s11, %s2325_s11, %s2326_s12  }
   0xf   :  { %s53_s14 = sshll.u32 %s2327_s13, 4  ;;  %s74_s0 = sshll.u32 %s3472_s4, 4  ;;  %s54_s14 = int_to_ptr.vmem [resolvable:$true] %s53_s14  ;;  %s75_s0 = int_to_ptr.hbm [resolvable:$true] %s74_s0 }
  0x10   :  { %56 = dma.hbm_to_vmem [thread:$0]  %s52_s3, 128, %s54_s14, [#allocation10]  }
  0x11   :  { %s89_s2 = sshll.u32 %s3474_s6, 4  ;;  %s2328_s19 = smov [#allocation14]   ;;  %s90_s2 = int_to_ptr.hbm [resolvable:$true] %s89_s2 }
  0x12   :  { %s76_s20 = sshll.u32 %s2328_s19, 4  ;;  %s2329_s21 = smov [#allocation15]   ;;  %s77_s20 = int_to_ptr.vmem [resolvable:$true] %s76_s20 }
  0x13   :  { %82 = dma.hbm_to_vmem [thread:$0]  %s75_s0, 8192, %s77_s20, [#allocation13], %s2322_s23, %s2322_s23, %s2323_s24  }
  0x14   :  { %s91_s22 = sshll.u32 %s2329_s21, 4  ;;  %s92_s22 = int_to_ptr.vmem [resolvable:$true] %s91_s22 }
  0x15   :  { %97 = dma.hbm_to_vmem [thread:$0]  %s90_s2, 2048, %s92_s22, [#allocation16], %s2325_s11, %s2325_s11, %s2326_s12  }
  0x16   :  { %2308 = dma.done.wait [#allocation7], 1024  }
  0x17   :  { %2309 = vsyncadd [#allocation7], 4294966272 }
  0x18   :  { %2310 = dma.done.wait [#allocation10], 256  }
  0x19   :  { %2311 = vsyncadd [#allocation10], 4294967040 }
  0x1a   :  { %2312 = dma.done.wait [#allocation13], 10240  }
  0x1b   :  { %2313 = vsyncadd [#allocation13], 4294957056 }
  0x1c   :  { %2314 = dma.done.wait [#allocation16], 2048  }
  0x1d   :  { %2315 = vsyncadd [#allocation16], 4294965248  ;;  %v152_v0 = vld [vmem:[#allocation12 + $0x60] sm:$0xff]  ;;  %v154_v1 = vld [vmem:[#allocation12 + $0x70] sm:$0xff]  ;;  %vm166_vm0 = vcmask 261120   ;;  %s1789_s1 = sshll.u32 %s3477_s9, 4  ;;  %s1790_s1 = int_to_ptr.hbm [resolvable:$true] %s1789_s1 }
  0x1e   :  { %v148_v2 = vld [vmem:[#allocation12 + $0x40] sm:$0xff]  ;;  %1878 = vmatpush.msra.mxu1 %v152_v0  ;;  %1879 = vmatpush.msra.mxu3 %v152_v0  ;;  %v150_v3 = vld [vmem:[#allocation12 + $0x50] sm:$0xff]  ;;  %v2414_v9 = vld [vmem:[#allocation6 + $0x28] sm:$0xff]  ;;  %s2331_s27 = smov [#allocation20]   ;;  %s1800_s3 = sshll.u32 %s3478_s10, 4  ;;  %s1801_s3 = int_to_ptr.hbm [resolvable:$true] %s1800_s3 }
  0x1f   :  { %285 = vmatpush.msra.mxu2 %v154_v1  ;;  %v144_v4 = vld [vmem:[#allocation12 + $0x20] sm:$0xff]  ;;  %203 = vmatpush.msra.mxu0 %v152_v0  ;;  %v146_v5 = vld [vmem:[#allocation12 + $0x30] sm:$0xff]  ;;  %v155_v11 = vld [vmem:[#allocation12 + $0x78] sm:$0xff]  ;;  %s1798_s28 = sshll.u32 %s2331_s27, 4  ;;  %s2332_s9 = smov [#allocation17]   ;;  %s1799_s28 = int_to_ptr.vmem [resolvable:$true] %s1798_s28 }
  0x20   :  { %1880 = vmatpush.msra.mxu1 %v148_v2  ;;  %1881 = vmatpush.msra.mxu3 %v148_v2  ;;  %v140_v6 = vld [vmem:[#allocation12] sm:$0xff]  ;;  %v142_v7 = vld [vmem:[#allocation12 + $0x10] sm:$0xff]  ;;  %v153_v12 = vld [vmem:[#allocation12 + $0x68] sm:$0xff]  ;;  %s1773_s13 = sshll.u32 %s2332_s9, 4  ;;  %s1775_s16 = sshll.u32 %s3476_s8, 4  ;;  %s1774_s13 = int_to_ptr.vmem [resolvable:$true] %s1773_s13  ;;  %s1776_s16 = int_to_ptr.hbm [resolvable:$true] %s1775_s16 }
  0x21   :  { %286 = vmatpush.msra.mxu2 %v150_v3  ;;  %204 = vmatpush.msra.mxu0 %v148_v2  ;;  %v2412_v8 = vld [vmem:[#allocation6 + $0x20] sm:$0xff]  ;;  %v2420_v13 = vld [vmem:[#allocation14 + $0x1e0] sm:$0xff]  ;;  %v149_v14 = vld [vmem:[#allocation12 + $0x48] sm:$0xff] }
  0x22   :  { %1882 = vmatpush.msra.mxu1 %v144_v4  ;;  %1883 = vmatpush.msra.mxu3 %v144_v4  ;;  %v2416_v10 = vld [vmem:[#allocation6] sm:$0xff]  ;;  %3574 = vst [vmem:[#allocation27_spill] sm:$0xff] %v2420_v13  ;;  %v151_v15 = vld [vmem:[#allocation12 + $0x58] sm:$0xff]  ;;  %v2426_v16 = vld [vmem:[#allocation14 + $0x1c0] sm:$0xff] }
  0x23   :  { %287 = vmatpush.msra.mxu2 %v146_v5  ;;  %205 = vmatpush.msra.mxu0 %v144_v4  ;;  %v145_v17 = vld [vmem:[#allocation12 + $0x28] sm:$0xff]  ;;  %v147_v18 = vld [vmem:[#allocation12 + $0x38] sm:$0xff]  ;;  %v2429_v19 = vld [vmem:[#allocation14 + $0x1a0] sm:$0xff] }
  0x24   :  { %1884 = vmatpush.msra.mxu1 %v140_v6  ;;  %1885 = vmatpush.msra.mxu3 %v140_v6  ;;  %v141_v20 = vld [vmem:[#allocation12 + $0x8] sm:$0xff]  ;;  %v143_v21 = vld [vmem:[#allocation12 + $0x18] sm:$0xff]  ;;  %v2434_v22 = vld [vmem:[#allocation6 + $0x30] sm:$0xff] }
  0x25   :  { %288 = vmatpush.msra.mxu2 %v142_v7  ;;  %1826 = vmatmul.msk.f32.vlgmr.msra.gmra.mxu1 %vm166_vm0, %v2412_v8  ;;  %v2436_v23 = vld [vmem:[#allocation6 + $0x8] sm:$0xff]  ;;  %v2439_v24 = vld [vmem:[#allocation14 + $0x1e8] sm:$0xff]  ;;  %v2442_v25 = vld [vmem:[#allocation14 + $0x180] sm:$0xff] }
  0x26   :  { %1827 = vmatmul.msk.f32.vlgmr.msra.gmra.mxu3 %vm166_vm0, %v2414_v9  ;;  %1838 = vmatmul.msk.f32.vlgmr.msra.gmra.mxu2 %vm166_vm0, %v2416_v10  ;;  %v2444_v26 = vld [vmem:[#allocation14 + $0x1f8] sm:$0xff]  ;;  %v2450_v27 = vld [vmem:[#allocation14 + $0x1c8] sm:$0xff]  ;;  %v2454_v28 = vld [vmem:[#allocation14 + $0x160] sm:$0xff] }
  0x27   :  { %326 = vmatpush.msrb.mxu3 %v155_v11  ;;  %244 = vmatpush.msrb.mxu1 %v153_v12  ;;  %v2457_v29 = vld [vmem:[#allocation14 + $0x1d8] sm:$0xff]  ;;  %v2461_v30 = vld [vmem:[#allocation14 + $0x1a8] sm:$0xff]  ;;  %v2463_v31 = vld [vmem:[#allocation14 + $0x140] sm:$0xff] }
  0x28   :  { %457 = vmatpush.msrb.mxu2 %v2420_v13  ;;  %206 = vmatpush.msra.mxu0 %v140_v6  ;;  %v2466_v32 = vld [vmem:[#allocation14 + $0x1b8] sm:$0xff]  ;;  %v2471_v33 = vld [vmem:[#allocation14 + $0x188] sm:$0xff]  ;;  %v2477_v35 = vld [vmem:[#allocation6 + $0x10] sm:$0xff] }
  0x29   :  { %245 = vmatpush.msrb.mxu1 %v149_v14  ;;  %327 = vmatpush.msrb.mxu3 %v151_v15  ;;  %v2473_v34 = vld [vmem:[#allocation6 + $0x38] sm:$0xff]  ;;  %v2483_v37 = vld [vmem:[#allocation14 + $0x120] sm:$0xff]  ;;  %v2486_v38 = vld [vmem:[#allocation14 + $0x198] sm:$0xff] }
  0x2a   :  { %458 = vmatpush.msrb.mxu2 %v2426_v16  ;;  %1822 = vmatmul.msk.f32.vlgmr.msra.gmra.mxu0 %vm166_vm0, %v2416_v10  ;;  %v2481_v36 = vld [vmem:[#allocation14 + $0x168] sm:$0xff]  ;;  %v2497_v40 = vld [vmem:[#allocation14 + $0x100] sm:$0xff]  ;;  %v2500_v41 = vld [vmem:[#allocation14 + $0x178] sm:$0xff] }
  0x2b   :  { %246 = vmatpush.msrb.mxu1 %v145_v17  ;;  %328 = vmatpush.msrb.mxu3 %v147_v18  ;;  %v2493_v39 = vld [vmem:[#allocation14 + $0x148] sm:$0xff]  ;;  %v2506_v43 = vld [vmem:[#allocation14 + $0xe0] sm:$0xff]  ;;  %v2509_v44 = vld [vmem:[#allocation14 + $0x158] sm:$0xff] }
  0x2c   :  { %459 = vmatpush.msrb.mxu2 %v2429_v19  ;;  %610 = vmatpush.msrb.mxu0 %v2420_v13  ;;  %v2504_v42 = vld [vmem:[#allocation14 + $0x128] sm:$0xff]  ;;  %v2523_v47 = vld [vmem:[#allocation14 + $0x138] sm:$0xff]  ;;  %v2525_v48 = vld [vmem:[#allocation14 + $0xc0] sm:$0xff] }
  0x2d   :  { %247 = vmatpush.msrb.mxu1 %v141_v20  ;;  %329 = vmatpush.msrb.mxu3 %v143_v21  ;;  %v2515_v45 = vld [vmem:[#allocation14 + $0x108] sm:$0xff]  ;;  %v2535_v50 = vld [vmem:[#allocation14 + $0x118] sm:$0xff]  ;;  %v2539_v51 = vld [vmem:[#allocation14 + $0xa0] sm:$0xff] }
  0x2e   :  { %1828 = vmatmul.msk.f32.gmra.mxu3 %vm166_vm0, %v2434_v22  ;;  %1830 = vmatmul.msk.f32.vlgmr.msrb.gmra.mxu1 %vm166_vm0, %v2416_v10  ;;  %v2519_v46 = vld [vmem:[#allocation6 + $0x18] sm:$0xff]  ;;  %v2546_v53 = vld [vmem:[#allocation14 + $0xf8] sm:$0xff]  ;;  %v2548_v54 = vld [vmem:[#allocation14 + $0x80] sm:$0xff] }
  0x2f   :  { %1839 = vmatmul.msk.f32.gmra.mxu2 %vm166_vm0, %v2436_v23  ;;  %477 = vmatpush.msra.mxu1 %v2439_v24  ;;  %v2528_v49 = vld [vmem:[#allocation14 + $0xe8] sm:$0xff]  ;;  %3575 = vst [vmem:[#allocation28_spill] sm:$0xff] %v2548_v54  ;;  %v2557_v56 = vld [vmem:[#allocation14 + $0xd8] sm:$0xff]  ;;  %v2562_v57 = vld [vmem:[#allocation14 + $0x60] sm:$0xff] }
  0x30   :  { %460 = vmatpush.msrb.mxu2 %v2442_v25  ;;  %517 = vmatpush.msra.mxu3 %v2444_v26  ;;  %v2542_v52 = vld [vmem:[#allocation14 + $0xc8] sm:$0xff]  ;;  %3577 = vst [vmem:[#allocation30_spill] sm:$0xff] %v2562_v57  ;;  %v2575_v59 = vld [vmem:[#allocation14 + $0x40] sm:$0xff]  ;;  %v2579_v60 = vld [vmem:[#allocation14 + $0xb8] sm:$0xff] }
  0x31   :  { %478 = vmatpush.msra.mxu1 %v2450_v27  ;;  %611 = vmatpush.msrb.mxu0 %v2426_v16  ;;  %v2551_v55 = vld [vmem:[#allocation14 + $0xa8] sm:$0xff]  ;;  %3579 = vst [vmem:[#allocation32_spill] sm:$0xff] %v2575_v59  ;;  %v2584_v62 = vld [vmem:[#allocation14 + $0x20] sm:$0xff]  ;;  %v2593_v0 = vld [vmem:[#allocation14 + $0x98] sm:$0xff] }
  0x32   :  { %461 = vmatpush.msrb.mxu2 %v2454_v28  ;;  %518 = vmatpush.msra.mxu3 %v2457_v29  ;;  %3576 = vst [vmem:[#allocation29_spill] sm:$0xff] %v2551_v55  ;;  %v2565_v58 = vld [vmem:[#allocation14 + $0x88] sm:$0xff]  ;;  %v2599_v2 = vld [vmem:[#allocation14] sm:$0xff]  ;;  %v2609_v4 = vld [vmem:[#allocation14 + $0x1f0] sm:$0xff] }
  0x33   :  { %479 = vmatpush.msra.mxu1 %v2461_v30  ;;  %612 = vmatpush.msrb.mxu0 %v2429_v19  ;;  %3578 = vst [vmem:[#allocation31_spill] sm:$0xff] %v2565_v58  ;;  %v2581_v61 = vld [vmem:[#allocation14 + $0x68] sm:$0xff]  ;;  %v2615_v5 = vld [vmem:[#allocation14 + $0x1d0] sm:$0xff]  ;;  %v2617_v6 = vld [vmem:[#allocation14 + $0x78] sm:$0xff] }
  0x34   :  { %462 = vmatpush.msrb.mxu2 %v2463_v31  ;;  %519 = vmatpush.msra.mxu3 %v2466_v32  ;;  %3580 = vst [vmem:[#allocation33_spill] sm:$0xff] %v2579_v60  ;;  %v2588_v63 = vld [vmem:[#allocation14 + $0x48] sm:$0xff]  ;;  %v2619_v7 = vld [vmem:[#allocation14 + $0x58] sm:$0xff]  ;;  %v2630_v11 = vld [vmem:[#allocation14 + $0x190] sm:$0xff] }
  0x35   :  { %480 = vmatpush.msra.mxu1 %v2471_v33  ;;  %613 = vmatpush.msrb.mxu0 %v2442_v25  ;;  %3581 = vst [vmem:[#allocation34_spill] sm:$0xff] %v2581_v61  ;;  %v2595_v1 = vld [vmem:[#allocation14 + $0x28] sm:$0xff]  ;;  %v2641_v12 = vld [vmem:[#allocation14 + $0x170] sm:$0xff]  ;;  %v2643_v14 = vld [vmem:[#allocation14 + $0x38] sm:$0xff] }
  0x36   :  { %1829 = vmatmul.msk.f32.gmra.mxu3 %vm166_vm0, %v2473_v34  ;;  %1831 = vmatmul.msk.f32.gmra.mxu1 %vm166_vm0, %v2436_v23  ;;  %3582 = vst [vmem:[#allocation35_spill] sm:$0xff] %v2584_v62  ;;  %v2602_v3 = vld [vmem:[#allocation14 + $0x8] sm:$0xff]  ;;  %v2645_v15 = vld [vmem:[#allocation14 + $0x18] sm:$0xff]  ;;  %v2651_v17 = vld [vmem:[#allocation14 + $0x150] sm:$0xff] }
  0x37   :  { %1840 = vmatmul.msk.f32.gmra.mxu2 %vm166_vm0, %v2477_v35  ;;  %481 = vmatpush.msra.mxu1 %v2481_v36  ;;  %3583 = vst [vmem:[#allocation36_spill] sm:$0xff] %v2588_v63  ;;  %v2656_v18 = vld [vmem:[#allocation14 + $0x130] sm:$0xff] }
  0x38   :  { %463 = vmatpush.msrb.mxu2 %v2483_v37  ;;  %520 = vmatpush.msra.mxu3 %v2486_v38  ;;  %3584 = vst [vmem:[#allocation37_spill] sm:$0xff] %v2593_v0  ;;  %v2662_v20 = vld [vmem:[#allocation14 + $0x110] sm:$0xff] }
  0x39   :  { %482 = vmatpush.msra.mxu1 %v2493_v39  ;;  %1823 = vmatmul.msk.f32.gmra.mxu0 %vm166_vm0, %v2436_v23  ;;  %3585 = vst [vmem:[#allocation38_spill] sm:$0xff] %v2595_v1  ;;  %v2672_v21 = vld [vmem:[#allocation14 + $0xf0] sm:$0xff] }
  0x3a   :  { %464 = vmatpush.msrb.mxu2 %v2497_v40  ;;  %521 = vmatpush.msra.mxu3 %v2500_v41  ;;  %3586 = vst [vmem:[#allocation39_spill] sm:$0xff] %v2599_v2 }
  0x3b   :  { %483 = vmatpush.msra.mxu1 %v2504_v42  ;;  %614 = vmatpush.msrb.mxu0 %v2454_v28  ;;  %3587 = vst [vmem:[#allocation40_spill] sm:$0xff] %v2602_v3 }
  0x3c   :  { %465 = vmatpush.msrb.mxu2 %v2506_v43  ;;  %522 = vmatpush.msra.mxu3 %v2509_v44  ;;  %3588 = vst [vmem:[#allocation41_spill] sm:$0xff] %v2617_v6 }
  0x3d   :  { %484 = vmatpush.msra.mxu1 %v2515_v45  ;;  %615 = vmatpush.msrb.mxu0 %v2463_v31  ;;  %3589 = vst [vmem:[#allocation42_spill] sm:$0xff] %v2619_v7 }
  0x3e   :  { %1832 = vmatmul.msk.f32.gmra.mxu1 %vm166_vm0, %v2477_v35  ;;  %1846 = vmatmul.msk.f32.vlgmr.msrb.gmra.mxu3 %vm166_vm0, %v2416_v10  ;;  %v2624_v10 = vld [vmem:[#allocation14 + $0x1b0] sm:$0xff]  ;;  %3590 = vst [vmem:[#allocation43_spill] sm:$0xff] %v2643_v14 }
  0x3f   :  { %1841 = vmatmul.msk.f32.gmra.mxu2 %vm166_vm0, %v2519_v46  ;;  %523 = vmatpush.msra.mxu3 %v2523_v47  ;;  %3591 = vst [vmem:[#allocation44_spill] sm:$0xff] %v2645_v15 }
  0x40   :  { %466 = vmatpush.msrb.mxu2 %v2525_v48  ;;  %485 = vmatpush.msra.mxu1 %v2528_v49 }
  0x41   :  { %524 = vmatpush.msra.mxu3 %v2535_v50  ;;  %616 = vmatpush.msrb.mxu0 %v2483_v37 }
  0x42   :  { %467 = vmatpush.msrb.mxu2 %v2539_v51  ;;  %486 = vmatpush.msra.mxu1 %v2542_v52 }
  0x43   :  { %525 = vmatpush.msra.mxu3 %v2546_v53  ;;  %617 = vmatpush.msrb.mxu0 %v2497_v40 }
  0x44   :  { %468 = vmatpush.msrb.mxu2 %v2548_v54  ;;  %487 = vmatpush.msra.mxu1 %v2551_v55 }
  0x45   :  { %526 = vmatpush.msra.mxu3 %v2557_v56  ;;  %1824 = vmatmul.msk.f32.gmra.mxu0 %vm166_vm0, %v2477_v35 }
  0x46   :  { %1833 = vmatmul.msk.f32.gmra.mxu1 %vm166_vm0, %v2519_v46  ;;  %1847 = vmatmul.msk.f32.gmra.mxu3 %vm166_vm0, %v2436_v23  ;;  %v2678_v23 = vld [vmem:[#allocation14 + $0xd0] sm:$0xff] }
  0x47   :  { %1842 = vmatmul.msk.f32.gmra.mxu2 %vm166_vm0, %v2412_v8  ;;  %488 = vmatpush.msra.mxu1 %v2565_v58 }
  0x48   :  { %469 = vmatpush.msrb.mxu2 %v2562_v57  ;;  %618 = vmatpush.msrb.mxu0 %v2506_v43 }
  0x49   :  { %527 = vmatpush.msra.mxu3 %v2579_v60  ;;  %489 = vmatpush.msra.mxu1 %v2581_v61 }
  0x4a   :  { %470 = vmatpush.msrb.mxu2 %v2575_v59  ;;  %619 = vmatpush.msrb.mxu0 %v2525_v48 }
  0x4b   :  { %490 = vmatpush.msra.mxu1 %v2588_v63  ;;  %528 = vmatpush.msra.mxu3 %v2593_v0 }
  0x4c   :  { %471 = vmatpush.msrb.mxu2 %v2584_v62  ;;  %620 = vmatpush.msrb.mxu0 %v2539_v51 }
  0x4d   :  { %491 = vmatpush.msra.mxu1 %v2595_v1  ;;  %529 = vmatpush.msra.mxu3 %v2617_v6 }
  0x4e   :  { %1834 = vmatmul.msk.f32.gmra.mxu1 %vm166_vm0, %v2412_v8  ;;  %1848 = vmatmul.msk.f32.gmra.mxu3 %vm166_vm0, %v2477_v35  ;;  %v2683_v35 = vld [vmem:[#allocation14 + $0xb0] sm:$0xff] }
  0x4f   :  { %1843 = vmatmul.msk.f32.gmra.mxu2 %vm166_vm0, %v2414_v9  ;;  %492 = vmatpush.msra.mxu1 %v2602_v3  ;;  %3592 = vst [vmem:[#allocation45_spill] sm:$0xff] %v2683_v35 }
  0x50   :  { %472 = vmatpush.msrb.mxu2 %v2599_v2  ;;  %621 = vmatpush.msrb.mxu0 %v2548_v54 }
  0x51   :  { %630 = vmatpush.msrb.mxu1 %v2439_v24  ;;  %530 = vmatpush.msra.mxu3 %v2619_v7 }
  0x52   :  { %497 = vmatpush.msra.mxu2 %v2609_v4  ;;  %1825 = vmatmul.msk.f32.gmra.mxu0 %vm166_vm0, %v2519_v46 }
  0x53   :  { %631 = vmatpush.msrb.mxu1 %v2450_v27  ;;  %622 = vmatpush.msrb.mxu0 %v2562_v57 }
  0x54   :  { %498 = vmatpush.msra.mxu2 %v2615_v5  ;;  %531 = vmatpush.msra.mxu3 %v2643_v14 }
  0x55   :  { %632 = vmatpush.msrb.mxu1 %v2461_v30  ;;  %623 = vmatpush.msrb.mxu0 %v2575_v59 }
  0x56   :  { %499 = vmatpush.msra.mxu2 %v2624_v10  ;;  %1835 = vmatmul.msk.f32.gmra.mxu1 %vm166_vm0, %v2414_v9 }
  0x57   :  { %1849 = vmatmul.msk.f32.gmra.mxu3 %vm166_vm0, %v2519_v46  ;;  %1844 = vmatmul.msk.f32.gmra.mxu2 %vm166_vm0, %v2434_v22  ;;  %v128_v46 = vld [vmem:[#allocation9] sm:$0xff] }
  0x58   :  { %500 = vmatpush.msra.mxu2 %v2630_v11  ;;  %633 = vmatpush.msrb.mxu1 %v2471_v33 }
  0x59   :  { %532 = vmatpush.msra.mxu3 %v2645_v15  ;;  %624 = vmatpush.msrb.mxu0 %v2584_v62  ;;  %v2703_v62 = vld [vmem:[#allocation14 + $0x50] sm:$0xff] }
  0x5a   :  { %501 = vmatpush.msra.mxu2 %v2641_v12  ;;  %634 = vmatpush.msrb.mxu1 %v2481_v36  ;;  %3595 = vst [vmem:[#allocation48_spill] sm:$0xff] %v2703_v62 }
  0x5b   :  { %670 = vmatpush.msrb.mxu3 %v2444_v26  ;;  %625 = vmatpush.msrb.mxu0 %v2599_v2  ;;  %v2699_v2 = vld [vmem:[#allocation14 + $0x70] sm:$0xff] }
  0x5c   :  { %502 = vmatpush.msra.mxu2 %v2651_v17  ;;  %635 = vmatpush.msrb.mxu1 %v2493_v39  ;;  %3594 = vst [vmem:[#allocation47_spill] sm:$0xff] %v2699_v2 }
  0x5d   :  { %671 = vmatpush.msrb.mxu3 %v2457_v29  ;;  %764 = vmatpush.msra.mxu0 %v2420_v13  ;;  %v2708_v13 = vld [vmem:[#allocation14 + $0x30] sm:$0xff] }
  0x5e   :  { %503 = vmatpush.msra.mxu2 %v2656_v18  ;;  %1836 = vmatmul.msk.f32.gmra.mxu1 %vm166_vm0, %v2434_v22  ;;  %3596 = vst [vmem:[#allocation49_spill] sm:$0xff] %v2708_v13 }
  0x5f   :  { %1850 = vmatmul.msk.f32.gmra.mxu3 %vm166_vm0, %v2412_v8  ;;  %1845 = vmatmul.msk.f32.gmra.mxu2 %vm166_vm0, %v2473_v34  ;;  %v2689_v8 = vld [vmem:[#allocation14 + $0x90] sm:$0xff] }
  0x60   :  { %504 = vmatpush.msra.mxu2 %v2662_v20  ;;  %672 = vmatpush.msrb.mxu3 %v2466_v32  ;;  %3593 = vst [vmem:[#allocation46_spill] sm:$0xff] %v2689_v8 }
  0x61   :  { %636 = vmatpush.msrb.mxu1 %v2504_v42  ;;  %765 = vmatpush.msra.mxu0 %v2426_v16 }
  0x62   :  { %505 = vmatpush.msra.mxu2 %v2672_v21  ;;  %673 = vmatpush.msrb.mxu3 %v2486_v38 }
  0x63   :  { %637 = vmatpush.msrb.mxu1 %v2515_v45  ;;  %766 = vmatpush.msra.mxu0 %v2429_v19 }
  0x64   :  { %506 = vmatpush.msra.mxu2 %v2678_v23  ;;  %674 = vmatpush.msrb.mxu3 %v2500_v41 }
  0x65   :  { %638 = vmatpush.msrb.mxu1 %v2528_v49  ;;  %767 = vmatpush.msra.mxu0 %v2442_v25 }
  0x66   :  { %507 = vmatpush.msra.mxu2 %v2683_v35  ;;  %675 = vmatpush.msrb.mxu3 %v2509_v44 }
  0x67   :  { %1837 = vmatmul.msk.f32.gmra.mxu1 %vm166_vm0, %v2473_v34  ;;  %1851 = vmatmul.msk.f32.gmra.mxu3 %vm166_vm0, %v2414_v9  ;;  %v2714_v9 = vld [vmem:[#allocation14 + $0x10] sm:$0xff] }
  0x68   :  { %508 = vmatpush.msra.mxu2 %v2689_v8  ;;  %676 = vmatpush.msrb.mxu3 %v2523_v47  ;;  %3597 = vst [vmem:[#allocation50_spill] sm:$0xff] %v2714_v9 }
  0x69   :  { %473 = vmatmul.f32.vlgmr.msrb.gmra.mxu2 %v128_v46  ;;  %639 = vmatpush.msrb.mxu1 %v2542_v52 }
  0x6a   :  { %509 = vmatpush.msra.mxu2 %v2699_v2  ;;  %677 = vmatpush.msrb.mxu3 %v2535_v50 }
  0x6b   :  { %640 = vmatpush.msrb.mxu1 %v2551_v55  ;;  %768 = vmatpush.msra.mxu0 %v2454_v28 }
  0x6c   :  { %510 = vmatpush.msra.mxu2 %v2703_v62  ;;  %678 = vmatpush.msrb.mxu3 %v2546_v53 }
  0x6d   :  { %641 = vmatpush.msrb.mxu1 %v2565_v58  ;;  %769 = vmatpush.msra.mxu0 %v2463_v31 }
  0x6e   :  { %511 = vmatpush.msra.mxu2 %v2708_v13  ;;  %679 = vmatpush.msrb.mxu3 %v2557_v56 }
  0x6f   :  { %1852 = vmatmul.msk.f32.gmra.mxu3 %vm166_vm0, %v2434_v22  ;;  %493 = vmatmul.f32.vlgmr.msra.gmra.mxu1 %v128_v46  ;;  %v3598_v22 = vld [vmem:[#allocation35_spill] sm:$0xff] }
  0x70   :  { %512 = vmatpush.msra.mxu2 %v2714_v9  ;;  %680 = vmatpush.msrb.mxu3 %v2579_v60 }
  0x71   :  { %513 = vmatmul.f32.vlgmr.msra.gmra.mxu2 %v128_v46  ;;  %642 = vmatpush.msrb.mxu1 %v2581_v61 }
  0x72   :  { %650 = vmatpush.msrb.mxu2 %v2609_v4  ;;  %681 = vmatpush.msrb.mxu3 %v2593_v0 }
  0x73   :  { %643 = vmatpush.msrb.mxu1 %v2588_v63  ;;  %770 = vmatpush.msra.mxu0 %v2483_v37 }
  0x74   :  { %651 = vmatpush.msrb.mxu2 %v2615_v5  ;;  %682 = vmatpush.msrb.mxu3 %v2617_v6 }
  0x75   :  { %644 = vmatpush.msrb.mxu1 %v2595_v1  ;;  %771 = vmatpush.msra.mxu0 %v2497_v40 }
  0x76   :  { %652 = vmatpush.msrb.mxu2 %v2624_v10  ;;  %683 = vmatpush.msrb.mxu3 %v2619_v7 }
  0x77   :  { %1853 = vmatmul.msk.f32.gmra.mxu3 %vm166_vm0, %v2473_v34  ;;  %645 = vmatpush.msrb.mxu1 %v2602_v3  ;;  %v3599_v34 = vld [vmem:[#allocation39_spill] sm:$0xff] }
  0x78   :  { %653 = vmatpush.msrb.mxu2 %v2630_v11  ;;  %684 = vmatpush.msrb.mxu3 %v2643_v14 }
  0x79   :  { %784 = vmatpush.msra.mxu1 %v2439_v24  ;;  %772 = vmatpush.msra.mxu0 %v2506_v43 }
  0x7a   :  { %654 = vmatpush.msrb.mxu2 %v2641_v12  ;;  %685 = vmatpush.msrb.mxu3 %v2645_v15 }
  0x7b   :  { %785 = vmatpush.msra.mxu1 %v2450_v27  ;;  %773 = vmatpush.msra.mxu0 %v2525_v48 }
  0x7c   :  { %655 = vmatpush.msrb.mxu2 %v2651_v17 }
  0x7d   :  { %786 = vmatpush.msra.mxu1 %v2461_v30  ;;  %774 = vmatpush.msra.mxu0 %v2539_v51 }
  0x7e   :  { %656 = vmatpush.msrb.mxu2 %v2656_v18 }
  0x7f   :  { %533 = vmatmul.f32.vlgmr.msra.gmra.mxu3 %v128_v46  ;;  %787 = vmatpush.msra.mxu1 %v2471_v33 }
  0x80   :  { %657 = vmatpush.msrb.mxu2 %v2662_v20  ;;  %824 = vmatpush.msra.mxu3 %v2444_v26 }
  0x81   :  { %788 = vmatpush.msra.mxu1 %v2481_v36  ;;  %775 = vmatpush.msra.mxu0 %v2548_v54 }
  0x82   :  { %658 = vmatpush.msrb.mxu2 %v2672_v21  ;;  %825 = vmatpush.msra.mxu3 %v2457_v29 }
  0x83   :  { %789 = vmatpush.msra.mxu1 %v2493_v39  ;;  %776 = vmatpush.msra.mxu0 %v2562_v57 }
  0x84   :  { %659 = vmatpush.msrb.mxu2 %v2678_v23  ;;  %826 = vmatpush.msra.mxu3 %v2466_v32 }
  0x85   :  { %790 = vmatpush.msra.mxu1 %v2504_v42  ;;  %777 = vmatpush.msra.mxu0 %v2575_v59 }
  0x86   :  { %660 = vmatpush.msrb.mxu2 %v2683_v35  ;;  %827 = vmatpush.msra.mxu3 %v2486_v38 }
  0x87   :  { %791 = vmatpush.msra.mxu1 %v2515_v45  ;;  %778 = vmatpush.msra.mxu0 %v3598_v22 }
  0x88   :  { %661 = vmatpush.msrb.mxu2 %v2689_v8  ;;  %828 = vmatpush.msra.mxu3 %v2500_v41 }
  0x89   :  { %792 = vmatpush.msra.mxu1 %v2528_v49  ;;  %779 = vmatpush.msra.mxu0 %v3599_v34 }
  0x8a   :  { %662 = vmatpush.msrb.mxu2 %v2699_v2  ;;  %829 = vmatpush.msra.mxu3 %v2509_v44 }
  0x8b   :  { %793 = vmatpush.msra.mxu1 %v2542_v52 }
  0x8c   :  { %663 = vmatpush.msrb.mxu2 %v2703_v62  ;;  %830 = vmatpush.msra.mxu3 %v2523_v47 }
  0x8d   :  { %794 = vmatpush.msra.mxu1 %v2551_v55 }
  0x8e   :  { %664 = vmatpush.msrb.mxu2 %v2708_v13  ;;  %831 = vmatpush.msra.mxu3 %v2535_v50 }
  0x8f   :  { %795 = vmatpush.msra.mxu1 %v2565_v58 }
  0x90   :  { %665 = vmatpush.msrb.mxu2 %v2714_v9  ;;  %832 = vmatpush.msra.mxu3 %v2546_v53 }
  0x91   :  { %796 = vmatpush.msra.mxu1 %v2581_v61 }
  0x92   :  { %804 = vmatpush.msra.mxu2 %v2609_v4  ;;  %833 = vmatpush.msra.mxu3 %v2557_v56 }
  0x93   :  { %797 = vmatpush.msra.mxu1 %v2588_v63 }
  0x94   :  { %805 = vmatpush.msra.mxu2 %v2615_v5  ;;  %834 = vmatpush.msra.mxu3 %v2579_v60 }
  0x95   :  { %798 = vmatpush.msra.mxu1 %v2595_v1 }
  0x96   :  { %806 = vmatpush.msra.mxu2 %v2624_v10  ;;  %835 = vmatpush.msra.mxu3 %v2593_v0 }
  0x97   :  { %799 = vmatpush.msra.mxu1 %v2602_v3 }
  0x98   :  { %807 = vmatpush.msra.mxu2 %v2630_v11  ;;  %836 = vmatpush.msra.mxu3 %v2617_v6 }
  0x9a   :  { %808 = vmatpush.msra.mxu2 %v2641_v12  ;;  %837 = vmatpush.msra.mxu3 %v2619_v7 }
  0x9c   :  { %809 = vmatpush.msra.mxu2 %v2651_v17  ;;  %838 = vmatpush.msra.mxu3 %v2643_v14 }
  0x9e   :  { %810 = vmatpush.msra.mxu2 %v2656_v18  ;;  %839 = vmatpush.msra.mxu3 %v2645_v15 }
  0xa0   :  { %811 = vmatpush.msra.mxu2 %v2662_v20 }
  0xa2   :  { %812 = vmatpush.msra.mxu2 %v2672_v21  ;;  %v2805_v46 = vpop.f32.mrf.mxu1 }
  0xa3   :  { %3600 = vst [vmem:[#allocation51_spill] sm:$0xff] %v2805_v46  ;;  %v156_v46 = vld [vmem:[%s3473_s5] sm:$0xf] }
  0xa4   :  { %813 = vmatpush.msra.mxu2 %v2678_v23  ;;  %v2821_v14 = vperm.slane %v156_v46, 2  ;;  %v159_v22 = vperm.slane %v156_v46, 1 }
  0xa6   :  { %814 = vmatpush.msra.mxu2 %v2683_v35 }
  0xa8   :  { %815 = vmatpush.msra.mxu2 %v2689_v8 }
  0xa9   :  { %v2811_v3 = vpop.f32.mrf.mxu3  ;;  %v2813_v34 = vpop.f32.mrf.mxu2 }
  0xaa   :  { %816 = vmatpush.msra.mxu2 %v2699_v2  ;;  %3601 = vst [vmem:[#allocation52_spill] sm:$0xff] %v2811_v3 }
  0xab   :  { %v249_v15 = vpop.f32.mrf.mxu1 }
  0xac   :  { %817 = vmatpush.msra.mxu2 %v2703_v62 }
  0xae   :  { %818 = vmatpush.msra.mxu2 %v2708_v13 }
  0xb0   :  { %819 = vmatpush.msra.mxu2 %v2714_v9 }
  0xb1   :  { %v2823_v1 = vpop.f32.mrf.mxu3 }
  0xb2   :  { %3602 = vst [vmem:[#allocation53_spill] sm:$0xff] %v2823_v1  ;;  %v293_v7 = vpop.f32.mrf.mxu2 }
  0xb3   :  { %v2826_v3 = vadd.f32 %v293_v7, %v2821_v14  ;;  %v252_v63 = vpop.f32.mrf.mxu1 }
  0xb4   :  { %v2828_v62 = vadd.f32 %v252_v63, %v159_v22 }
  0xb5   :  { %3603 = vst [vmem:[#allocation54_spill] sm:$0xff] %v2826_v3  ;;  %v161_v3 = vperm.slane %v156_v46, 3 }
  0xb6   :  { %3604 = vst [vmem:[#allocation55_spill] sm:$0xff] %v2828_v62 }
  0xb9   :  { %v2830_v59 = vpop.f32.mrf.mxu3 }
  0xba   :  { %3605 = vst [vmem:[#allocation56_spill] sm:$0xff] %v2830_v59  ;;  %v296_v13 = vpop.f32.mrf.mxu2 }
  0xbb   :  { %v2833_v9 = vadd.f32 %v296_v13, %v2821_v14  ;;  %v255_v6 = vpop.f32.mrf.mxu1 }
  0xbc   :  { %v2835_v2 = vadd.f32 %v255_v6, %v159_v22 }
  0xbd   :  { %3606 = vst [vmem:[#allocation57_spill] sm:$0xff] %v2833_v9 }
  0xbe   :  { %3607 = vst [vmem:[#allocation58_spill] sm:$0xff] %v2835_v2 }
  0xc1   :  { %v331_v61 = vpop.f32.mrf.mxu3 }
  0xc2   :  { %v299_v57 = vpop.f32.mrf.mxu2 }
  0xc3   :  { %v2838_v1 = vadd.f32 %v299_v57, %v2821_v14  ;;  %v258_v0 = vpop.f32.mrf.mxu1 }
  0xc4   :  { %v2840_v7 = vadd.f32 %v258_v0, %v159_v22 }
  0xc5   :  { %3608 = vst [vmem:[#allocation59_spill] sm:$0xff] %v2838_v1 }
  0xc6   :  { %3609 = vst [vmem:[#allocation60_spill] sm:$0xff] %v2840_v7 }
  0xc9   :  { %v334_v63 = vpop.f32.mrf.mxu3 }
  0xca   :  { %v302_v62 = vpop.f32.mrf.mxu2  ;;  %v2842_v8 = vadd.f32 %v334_v63, %v161_v3 }
  0xcb   :  { %v2845_v59 = vadd.f32 %v302_v62, %v2821_v14  ;;  %v261_v13 = vpop.f32.mrf.mxu1 }
  0xcc   :  { %3610 = vst [vmem:[#allocation61_spill] sm:$0xff] %v2842_v8  ;;  %v2847_v9 = vadd.f32 %v261_v13, %v159_v22 }
  0xcd   :  { %3611 = vst [vmem:[#allocation62_spill] sm:$0xff] %v2845_v59 }
  0xce   :  { %3612 = vst [vmem:[#allocation63_spill] sm:$0xff] %v2847_v9 }
  0xd1   :  { %v337_v6 = vpop.f32.mrf.mxu3 }
  0xd2   :  { %v305_v2 = vpop.f32.mrf.mxu2  ;;  %v2849_v58 = vadd.f32 %v337_v6, %v161_v3 }
  0xd3   :  { %v2852_v57 = vadd.f32 %v305_v2, %v2821_v14  ;;  %v264_v0 = vpop.f32.mrf.mxu1 }
  0xd4   :  { %3613 = vst [vmem:[#allocation64_spill] sm:$0xff] %v2849_v58  ;;  %v2854_v1 = vadd.f32 %v264_v0, %v159_v22 }
  0xd5   :  { %3614 = vst [vmem:[#allocation65_spill] sm:$0xff] %v2852_v57  ;;  %v208_v57 = vpop.f32.mrf.mxu0 }
  0xd6   :  { %3615 = vst [vmem:[#allocation66_spill] sm:$0xff] %v2854_v1 }
  0xda   :  { %v340_v7 = vpop.f32.mrf.mxu3  ;;  %v308_v63 = vpop.f32.mrf.mxu2 }
  0xdb   :  { %v2856_v54 = vadd.f32 %v340_v7, %v161_v3  ;;  %v267_v8 = vpop.f32.mrf.mxu1  ;;  %v2859_v62 = vadd.f32 %v308_v63, %v2821_v14  ;;  %v2870_v7 = vperm.slane %v156_v46, 0  ;;  %v250_v63 = vadd.f32 %v249_v15, %v159_v22 }
  0xdc   :  { %v2861_v13 = vadd.f32 %v267_v8, %v159_v22 }
  0xdd   :  { %3616 = vst [vmem:[#allocation67_spill] sm:$0xff] %v2856_v54  ;;  %v209_v1 = vadd.f32 %v208_v57, %v2870_v7 }
  0xde   :  { %3617 = vst [vmem:[#allocation68_spill] sm:$0xff] %v2859_v62 }
  0xdf   :  { %3618 = vst [vmem:[#allocation69_spill] sm:$0xff] %v2861_v13 }
  0xe0   :  { %3622 = vst [vmem:[#allocation73_spill] sm:$0xff] %v2870_v7 }
  0xe2   :  { %v343_v59 = vpop.f32.mrf.mxu3  ;;  %v311_v6 = vpop.f32.mrf.mxu2 }
  0xe3   :  { %v2863_v9 = vadd.f32 %v343_v59, %v161_v3  ;;  %v2866_v2 = vadd.f32 %v311_v6, %v2821_v14 }
  0xe4   :  { %v270_v58 = vpop.f32.mrf.mxu1 }
  0xe5   :  { %3619 = vst [vmem:[#allocation70_spill] sm:$0xff] %v2863_v9  ;;  %v2868_v0 = vadd.f32 %v270_v58, %v159_v22 }
  0xe6   :  { %3620 = vst [vmem:[#allocation71_spill] sm:$0xff] %v2866_v2 }
  0xe7   :  { %3621 = vst [vmem:[#allocation72_spill] sm:$0xff] %v2868_v0 }
  0xea   :  { %v346_v54 = vpop.f32.mrf.mxu3 }
  0xeb   :  { %v2873_v62 = vadd.f32 %v346_v54, %v161_v3 }
  0xec   :  { %v474_v8 = vpop.f32.mrf.mxu2  ;;  %v494_v13 = vpop.f32.mrf.mxu1 }
  0xed   :  { %3623 = vst [vmem:[#allocation74_spill] sm:$0xff] %v2873_v62  ;;  %v537_v59 = vadd.f32 %v474_v8, %v209_v1  ;;  %v538_v9 = vadd.f32 %v494_v13, %v250_v63  ;;  %v332_v1 = vadd.f32 %v331_v61, %v161_v3 }
  0xef   :  { %v1854_v60 = vmul.f32 -1.442695, %v537_v59  ;;  %v1855_v35 = vmul.f32 -1.442695, %v538_v9 }
  0xf1   :  { %1900 = vpow2.f32 %v1854_v60 }
  0xf2   :  { %1902 = vpow2.f32 %v1855_v35  ;;  %v349_v6 = vpop.f32.mrf.mxu3 }
  0xf3   :  { %v2875_v58 = vadd.f32 %v349_v6, %v161_v3 }
  0xf5   :  { %3624 = vst [vmem:[#allocation75_spill] sm:$0xff] %v2875_v58  ;;  %v514_v58 = vpop.f32.mrf.mxu2 }
  0xf7   :  { %v1901_v2 = vpop.eup %1900 }
  0xf8   :  { %v1903_v46 = vpop.eup %1902  ;;  %v544_v0 = vadd.f32 1.0, %v1901_v2  ;;  %v291_v2 = vadd.f32 %v2813_v34, %v2821_v14 }
  0xf9   :  { %v563_v55 = vadd.f32 1.0, %v1903_v46 }
  0xfa   :  { %1904 = vrcp.f32 %v544_v0  ;;  %v352_v57 = vpop.f32.mrf.mxu3  ;;  %vm550_vm1 = vweird.f32 %v544_v0  ;;  %v539_v61 = vadd.f32 %v514_v58, %v291_v2  ;;  %v130_v58 = vld [vmem:[#allocation11] sm:$0xff] }
  0xfb   :  { %1906 = vrcp.f32 %v563_v55  ;;  %v2877_v54 = vadd.f32 %v352_v57, %v161_v3  ;;  %v575_v57 = vand.u32 2147483648, %v563_v55  ;;  %v556_v3 = vand.u32 2147483648, %v544_v0 }
  0xfc   :  { %vm569_vm4 = vweird.f32 %v563_v55 }
  0xfd   :  { %3625 = vst [vmem:[#allocation76_spill] sm:$0xff] %v2877_v54  ;;  %v557_v14 = vor.u32 1.1754944e-38, %v556_v3 }
 0x100   :  { %v1905_v15 = vpop.eup %1904 }
 0x101   :  { %v1907_v22 = vpop.eup %1906  ;;  %v546_v13 = vmul.f32 %v1905_v15, %v544_v0  ;;  %vm551_vm2 = vweird.f32 %v1905_v15 }
 0x102   :  { %v565_v63 = vmul.f32 %v1907_v22, %v563_v55  ;;  %v534_v9 = vpop.f32.mrf.mxu3  ;;  %vm570_vm3 = vweird.f32 %v1907_v22  ;;  %vm2881_vm5 = vmor %vm550_vm1, %vm551_vm2 }
 0x103   :  { %v547_v60 = vsub.f32 1.0, %v546_v13  ;;  %v540_v35 = vadd.f32 %v534_v9, %v332_v1  ;;  %v554_v13 = vand.u32 2147483647, %v544_v0  ;;  %vm571_vm6 = vmor %vm569_vm4, %vm570_vm3 }
 0x104   :  { %v566_v8 = vsub.f32 1.0, %v565_v63  ;;  %v573_v63 = vand.u32 2147483647, %v563_v55 }
 0x105   :  { %v1856_v59 = vmul.f32 -1.442695, %v540_v35  ;;  %v548_v62 = vmul.f32 %v1905_v15, %v547_v60  ;;  %v576_v35 = vor.u32 1.1754944e-38, %v575_v57  ;;  %vm555_vm7 = vcmp.eq.f32.partialorder %v554_v13, 8.507059e+37 }
 0x106   :  { %v567_v6 = vmul.f32 %v1907_v22, %v566_v8  ;;  %vm574_vm8 = vcmp.eq.f32.partialorder %v573_v63, 8.507059e+37 }
 0x107   :  { %1908 = vpow2.f32 %v1856_v59  ;;  %v549_v54 = vadd.f32 %v1905_v15, %v548_v62 }
 0x108   :  { %v568_v46 = vadd.f32 %v1907_v22, %v567_v6  ;;  %1910 = vtanh.f32 %v539_v61 }
 0x109   :  { %v553_v8 = vsel %vm2881_vm5, %v1905_v15, %v549_v54 }
 0x10a   :  { %v572_v60 = vsel %vm571_vm6, %v1907_v22, %v568_v46  ;;  %v558_v59 = vsel %vm555_vm7, %v557_v14, %v553_v8  ;;  %v3655_v14 = vld [vmem:[#allocation55_spill] sm:$0xff] }
 0x10b   :  { %v577_v62 = vsel %vm574_vm8, %v576_v35, %v572_v60  ;;  %v3629_v60 = vld [vmem:[#allocation27_spill] sm:$0xff] }
 0x10c   :  { %v599_v6 = vmul.f32 %v577_v62, %v130_v58 }
 0x10d   :  { %v1909_v9 = vpop.eup %1908 }
 0x10e   :  { %v583_v34 = vadd.f32 1.0, %v1909_v9  ;;  %v1911_v2 = vpop.eup %1910 }
 0x10f   :  { %v600_v0 = vmul.f32 %v1911_v2, %v558_v59  ;;  %v3656_v59 = vld [vmem:[#allocation61_spill] sm:$0xff] }
 0x110   :  { %1912 = vrcp.f32 %v583_v34  ;;  %v595_v57 = vand.u32 2147483648, %v583_v34  ;;  %v593_v54 = vand.u32 2147483647, %v583_v34  ;;  %vm589_vm10 = vweird.f32 %v583_v34 }
 0x111   :  { %v2887_v7 = vadd.f32 %v600_v0, %v599_v6 }
 0x112   :  { %v596_v3 = vor.u32 1.1754944e-38, %v595_v57  ;;  %vm594_vm12 = vcmp.eq.f32.partialorder %v593_v54, 8.507059e+37 }
 0x113   :  { %1914 = vtanh.f32 %v2887_v7 }
 0x116   :  { %v1913_v55 = vpop.eup %1912 }
 0x117   :  { %v585_v22 = vmul.f32 %v1913_v55, %v583_v34  ;;  %vm590_vm9 = vweird.f32 %v1913_v55 }
 0x118   :  { %vm591_vm11 = vmor %vm589_vm10, %vm590_vm9 }
 0x119   :  { %v586_v46 = vsub.f32 1.0, %v585_v22  ;;  %v1915_v13 = vpop.eup %1914 }
 0x11b   :  { %v587_v61 = vmul.f32 %v1913_v55, %v586_v46 }
 0x11d   :  { %v588_v15 = vadd.f32 %v1913_v55, %v587_v61 }
 0x11f   :  { %v592_v1 = vsel %vm591_vm11, %v1913_v55, %v588_v15 }
 0x120   :  { %v597_v63 = vsel %vm594_vm12, %v596_v3, %v592_v1  ;;  %v3657_v3 = vld [vmem:[#allocation54_spill] sm:$0xff] }
 0x121   :  { %v2890_v9 = vmul.f32 %v1915_v13, %v597_v63 }
 0x123   :  { %3628 = vst [vmem:[#allocation77_spill] sm:$0xff] %v2890_v9  ;;  %626 = vmatmul.f32.vlgmr.msrb.gmra.mxu0 %v2890_v9  ;;  %646 = vmatmul.f32.vlgmr.msrb.gmra.mxu1 %v2890_v9 }
 0x124   :  { %666 = vmatmul.f32.vlgmr.msrb.gmra.mxu2 %v2890_v9  ;;  %686 = vmatmul.f32.vlgmr.msrb.gmra.mxu3 %v2890_v9 }
 0x125   :  { %918 = vmatpush.msrb.mxu0 %v3629_v60  ;;  %938 = vmatpush.msrb.mxu1 %v2439_v24  ;;  %v3632_v24 = vld [vmem:[#allocation33_spill] sm:$0xff] }
 0x126   :  { %958 = vmatpush.msrb.mxu2 %v2609_v4  ;;  %978 = vmatpush.msrb.mxu3 %v2444_v26  ;;  %v3634_v26 = vld [vmem:[#allocation31_spill] sm:$0xff] }
 0x127   :  { %919 = vmatpush.msrb.mxu0 %v2426_v16  ;;  %939 = vmatpush.msrb.mxu1 %v2450_v27  ;;  %v3630_v16 = vld [vmem:[#allocation29_spill] sm:$0xff]  ;;  %v3635_v27 = vld [vmem:[#allocation46_spill] sm:$0xff] }
 0x128   :  { %959 = vmatpush.msrb.mxu2 %v2615_v5  ;;  %979 = vmatpush.msrb.mxu3 %v2457_v29  ;;  %v3637_v29 = vld [vmem:[#allocation30_spill] sm:$0xff] }
 0x129   :  { %920 = vmatpush.msrb.mxu0 %v2429_v19  ;;  %940 = vmatpush.msrb.mxu1 %v2461_v30  ;;  %v3631_v19 = vld [vmem:[#allocation45_spill] sm:$0xff]  ;;  %v3638_v30 = vld [vmem:[#allocation34_spill] sm:$0xff] }
 0x12a   :  { %960 = vmatpush.msrb.mxu2 %v2624_v10  ;;  %980 = vmatpush.msrb.mxu3 %v2466_v32  ;;  %v3640_v32 = vld [vmem:[#allocation41_spill] sm:$0xff] }
 0x12b   :  { %921 = vmatpush.msrb.mxu0 %v2442_v25  ;;  %941 = vmatpush.msrb.mxu1 %v2471_v33  ;;  %v3633_v25 = vld [vmem:[#allocation28_spill] sm:$0xff] }
 0x12c   :  { %961 = vmatpush.msrb.mxu2 %v2630_v11  ;;  %981 = vmatpush.msrb.mxu3 %v2486_v38  ;;  %v3641_v33 = vld [vmem:[#allocation32_spill] sm:$0xff]  ;;  %v3644_v38 = vld [vmem:[#allocation42_spill] sm:$0xff] }
 0x12d   :  { %922 = vmatpush.msrb.mxu0 %v2454_v28  ;;  %942 = vmatpush.msrb.mxu1 %v2481_v36  ;;  %v3636_v28 = vld [vmem:[#allocation37_spill] sm:$0xff]  ;;  %v3642_v36 = vld [vmem:[#allocation36_spill] sm:$0xff] }
 0x12e   :  { %962 = vmatpush.msrb.mxu2 %v2641_v12  ;;  %982 = vmatpush.msrb.mxu3 %v2500_v41  ;;  %v3647_v41 = vld [vmem:[#allocation49_spill] sm:$0xff] }
 0x12f   :  { %923 = vmatpush.msrb.mxu0 %v2463_v31  ;;  %943 = vmatpush.msrb.mxu1 %v2493_v39  ;;  %v3639_v31 = vld [vmem:[#allocation47_spill] sm:$0xff] }
 0x130   :  { %963 = vmatpush.msrb.mxu2 %v2651_v17  ;;  %983 = vmatpush.msrb.mxu3 %v2509_v44  ;;  %v3645_v39 = vld [vmem:[#allocation35_spill] sm:$0xff]  ;;  %v3650_v44 = vld [vmem:[#allocation40_spill] sm:$0xff] }
 0x131   :  { %924 = vmatpush.msrb.mxu0 %v2483_v37  ;;  %944 = vmatpush.msrb.mxu1 %v2504_v42  ;;  %v3643_v37 = vld [vmem:[#allocation48_spill] sm:$0xff]  ;;  %v3648_v42 = vld [vmem:[#allocation43_spill] sm:$0xff] }
 0x132   :  { %964 = vmatpush.msrb.mxu2 %v2656_v18  ;;  %984 = vmatpush.msrb.mxu3 %v2523_v47  ;;  %v3652_v47 = vld [vmem:[#allocation44_spill] sm:$0xff] }
 0x133   :  { %925 = vmatpush.msrb.mxu0 %v2497_v40  ;;  %945 = vmatpush.msrb.mxu1 %v2515_v45  ;;  %v3646_v40 = vld [vmem:[#allocation38_spill] sm:$0xff] }
 0x134   :  { %965 = vmatpush.msrb.mxu2 %v2662_v20  ;;  %985 = vmatpush.msrb.mxu3 %v2535_v50  ;;  %v3651_v45 = vld [vmem:[#allocation50_spill] sm:$0xff] }
 0x135   :  { %926 = vmatpush.msrb.mxu0 %v2506_v43  ;;  %946 = vmatpush.msrb.mxu1 %v2528_v49  ;;  %v3649_v43 = vld [vmem:[#allocation39_spill] sm:$0xff] }
 0x136   :  { %966 = vmatpush.msrb.mxu2 %v2672_v21  ;;  %986 = vmatpush.msrb.mxu3 %v2546_v53 }
 0x137   :  { %927 = vmatpush.msrb.mxu0 %v2525_v48  ;;  %947 = vmatpush.msrb.mxu1 %v2542_v52  ;;  %v211_v48 = vpop.f32.mrf.mxu0 }
 0x138   :  { %967 = vmatpush.msrb.mxu2 %v2678_v23  ;;  %987 = vmatpush.msrb.mxu3 %v2557_v56 }
 0x139   :  { %928 = vmatpush.msrb.mxu0 %v2539_v51  ;;  %948 = vmatpush.msrb.mxu1 %v3630_v16  ;;  %v3654_v51 = vld [vmem:[#allocation73_spill] sm:$0xff] }
 0x13a   :  { %968 = vmatpush.msrb.mxu2 %v3631_v19  ;;  %988 = vmatpush.msrb.mxu3 %v3632_v24  ;;  %v212_v52 = vadd.f32 %v211_v48, %v3654_v51 }
 0x13b   :  { %929 = vmatpush.msrb.mxu0 %v3633_v25  ;;  %949 = vmatpush.msrb.mxu1 %v3634_v26 }
 0x13c   :  { %969 = vmatpush.msrb.mxu2 %v3635_v27  ;;  %989 = vmatpush.msrb.mxu3 %v3636_v28 }
 0x13d   :  { %930 = vmatpush.msrb.mxu0 %v3637_v29  ;;  %950 = vmatpush.msrb.mxu1 %v3638_v30 }
 0x13e   :  { %970 = vmatpush.msrb.mxu2 %v3639_v31  ;;  %990 = vmatpush.msrb.mxu3 %v3640_v32 }
 0x13f   :  { %931 = vmatpush.msrb.mxu0 %v3641_v33  ;;  %951 = vmatpush.msrb.mxu1 %v3642_v36  ;;  %v2960_v49 = vpop.f32.mrf.mxu0 }
 0x140   :  { %971 = vmatpush.msrb.mxu2 %v3643_v37  ;;  %991 = vmatpush.msrb.mxu3 %v3644_v38 }
 0x141   :  { %932 = vmatpush.msrb.mxu0 %v3645_v39  ;;  %952 = vmatpush.msrb.mxu1 %v3646_v40 }
 0x142   :  { %972 = vmatpush.msrb.mxu2 %v3647_v41  ;;  %992 = vmatpush.msrb.mxu3 %v3648_v42 }
 0x143   :  { %933 = vmatpush.msrb.mxu0 %v3649_v43  ;;  %953 = vmatpush.msrb.mxu1 %v3650_v44 }
 0x144   :  { %973 = vmatpush.msrb.mxu2 %v3651_v45  ;;  %993 = vmatpush.msrb.mxu3 %v3652_v47 }
 0x147   :  { %v2962_v50 = vpop.f32.mrf.mxu0 }
 0x148   :  { %3653 = vst [vmem:[#allocation27_spill] sm:$0xff] %v2962_v50 }
 0x1a0   :  { %v627_v53 = vpop.f32.mrf.mxu0  ;;  %v647_v56 = vpop.f32.mrf.mxu1 }
 0x1a1   :  { %v690_v35 = vadd.f32 %v627_v53, %v212_v52  ;;  %v691_v34 = vadd.f32 %v647_v56, %v3655_v14 }
 0x1a3   :  { %v1857_v8 = vmul.f32 -1.442695, %v690_v35  ;;  %v1858_v58 = vmul.f32 -1.442695, %v691_v34 }
 0x1a5   :  { %1916 = vpow2.f32 %v1857_v8 }
 0x1a6   :  { %1918 = vpow2.f32 %v1858_v58 }
 0x1a7   :  { %v687_v62 = vpop.f32.mrf.mxu3  ;;  %v667_v57 = vpop.f32.mrf.mxu2 }
 0x1a8   :  { %v693_v6 = vadd.f32 %v687_v62, %v3656_v59  ;;  %v692_v1 = vadd.f32 %v667_v57, %v3657_v3  ;;  %v2988_v3 = vld [vmem:[#allocation14 + $0x1c0] sm:$0xff] }
 0x1aa   :  { %v1859_v2 = vmul.f32 -1.442695, %v693_v6 }
 0x1ab   :  { %v1917_v0 = vpop.eup %1916 }
 0x1ac   :  { %v1919_v55 = vpop.eup %1918  ;;  %v697_v22 = vadd.f32 1.0, %v1917_v0  ;;  %1920 = vpow2.f32 %v1859_v2 }
 0x1ad   :  { %v716_v46 = vadd.f32 1.0, %v1919_v55 }
 0x1ae   :  { %1922 = vrcp.f32 %v697_v22  ;;  %v709_v25 = vand.u32 2147483648, %v697_v22  ;;  %v707_v29 = vand.u32 2147483647, %v697_v22  ;;  %vm703_vm15 = vweird.f32 %v697_v22 }
 0x1af   :  { %1924 = vrcp.f32 %v716_v46  ;;  %v728_v26 = vand.u32 2147483648, %v716_v46  ;;  %v726_v33 = vand.u32 2147483647, %v716_v46  ;;  %vm722_vm0 = vweird.f32 %v716_v46 }
 0x1b0   :  { %v710_v40 = vor.u32 1.1754944e-38, %v709_v25  ;;  %vm708_vm3 = vcmp.eq.f32.partialorder %v707_v29, 8.507059e+37  ;;  %v3018_v25 = vld [vmem:[#allocation14 + $0x160] sm:$0xff]  ;;  %v3035_v29 = vld [vmem:[#allocation14 + $0x158] sm:$0xff] }
 0x1b1   :  { %v729_v48 = vor.u32 1.1754944e-38, %v728_v26  ;;  %vm727_vm4 = vcmp.eq.f32.partialorder %v726_v33, 8.507059e+37  ;;  %v3025_v26 = vld [vmem:[#allocation14 + $0x178] sm:$0xff] }
 0x1b2   :  { %v1921_v61 = vpop.eup %1920  ;;  %v3045_v33 = vld [vmem:[#allocation14 + $0x138] sm:$0xff] }
 0x1b3   :  { %v736_v54 = vadd.f32 1.0, %v1921_v61 }
 0x1b4   :  { %v1923_v15 = vpop.eup %1922 }
 0x1b5   :  { %v1925_v13 = vpop.eup %1924  ;;  %v699_v63 = vmul.f32 %v1923_v15, %v697_v22  ;;  %1926 = vrcp.f32 %v736_v54  ;;  %vm704_vm13 = vweird.f32 %v1923_v15  ;;  %v748_v2 = vand.u32 2147483648, %v736_v54 }
 0x1b6   :  { %v718_v60 = vmul.f32 %v1925_v13, %v716_v46  ;;  %1928 = vtanh.f32 %v692_v1  ;;  %vm723_vm14 = vweird.f32 %v1925_v13  ;;  %vm705_vm1 = vmor %vm703_vm15, %vm704_vm13  ;;  %vm742_vm6 = vweird.f32 %v736_v54  ;;  %v2991_v1 = vld [vmem:[#allocation14 + $0x1c8] sm:$0xff] }
 0x1b7   :  { %v700_v16 = vsub.f32 1.0, %v699_v63  ;;  %vm724_vm2 = vmor %vm722_vm0, %vm723_vm14  ;;  %v746_v0 = vand.u32 2147483647, %v736_v54  ;;  %v749_v22 = vor.u32 1.1754944e-38, %v748_v2  ;;  %v2998_v63 = vld [vmem:[#allocation14 + $0x1a0] sm:$0xff] }
 0x1b8   :  { %v719_v24 = vsub.f32 1.0, %v718_v60  ;;  %v3005_v60 = vld [vmem:[#allocation14 + $0x1b8] sm:$0xff] }
 0x1b9   :  { %v701_v28 = vmul.f32 %v1923_v15, %v700_v16  ;;  %vm747_vm8 = vcmp.eq.f32.partialorder %v746_v0, 8.507059e+37  ;;  %v3008_v16 = vld [vmem:[#allocation14 + $0x180] sm:$0xff] }
 0x1ba   :  { %v720_v30 = vmul.f32 %v1925_v13, %v719_v24  ;;  %v3015_v24 = vld [vmem:[#allocation14 + $0x198] sm:$0xff] }
 0x1bb   :  { %v1927_v36 = vpop.eup %1926  ;;  %v702_v39 = vadd.f32 %v1923_v15, %v701_v28  ;;  %v3028_v28 = vld [vmem:[#allocation14 + $0x140] sm:$0xff] }
 0x1bc   :  { %v721_v43 = vadd.f32 %v1925_v13, %v720_v30  ;;  %v738_v44 = vmul.f32 %v1927_v36, %v736_v54  ;;  %v1929_v53 = vpop.eup %1928  ;;  %vm743_vm5 = vweird.f32 %v1927_v36  ;;  %v2981_v54 = vld [vmem:[#allocation14 + $0x1e8] sm:$0xff]  ;;  %v3038_v30 = vld [vmem:[#allocation14 + $0x120] sm:$0xff] }
 0x1bd   :  { %v706_v52 = vsel %vm705_vm1, %v1923_v15, %v702_v39  ;;  %vm744_vm7 = vmor %vm742_vm6, %vm743_vm5  ;;  %v2985_v15 = vld [vmem:[#allocation14 + $0x1f8] sm:$0xff] }
 0x1be   :  { %v711_v56 = vsel %vm708_vm3, %v710_v40, %v706_v52  ;;  %v725_v35 = vsel %vm724_vm2, %v1925_v13, %v721_v43  ;;  %v739_v14 = vsub.f32 1.0, %v738_v44  ;;  %v2995_v13 = vld [vmem:[#allocation14 + $0x1d8] sm:$0xff]  ;;  %v3058_v40 = vld [vmem:[#allocation14 + $0xe0] sm:$0xff] }
 0x1bf   :  { %v730_v34 = vsel %vm727_vm4, %v729_v48, %v725_v35  ;;  %v753_v8 = vmul.f32 %v1929_v53, %v711_v56  ;;  %v3055_v39 = vld [vmem:[#allocation14 + $0x118] sm:$0xff]  ;;  %v3068_v44 = vld [vmem:[#allocation14 + $0xc0] sm:$0xff] }
 0x1c0   :  { %v752_v58 = vmul.f32 %v730_v34, %v2887_v7  ;;  %v740_v62 = vmul.f32 %v1927_v36, %v739_v14  ;;  %v2978_v7 = vld [vmem:[#allocation14 + $0x1e0] sm:$0xff]  ;;  %v3065_v43 = vld [vmem:[#allocation14 + $0xf8] sm:$0xff] }
 0x1c1   :  { %v3075_v48 = vld [vmem:[#allocation14 + $0xd8] sm:$0xff]  ;;  %v3078_v52 = vld [vmem:[#allocation14 + $0xa0] sm:$0xff] }
 0x1c2   :  { %v2969_v59 = vadd.f32 %v753_v8, %v752_v58  ;;  %v741_v6 = vadd.f32 %v1927_v36, %v740_v62  ;;  %3659 = vst [vmem:[#allocation45_spill] sm:$0xff] %v3075_v48  ;;  %v3085_v53 = vld [vmem:[#allocation14 + $0xb8] sm:$0xff]  ;;  %v3088_v56 = vld [vmem:[#allocation14 + $0x80] sm:$0xff]  ;;  %v3117_v58 = vld [vmem:[#allocation14 + $0x28] sm:$0xff] }
 0x1c3   :  { %3660 = vst [vmem:[#allocation33_spill] sm:$0xff] %v3078_v52  ;;  %v3095_v35 = vld [vmem:[#allocation14 + $0x98] sm:$0xff]  ;;  %v3098_v14 = vld [vmem:[#allocation14 + $0x60] sm:$0xff] }
 0x1c4   :  { %1930 = vtanh.f32 %v2969_v59  ;;  %v745_v55 = vsel %vm744_vm7, %v1927_v36, %v741_v6  ;;  %v3048_v36 = vld [vmem:[#allocation14 + $0x100] sm:$0xff]  ;;  %3662 = vst [vmem:[#allocation31_spill] sm:$0xff] %v3085_v53  ;;  %v3674_v6 = vld [vmem:[#allocation58_spill] sm:$0xff] }
 0x1c5   :  { %v750_v57 = vsel %vm747_vm8, %v749_v22, %v745_v55  ;;  %3663 = vst [vmem:[#allocation46_spill] sm:$0xff] %v3088_v56  ;;  %v3106_v34 = vld [vmem:[#allocation14 + $0x40] sm:$0xff]  ;;  %v3675_v22 = vld [vmem:[#allocation64_spill] sm:$0xff] }
 0x1c6   :  { %3665 = vst [vmem:[#allocation30_spill] sm:$0xff] %v3095_v35  ;;  %v3114_v8 = vld [vmem:[#allocation14 + $0x20] sm:$0xff] }
 0x1c7   :  { %3666 = vst [vmem:[#allocation34_spill] sm:$0xff] %v3098_v14 }
 0x1c8   :  { %3668 = vst [vmem:[#allocation41_spill] sm:$0xff] %v3106_v34 }
 0x1c9   :  { %3670 = vst [vmem:[#allocation36_spill] sm:$0xff] %v3114_v8 }
 0x1ca   :  { %v1931_v46 = vpop.eup %1930  ;;  %3671 = vst [vmem:[#allocation48_spill] sm:$0xff] %v3117_v58 }
 0x1cb   :  { %v2972_v61 = vmul.f32 %v1931_v46, %v750_v57 }
 0x1cd   :  { %3658 = vst [vmem:[#allocation29_spill] sm:$0xff] %v2972_v61  ;;  %780 = vmatmul.f32.vlgmr.msra.gmra.mxu0 %v2972_v61  ;;  %800 = vmatmul.f32.vlgmr.msra.gmra.mxu1 %v2972_v61 }
 0x1ce   :  { %820 = vmatmul.f32.vlgmr.msra.gmra.mxu2 %v2972_v61  ;;  %840 = vmatmul.f32.vlgmr.msra.gmra.mxu3 %v2972_v61 }
 0x1cf   :  { %1072 = vmatpush.msra.mxu0 %v2978_v7  ;;  %1092 = vmatpush.msra.mxu1 %v2981_v54 }
 0x1d0   :  { %1112 = vmatpush.msra.mxu2 %v2609_v4  ;;  %1132 = vmatpush.msra.mxu3 %v2985_v15  ;;  %v3001_v4 = vld [vmem:[#allocation14 + $0x1a8] sm:$0xff] }
 0x1d1   :  { %1073 = vmatpush.msra.mxu0 %v2988_v3  ;;  %1093 = vmatpush.msra.mxu1 %v2991_v1 }
 0x1d2   :  { %1113 = vmatpush.msra.mxu2 %v2615_v5  ;;  %1133 = vmatpush.msra.mxu3 %v2995_v13  ;;  %v3011_v5 = vld [vmem:[#allocation14 + $0x188] sm:$0xff] }
 0x1d3   :  { %1074 = vmatpush.msra.mxu0 %v2998_v63  ;;  %1094 = vmatpush.msra.mxu1 %v3001_v4 }
 0x1d4   :  { %1114 = vmatpush.msra.mxu2 %v2624_v10  ;;  %1134 = vmatpush.msra.mxu3 %v3005_v60  ;;  %v3021_v10 = vld [vmem:[#allocation14 + $0x168] sm:$0xff] }
 0x1d5   :  { %1075 = vmatpush.msra.mxu0 %v3008_v16  ;;  %1095 = vmatpush.msra.mxu1 %v3011_v5 }
 0x1d6   :  { %1115 = vmatpush.msra.mxu2 %v2630_v11  ;;  %1135 = vmatpush.msra.mxu3 %v3015_v24  ;;  %v3031_v11 = vld [vmem:[#allocation14 + $0x148] sm:$0xff] }
 0x1d7   :  { %1076 = vmatpush.msra.mxu0 %v3018_v25  ;;  %1096 = vmatpush.msra.mxu1 %v3021_v10 }
 0x1d8   :  { %1116 = vmatpush.msra.mxu2 %v2641_v12  ;;  %1136 = vmatpush.msra.mxu3 %v3025_v26  ;;  %v3041_v12 = vld [vmem:[#allocation14 + $0x128] sm:$0xff] }
 0x1d9   :  { %1077 = vmatpush.msra.mxu0 %v3028_v28  ;;  %1097 = vmatpush.msra.mxu1 %v3031_v11 }
 0x1da   :  { %1117 = vmatpush.msra.mxu2 %v2651_v17  ;;  %1137 = vmatpush.msra.mxu3 %v3035_v29  ;;  %v3051_v17 = vld [vmem:[#allocation14 + $0x108] sm:$0xff] }
 0x1db   :  { %1078 = vmatpush.msra.mxu0 %v3038_v30  ;;  %1098 = vmatpush.msra.mxu1 %v3041_v12 }
 0x1dc   :  { %1118 = vmatpush.msra.mxu2 %v2656_v18  ;;  %1138 = vmatpush.msra.mxu3 %v3045_v33  ;;  %v3061_v18 = vld [vmem:[#allocation14 + $0xe8] sm:$0xff] }
 0x1dd   :  { %1079 = vmatpush.msra.mxu0 %v3048_v36  ;;  %1099 = vmatpush.msra.mxu1 %v3051_v17 }
 0x1de   :  { %1119 = vmatpush.msra.mxu2 %v2662_v20  ;;  %1139 = vmatpush.msra.mxu3 %v3055_v39  ;;  %v3071_v20 = vld [vmem:[#allocation14 + $0xc8] sm:$0xff] }
 0x1df   :  { %1080 = vmatpush.msra.mxu0 %v3058_v40  ;;  %1100 = vmatpush.msra.mxu1 %v3061_v18 }
 0x1e0   :  { %1120 = vmatpush.msra.mxu2 %v2672_v21  ;;  %1140 = vmatpush.msra.mxu3 %v3065_v43  ;;  %v3081_v21 = vld [vmem:[#allocation14 + $0xa8] sm:$0xff] }
 0x1e1   :  { %1081 = vmatpush.msra.mxu0 %v3068_v44  ;;  %1101 = vmatpush.msra.mxu1 %v3071_v20  ;;  %3661 = vst [vmem:[#allocation28_spill] sm:$0xff] %v3081_v21 }
 0x1e2   :  { %1121 = vmatpush.msra.mxu2 %v2678_v23  ;;  %1141 = vmatpush.msra.mxu3 %v3075_v48  ;;  %v3091_v23 = vld [vmem:[#allocation14 + $0x88] sm:$0xff] }
 0x1e3   :  { %1082 = vmatpush.msra.mxu0 %v3078_v52  ;;  %1102 = vmatpush.msra.mxu1 %v3081_v21  ;;  %3664 = vst [vmem:[#allocation37_spill] sm:$0xff] %v3091_v23 }
 0x1e4   :  { %1122 = vmatpush.msra.mxu2 %v3631_v19  ;;  %1142 = vmatpush.msra.mxu3 %v3085_v53  ;;  %v3101_v19 = vld [vmem:[#allocation14 + $0x68] sm:$0xff] }
 0x1e5   :  { %1083 = vmatpush.msra.mxu0 %v3088_v56  ;;  %1103 = vmatpush.msra.mxu1 %v3091_v23  ;;  %3667 = vst [vmem:[#allocation47_spill] sm:$0xff] %v3101_v19 }
 0x1e6   :  { %1123 = vmatpush.msra.mxu2 %v3635_v27  ;;  %1143 = vmatpush.msra.mxu3 %v3095_v35  ;;  %v3109_v27 = vld [vmem:[#allocation14 + $0x48] sm:$0xff] }
 0x1e7   :  { %1084 = vmatpush.msra.mxu0 %v3098_v14  ;;  %1104 = vmatpush.msra.mxu1 %v3101_v19  ;;  %3669 = vst [vmem:[#allocation32_spill] sm:$0xff] %v3109_v27 }
 0x1e8   :  { %1124 = vmatpush.msra.mxu2 %v3639_v31  ;;  %1144 = vmatpush.msra.mxu3 %v3640_v32  ;;  %v3122_v31 = vld [vmem:[#allocation14] sm:$0xff]  ;;  %v3125_v32 = vld [vmem:[#allocation14 + $0x8] sm:$0xff] }
 0x1e9   :  { %1085 = vmatpush.msra.mxu0 %v3106_v34  ;;  %1105 = vmatpush.msra.mxu1 %v3109_v27  ;;  %3672 = vst [vmem:[#allocation42_spill] sm:$0xff] %v3122_v31 }
 0x1ea   :  { %1125 = vmatpush.msra.mxu2 %v3643_v37  ;;  %1145 = vmatpush.msra.mxu3 %v3644_v38  ;;  %3673 = vst [vmem:[#allocation35_spill] sm:$0xff] %v3125_v32  ;;  %v215_v37 = vadd.f32 %v2960_v49, %v3654_v51 }
 0x1eb   :  { %1086 = vmatpush.msra.mxu0 %v3114_v8  ;;  %1106 = vmatpush.msra.mxu1 %v3117_v58 }
 0x1ec   :  { %1126 = vmatpush.msra.mxu2 %v3647_v41  ;;  %1146 = vmatpush.msra.mxu3 %v3648_v42 }
 0x1ed   :  { %1087 = vmatpush.msra.mxu0 %v3122_v31  ;;  %1107 = vmatpush.msra.mxu1 %v3125_v32 }
 0x1ee   :  { %1127 = vmatpush.msra.mxu2 %v3651_v45  ;;  %1147 = vmatpush.msra.mxu3 %v3652_v47 }
 0x24a   :  { %v781_v38 = vpop.f32.mrf.mxu0  ;;  %v801_v62 = vpop.f32.mrf.mxu1 }
 0x24b   :  { %v844_v41 = vadd.f32 %v781_v38, %v215_v37  ;;  %v845_v42 = vadd.f32 %v801_v62, %v3674_v6  ;;  %v3676_v62 = vld [vmem:[#allocation57_spill] sm:$0xff] }
 0x24d   :  { %v1860_v2 = vmul.f32 -1.442695, %v844_v41  ;;  %v1861_v0 = vmul.f32 -1.442695, %v845_v42 }
 0x24f   :  { %1932 = vpow2.f32 %v1860_v2 }
 0x250   :  { %1934 = vpow2.f32 %v1861_v0 }
 0x251   :  { %v841_v55 = vpop.f32.mrf.mxu3  ;;  %v821_v49 = vpop.f32.mrf.mxu2 }
 0x252   :  { %v847_v46 = vadd.f32 %v841_v55, %v3675_v22  ;;  %v846_v41 = vadd.f32 %v821_v49, %v3676_v62 }
 0x254   :  { %v1862_v57 = vmul.f32 -1.442695, %v847_v46 }
 0x255   :  { %v1933_v61 = vpop.eup %1932 }
 0x256   :  { %v1935_v45 = vpop.eup %1934  ;;  %v851_v9 = vadd.f32 1.0, %v1933_v61  ;;  %1936 = vpow2.f32 %v1862_v57 }
 0x257   :  { %v870_v47 = vadd.f32 1.0, %v1935_v45 }
 0x258   :  { %1938 = vrcp.f32 %v851_v9  ;;  %v863_v22 = vand.u32 2147483648, %v851_v9  ;;  %v861_v57 = vand.u32 2147483647, %v851_v9  ;;  %vm857_vm11 = vweird.f32 %v851_v9 }
 0x259   :  { %1940 = vrcp.f32 %v870_v47  ;;  %v882_v46 = vand.u32 2147483648, %v870_v47  ;;  %v880_v51 = vand.u32 2147483647, %v870_v47  ;;  %vm876_vm12 = vweird.f32 %v870_v47 }
 0x25a   :  { %v864_v49 = vor.u32 1.1754944e-38, %v863_v22  ;;  %vm862_vm15 = vcmp.eq.f32.partialorder %v861_v57, 8.507059e+37 }
 0x25b   :  { %vm881_vm0 = vcmp.eq.f32.partialorder %v880_v51, 8.507059e+37 }
 0x25c   :  { %v1937_v50 = vpop.eup %1936 }
 0x25d   :  { %v890_v37 = vadd.f32 1.0, %v1937_v50 }
 0x25e   :  { %v1939_v38 = vpop.eup %1938 }
 0x25f   :  { %v1941_v6 = vpop.eup %1940  ;;  %v853_v42 = vmul.f32 %v1939_v38, %v851_v9  ;;  %1942 = vrcp.f32 %v890_v37  ;;  %vm858_vm9 = vweird.f32 %v1939_v38  ;;  %v902_v22 = vand.u32 2147483648, %v890_v37 }
 0x260   :  { %v872_v2 = vmul.f32 %v1941_v6, %v870_v47  ;;  %1944 = vtanh.f32 %v846_v41  ;;  %vm877_vm10 = vweird.f32 %v1941_v6  ;;  %vm859_vm13 = vmor %vm857_vm11, %vm858_vm9  ;;  %vm896_vm2 = vweird.f32 %v890_v37 }
 0x261   :  { %v854_v0 = vsub.f32 1.0, %v853_v42  ;;  %vm878_vm14 = vmor %vm876_vm12, %vm877_vm10  ;;  %v883_v42 = vor.u32 1.1754944e-38, %v882_v46  ;;  %v903_v57 = vor.u32 1.1754944e-38, %v902_v22  ;;  %v3687_v22 = vld [vmem:[#allocation36_spill] sm:$0xff] }
 0x262   :  { %v873_v55 = vsub.f32 1.0, %v872_v2 }
 0x263   :  { %v855_v61 = vmul.f32 %v1939_v38, %v854_v0 }
 0x264   :  { %v874_v45 = vmul.f32 %v1941_v6, %v873_v55 }
 0x265   :  { %v1943_v32 = vpop.eup %1942  ;;  %v856_v50 = vadd.f32 %v1939_v38, %v855_v61 }
 0x266   :  { %v875_v62 = vadd.f32 %v1941_v6, %v874_v45  ;;  %v892_v31 = vmul.f32 %v1943_v32, %v890_v37  ;;  %v1945_v41 = vpop.eup %1944  ;;  %vm897_vm1 = vweird.f32 %v1943_v32  ;;  %v3189_v45 = vld [vmem:[#allocation14 + $0x110] sm:$0xff] }
 0x267   :  { %v860_v2 = vsel %vm859_vm13, %v1939_v38, %v856_v50  ;;  %v900_v38 = vand.u32 2147483647, %v890_v37  ;;  %vm898_vm3 = vmor %vm896_vm2, %vm897_vm1  ;;  %v3183_v37 = vld [vmem:[#allocation14 + $0x130] sm:$0xff] }
 0x268   :  { %v865_v58 = vsel %vm862_vm15, %v864_v49, %v860_v2  ;;  %v879_v0 = vsel %vm878_vm14, %v1941_v6, %v875_v62  ;;  %v893_v8 = vsub.f32 1.0, %v892_v31  ;;  %v3195_v50 = vld [vmem:[#allocation14 + $0xf0] sm:$0xff] }
 0x269   :  { %v884_v55 = vsel %vm881_vm0, %v883_v42, %v879_v0  ;;  %v907_v27 = vmul.f32 %v1945_v41, %v865_v58  ;;  %vm901_vm4 = vcmp.eq.f32.partialorder %v900_v38, 8.507059e+37  ;;  %v3171_v58 = vld [vmem:[#allocation14 + $0x170] sm:$0xff]  ;;  %v3222_v41 = vld [vmem:[#allocation14 + $0x78] sm:$0xff]  ;;  %v3683_v0 = vld [vmem:[#allocation41_spill] sm:$0xff] }
 0x26a   :  { %v906_v34 = vmul.f32 %v884_v55, %v2969_v59  ;;  %v894_v61 = vmul.f32 %v1943_v32, %v893_v8  ;;  %v3147_v59 = vld [vmem:[#allocation14 + $0x1f0] sm:$0xff]  ;;  %3682 = vst [vmem:[#allocation50_spill] sm:$0xff] %v3222_v41  ;;  %v3684_v55 = vld [vmem:[#allocation32_spill] sm:$0xff] }
 0x26b   :  { %v3165_v8 = vld [vmem:[#allocation14 + $0x190] sm:$0xff]  ;;  %v3688_v38 = vld [vmem:[#allocation48_spill] sm:$0xff] }
 0x26c   :  { %v3136_v9 = vadd.f32 %v907_v27, %v906_v34  ;;  %v895_v47 = vadd.f32 %v1943_v32, %v894_v61  ;;  %v3153_v34 = vld [vmem:[#allocation14 + $0x1d0] sm:$0xff] }
 0x26d   :  { %v3159_v27 = vld [vmem:[#allocation14 + $0x1b0] sm:$0xff] }
 0x26e   :  { %1946 = vtanh.f32 %v3136_v9  ;;  %v899_v46 = vsel %vm898_vm3, %v1943_v32, %v895_v47  ;;  %v3177_v32 = vld [vmem:[#allocation14 + $0x150] sm:$0xff]  ;;  %v3230_v47 = vld [vmem:[#allocation14 + $0x58] sm:$0xff] }
 0x26f   :  { %v904_v31 = vsel %vm901_vm4, %v903_v57, %v899_v46  ;;  %v3201_v49 = vld [vmem:[#allocation14 + $0xd0] sm:$0xff]  ;;  %3686 = vst [vmem:[#allocation55_spill] sm:$0xff] %v3230_v47  ;;  %v3238_v57 = vld [vmem:[#allocation14 + $0x38] sm:$0xff] }
 0x270   :  { %3678 = vst [vmem:[#allocation49_spill] sm:$0xff] %v3201_v49  ;;  %v3207_v62 = vld [vmem:[#allocation14 + $0xb0] sm:$0xff] }
 0x271   :  { %3679 = vst [vmem:[#allocation43_spill] sm:$0xff] %v3207_v62  ;;  %v3213_v42 = vld [vmem:[#allocation14 + $0x90] sm:$0xff] }
 0x272   :  { %3680 = vst [vmem:[#allocation39_spill] sm:$0xff] %v3213_v42  ;;  %v3219_v2 = vld [vmem:[#allocation14 + $0x70] sm:$0xff] }
 0x273   :  { %3681 = vst [vmem:[#allocation40_spill] sm:$0xff] %v3219_v2  ;;  %v3227_v61 = vld [vmem:[#allocation14 + $0x50] sm:$0xff] }
 0x274   :  { %v1947_v51 = vpop.eup %1946  ;;  %3685 = vst [vmem:[#allocation44_spill] sm:$0xff] %v3227_v61  ;;  %v3235_v46 = vld [vmem:[#allocation14 + $0x30] sm:$0xff] }
 0x275   :  { %v3139_v6 = vmul.f32 %v1947_v51, %v904_v31  ;;  %3689 = vst [vmem:[#allocation61_spill] sm:$0xff] %v3235_v46  ;;  %v3691_v51 = vld [vmem:[#allocation42_spill] sm:$0xff]  ;;  %v3692_v31 = vld [vmem:[#allocation35_spill] sm:$0xff] }
 0x276   :  { %3690 = vst [vmem:[#allocation54_spill] sm:$0xff] %v3238_v57 }
 0x277   :  { %3677 = vst [vmem:[#allocation38_spill] sm:$0xff] %v3139_v6  ;;  %934 = vmatmul.f32.vlgmr.msrb.gmra.mxu0 %v3139_v6  ;;  %954 = vmatmul.f32.vlgmr.msrb.gmra.mxu1 %v3139_v6 }
 0x278   :  { %974 = vmatmul.f32.vlgmr.msrb.gmra.mxu2 %v3139_v6  ;;  %994 = vmatmul.f32.vlgmr.msrb.gmra.mxu3 %v3139_v6  ;;  %v3243_v6 = vld [vmem:[#allocation14 + $0x10] sm:$0xff] }
 0x279   :  { %1226 = vmatpush.msrb.mxu0 %v2978_v7  ;;  %1246 = vmatpush.msrb.mxu1 %v2981_v54  ;;  %3693 = vst [vmem:[#allocation58_spill] sm:$0xff] %v3243_v6 }
 0x27a   :  { %1266 = vmatpush.msrb.mxu2 %v3147_v59  ;;  %1286 = vmatpush.msrb.mxu3 %v2985_v15 }
 0x27b   :  { %1227 = vmatpush.msrb.mxu0 %v2988_v3  ;;  %1247 = vmatpush.msrb.mxu1 %v2991_v1 }
 0x27c   :  { %1267 = vmatpush.msrb.mxu2 %v3153_v34  ;;  %1287 = vmatpush.msrb.mxu3 %v2995_v13 }
 0x27d   :  { %1228 = vmatpush.msrb.mxu0 %v2998_v63  ;;  %1248 = vmatpush.msrb.mxu1 %v3001_v4 }
 0x27e   :  { %1268 = vmatpush.msrb.mxu2 %v3159_v27  ;;  %1288 = vmatpush.msrb.mxu3 %v3005_v60 }
 0x27f   :  { %1229 = vmatpush.msrb.mxu0 %v3008_v16  ;;  %1249 = vmatpush.msrb.mxu1 %v3011_v5 }
 0x280   :  { %1269 = vmatpush.msrb.mxu2 %v3165_v8  ;;  %1289 = vmatpush.msrb.mxu3 %v3015_v24 }
 0x281   :  { %1230 = vmatpush.msrb.mxu0 %v3018_v25  ;;  %1250 = vmatpush.msrb.mxu1 %v3021_v10 }
 0x282   :  { %1270 = vmatpush.msrb.mxu2 %v3171_v58  ;;  %1290 = vmatpush.msrb.mxu3 %v3025_v26 }
 0x283   :  { %1231 = vmatpush.msrb.mxu0 %v3028_v28  ;;  %1251 = vmatpush.msrb.mxu1 %v3031_v11 }
 0x284   :  { %1271 = vmatpush.msrb.mxu2 %v3177_v32  ;;  %1291 = vmatpush.msrb.mxu3 %v3035_v29 }
 0x285   :  { %1232 = vmatpush.msrb.mxu0 %v3038_v30  ;;  %1252 = vmatpush.msrb.mxu1 %v3041_v12 }
 0x286   :  { %1272 = vmatpush.msrb.mxu2 %v3183_v37  ;;  %1292 = vmatpush.msrb.mxu3 %v3045_v33 }
 0x287   :  { %1233 = vmatpush.msrb.mxu0 %v3048_v36  ;;  %1253 = vmatpush.msrb.mxu1 %v3051_v17 }
 0x288   :  { %1273 = vmatpush.msrb.mxu2 %v3189_v45  ;;  %1293 = vmatpush.msrb.mxu3 %v3055_v39 }
 0x289   :  { %1234 = vmatpush.msrb.mxu0 %v3058_v40  ;;  %1254 = vmatpush.msrb.mxu1 %v3061_v18 }
 0x28a   :  { %1274 = vmatpush.msrb.mxu2 %v3195_v50  ;;  %1294 = vmatpush.msrb.mxu3 %v3065_v43 }
 0x28b   :  { %1235 = vmatpush.msrb.mxu0 %v3068_v44  ;;  %1255 = vmatpush.msrb.mxu1 %v3071_v20 }
 0x28c   :  { %1275 = vmatpush.msrb.mxu2 %v3201_v49  ;;  %1295 = vmatpush.msrb.mxu3 %v3075_v48 }
 0x28d   :  { %1236 = vmatpush.msrb.mxu0 %v3078_v52  ;;  %1256 = vmatpush.msrb.mxu1 %v3081_v21 }
 0x28e   :  { %1276 = vmatpush.msrb.mxu2 %v3207_v62  ;;  %1296 = vmatpush.msrb.mxu3 %v3085_v53 }
 0x28f   :  { %1237 = vmatpush.msrb.mxu0 %v3088_v56  ;;  %1257 = vmatpush.msrb.mxu1 %v3091_v23 }
 0x290   :  { %1277 = vmatpush.msrb.mxu2 %v3213_v42  ;;  %1297 = vmatpush.msrb.mxu3 %v3095_v35 }
 0x291   :  { %1238 = vmatpush.msrb.mxu0 %v3098_v14  ;;  %1258 = vmatpush.msrb.mxu1 %v3101_v19  ;;  %v3698_v19 = vld [vmem:[#allocation67_spill] sm:$0xff] }
 0x292   :  { %1278 = vmatpush.msrb.mxu2 %v3219_v2  ;;  %1298 = vmatpush.msrb.mxu3 %v3222_v41  ;;  %v3697_v41 = vld [vmem:[#allocation60_spill] sm:$0xff] }
 0x293   :  { %1239 = vmatpush.msrb.mxu0 %v3683_v0  ;;  %1259 = vmatpush.msrb.mxu1 %v3684_v55 }
 0x294   :  { %1279 = vmatpush.msrb.mxu2 %v3227_v61  ;;  %1299 = vmatpush.msrb.mxu3 %v3230_v47  ;;  %v3246_v47 = vld [vmem:[#allocation14 + $0x18] sm:$0xff] }
 0x295   :  { %1240 = vmatpush.msrb.mxu0 %v3687_v22  ;;  %1260 = vmatpush.msrb.mxu1 %v3688_v38  ;;  %3694 = vst [vmem:[#allocation64_spill] sm:$0xff] %v3246_v47  ;;  %v3695_v38 = vld [vmem:[#allocation73_spill] sm:$0xff]  ;;  %v3696_v22 = vld [vmem:[#allocation27_spill] sm:$0xff] }
 0x296   :  { %1280 = vmatpush.msrb.mxu2 %v3235_v46  ;;  %1300 = vmatpush.msrb.mxu3 %v3238_v57  ;;  %v218_v61 = vadd.f32 %v3696_v22, %v3695_v38 }
 0x297   :  { %1241 = vmatpush.msrb.mxu0 %v3691_v51  ;;  %1261 = vmatpush.msrb.mxu1 %v3692_v31 }
 0x298   :  { %1281 = vmatpush.msrb.mxu2 %v3243_v6  ;;  %1301 = vmatpush.msrb.mxu3 %v3246_v47 }
 0x2f4   :  { %v935_v46 = vpop.f32.mrf.mxu0  ;;  %v955_v55 = vpop.f32.mrf.mxu1 }
 0x2f5   :  { %v998_v0 = vadd.f32 %v935_v46, %v218_v61  ;;  %v999_v57 = vadd.f32 %v955_v55, %v3697_v41  ;;  %v3699_v41 = vld [vmem:[#allocation59_spill] sm:$0xff] }
 0x2f7   :  { %v1863_v2 = vmul.f32 -1.442695, %v998_v0  ;;  %v1864_v51 = vmul.f32 -1.442695, %v999_v57 }
 0x2f9   :  { %1948 = vpow2.f32 %v1863_v2 }
 0x2fa   :  { %1950 = vpow2.f32 %v1864_v51 }
 0x2fb   :  { %v995_v31 = vpop.f32.mrf.mxu3  ;;  %v975_v22 = vpop.f32.mrf.mxu2 }
 0x2fc   :  { %v1001_v14 = vadd.f32 %v995_v31, %v3698_v19  ;;  %v1000_v0 = vadd.f32 %v975_v22, %v3699_v41 }
 0x2fe   :  { %v1865_v6 = vmul.f32 -1.442695, %v1001_v14 }
 0x2ff   :  { %v1949_v35 = vpop.eup %1948 }
 0x300   :  { %v1951_v42 = vpop.eup %1950  ;;  %v1005_v23 = vadd.f32 1.0, %v1949_v35  ;;  %1952 = vpow2.f32 %v1865_v6 }
 0x301   :  { %v1024_v47 = vadd.f32 1.0, %v1951_v42 }
 0x302   :  { %1954 = vrcp.f32 %v1005_v23  ;;  %v1017_v14 = vand.u32 2147483648, %v1005_v23  ;;  %v1015_v6 = vand.u32 2147483647, %v1005_v23  ;;  %vm1011_vm7 = vweird.f32 %v1005_v23 }
 0x303   :  { %1956 = vrcp.f32 %v1024_v47  ;;  %v1036_v31 = vand.u32 2147483648, %v1024_v47  ;;  %v1034_v56 = vand.u32 2147483647, %v1024_v47  ;;  %vm1030_vm8 = vweird.f32 %v1024_v47 }
 0x304   :  { %v1018_v22 = vor.u32 1.1754944e-38, %v1017_v14  ;;  %vm1016_vm11 = vcmp.eq.f32.partialorder %v1015_v6, 8.507059e+37 }
 0x305   :  { %vm1035_vm12 = vcmp.eq.f32.partialorder %v1034_v56, 8.507059e+37 }
 0x306   :  { %v1953_v38 = vpop.eup %1952 }
 0x307   :  { %v1044_v61 = vadd.f32 1.0, %v1953_v38 }
 0x308   :  { %v1955_v46 = vpop.eup %1954 }
 0x309   :  { %v1957_v55 = vpop.eup %1956  ;;  %v1007_v2 = vmul.f32 %v1955_v46, %v1005_v23  ;;  %1958 = vrcp.f32 %v1044_v61  ;;  %vm1012_vm5 = vweird.f32 %v1955_v46  ;;  %v1056_v14 = vand.u32 2147483648, %v1044_v61 }
 0x30a   :  { %v1026_v57 = vmul.f32 %v1957_v55, %v1024_v47  ;;  %1960 = vtanh.f32 %v1000_v0  ;;  %vm1031_vm6 = vweird.f32 %v1957_v55  ;;  %vm1013_vm9 = vmor %vm1011_vm7, %vm1012_vm5  ;;  %vm1050_vm14 = vweird.f32 %v1044_v61 }
 0x30b   :  { %v1008_v51 = vsub.f32 1.0, %v1007_v2  ;;  %vm1032_vm10 = vmor %vm1030_vm8, %vm1031_vm6  ;;  %v1037_v2 = vor.u32 1.1754944e-38, %v1036_v31  ;;  %v1057_v6 = vor.u32 1.1754944e-38, %v1056_v14  ;;  %v3719_v14 = vld [vmem:[#allocation36_spill] sm:$0xff] }
 0x30c   :  { %v1027_v19 = vsub.f32 1.0, %v1026_v57 }
 0x30d   :  { %v1009_v35 = vmul.f32 %v1955_v46, %v1008_v51 }
 0x30e   :  { %v1028_v42 = vmul.f32 %v1957_v55, %v1027_v19 }
 0x30f   :  { %v1959_v53 = vpop.eup %1958  ;;  %v1010_v38 = vadd.f32 %v1955_v46, %v1009_v35 }
 0x310   :  { %v1029_v41 = vadd.f32 %v1957_v55, %v1028_v42  ;;  %v1046_v62 = vmul.f32 %v1959_v53, %v1044_v61  ;;  %v1961_v0 = vpop.eup %1960  ;;  %vm1051_vm13 = vweird.f32 %v1959_v53  ;;  %v3708_v42 = vld [vmem:[#allocation37_spill] sm:$0xff] }
 0x311   :  { %v1014_v57 = vsel %vm1013_vm9, %v1955_v46, %v1010_v38  ;;  %v1054_v46 = vand.u32 2147483647, %v1044_v61  ;;  %vm1052_vm15 = vmor %vm1050_vm14, %vm1051_vm13  ;;  %v3707_v61 = vld [vmem:[#allocation46_spill] sm:$0xff]  ;;  %v3709_v38 = vld [vmem:[#allocation39_spill] sm:$0xff] }
 0x312   :  { %v1019_v21 = vsel %vm1016_vm11, %v1018_v22, %v1014_v57  ;;  %v1033_v51 = vsel %vm1032_vm10, %v1957_v55, %v1029_v41  ;;  %v1047_v52 = vsub.f32 1.0, %v1046_v62  ;;  %v3710_v22 = vld [vmem:[#allocation30_spill] sm:$0xff]  ;;  %v3713_v57 = vld [vmem:[#allocation40_spill] sm:$0xff] }
 0x313   :  { %v1038_v19 = vsel %vm1035_vm12, %v1037_v2, %v1033_v51  ;;  %v1061_v48 = vmul.f32 %v1961_v0, %v1019_v21  ;;  %vm1055_vm0 = vcmp.eq.f32.partialorder %v1054_v46, 8.507059e+37  ;;  %v3703_v21 = vld [vmem:[#allocation33_spill] sm:$0xff]  ;;  %v3711_v41 = vld [vmem:[#allocation34_spill] sm:$0xff]  ;;  %v3712_v2 = vld [vmem:[#allocation47_spill] sm:$0xff] }
 0x314   :  { %v1060_v49 = vmul.f32 %v1038_v19, %v3136_v9  ;;  %v1048_v35 = vmul.f32 %v1959_v53, %v1047_v52  ;;  %v3702_v52 = vld [vmem:[#allocation45_spill] sm:$0xff]  ;;  %v3705_v9 = vld [vmem:[#allocation43_spill] sm:$0xff]  ;;  %v3714_v0 = vld [vmem:[#allocation50_spill] sm:$0xff] }
 0x315   :  { %v3715_v51 = vld [vmem:[#allocation41_spill] sm:$0xff]  ;;  %v3716_v19 = vld [vmem:[#allocation32_spill] sm:$0xff] }
 0x316   :  { %v3255_v23 = vadd.f32 %v1061_v48, %v1060_v49  ;;  %v1049_v47 = vadd.f32 %v1959_v53, %v1048_v35  ;;  %v3701_v48 = vld [vmem:[#allocation49_spill] sm:$0xff]  ;;  %v3706_v49 = vld [vmem:[#allocation31_spill] sm:$0xff]  ;;  %v3717_v35 = vld [vmem:[#allocation44_spill] sm:$0xff] }
 0x317   :  { %v3720_v46 = vld [vmem:[#allocation48_spill] sm:$0xff] }
 0x318   :  { %1962 = vtanh.f32 %v3255_v23  ;;  %v1053_v31 = vsel %vm1052_vm15, %v1959_v53, %v1049_v47  ;;  %v3704_v53 = vld [vmem:[#allocation28_spill] sm:$0xff]  ;;  %v3718_v47 = vld [vmem:[#allocation55_spill] sm:$0xff] }
 0x319   :  { %v1058_v62 = vsel %vm1055_vm0, %v1057_v6, %v1053_v31  ;;  %v3721_v31 = vld [vmem:[#allocation61_spill] sm:$0xff]  ;;  %v3722_v6 = vld [vmem:[#allocation54_spill] sm:$0xff] }
 0x31e   :  { %v1963_v56 = vpop.eup %1962 }
 0x31f   :  { %v3258_v55 = vmul.f32 %v1963_v56, %v1058_v62  ;;  %v3723_v56 = vld [vmem:[#allocation42_spill] sm:$0xff]  ;;  %v3724_v62 = vld [vmem:[#allocation35_spill] sm:$0xff] }
 0x321   :  { %3700 = vst [vmem:[#allocation57_spill] sm:$0xff] %v3258_v55  ;;  %1088 = vmatmul.f32.vlgmr.msra.gmra.mxu0 %v3258_v55  ;;  %1108 = vmatmul.f32.vlgmr.msra.gmra.mxu1 %v3258_v55 }
 0x322   :  { %1128 = vmatmul.f32.vlgmr.msra.gmra.mxu2 %v3258_v55  ;;  %1148 = vmatmul.f32.vlgmr.msra.gmra.mxu3 %v3258_v55  ;;  %v3725_v55 = vld [vmem:[#allocation58_spill] sm:$0xff] }
 0x323   :  { %1380 = vmatpush.msra.mxu0 %v2978_v7  ;;  %1400 = vmatpush.msra.mxu1 %v2981_v54 }
 0x324   :  { %1420 = vmatpush.msra.mxu2 %v3147_v59  ;;  %1440 = vmatpush.msra.mxu3 %v2985_v15 }
 0x325   :  { %1381 = vmatpush.msra.mxu0 %v2988_v3  ;;  %1401 = vmatpush.msra.mxu1 %v2991_v1 }
 0x326   :  { %1421 = vmatpush.msra.mxu2 %v3153_v34  ;;  %1441 = vmatpush.msra.mxu3 %v2995_v13 }
 0x327   :  { %1382 = vmatpush.msra.mxu0 %v2998_v63  ;;  %1402 = vmatpush.msra.mxu1 %v3001_v4 }
 0x328   :  { %1422 = vmatpush.msra.mxu2 %v3159_v27  ;;  %1442 = vmatpush.msra.mxu3 %v3005_v60 }
 0x329   :  { %1383 = vmatpush.msra.mxu0 %v3008_v16  ;;  %1403 = vmatpush.msra.mxu1 %v3011_v5 }
 0x32a   :  { %1423 = vmatpush.msra.mxu2 %v3165_v8  ;;  %1443 = vmatpush.msra.mxu3 %v3015_v24 }
 0x32b   :  { %1384 = vmatpush.msra.mxu0 %v3018_v25  ;;  %1404 = vmatpush.msra.mxu1 %v3021_v10 }
 0x32c   :  { %1424 = vmatpush.msra.mxu2 %v3171_v58  ;;  %1444 = vmatpush.msra.mxu3 %v3025_v26 }
 0x32d   :  { %1385 = vmatpush.msra.mxu0 %v3028_v28  ;;  %1405 = vmatpush.msra.mxu1 %v3031_v11 }
 0x32e   :  { %1425 = vmatpush.msra.mxu2 %v3177_v32  ;;  %1445 = vmatpush.msra.mxu3 %v3035_v29 }
 0x32f   :  { %1386 = vmatpush.msra.mxu0 %v3038_v30  ;;  %1406 = vmatpush.msra.mxu1 %v3041_v12 }
 0x330   :  { %1426 = vmatpush.msra.mxu2 %v3183_v37  ;;  %1446 = vmatpush.msra.mxu3 %v3045_v33 }
 0x331   :  { %1387 = vmatpush.msra.mxu0 %v3048_v36  ;;  %1407 = vmatpush.msra.mxu1 %v3051_v17 }
 0x332   :  { %1427 = vmatpush.msra.mxu2 %v3189_v45  ;;  %1447 = vmatpush.msra.mxu3 %v3055_v39 }
 0x333   :  { %1388 = vmatpush.msra.mxu0 %v3058_v40  ;;  %1408 = vmatpush.msra.mxu1 %v3061_v18 }
 0x334   :  { %1428 = vmatpush.msra.mxu2 %v3195_v50  ;;  %1448 = vmatpush.msra.mxu3 %v3065_v43 }
 0x335   :  { %1389 = vmatpush.msra.mxu0 %v3068_v44  ;;  %1409 = vmatpush.msra.mxu1 %v3071_v20 }
 0x336   :  { %1429 = vmatpush.msra.mxu2 %v3701_v48  ;;  %1449 = vmatpush.msra.mxu3 %v3702_v52 }
 0x337   :  { %1390 = vmatpush.msra.mxu0 %v3703_v21  ;;  %1410 = vmatpush.msra.mxu1 %v3704_v53 }
 0x338   :  { %1430 = vmatpush.msra.mxu2 %v3705_v9  ;;  %1450 = vmatpush.msra.mxu3 %v3706_v49 }
 0x339   :  { %1391 = vmatpush.msra.mxu0 %v3707_v61  ;;  %1411 = vmatpush.msra.mxu1 %v3708_v42 }
 0x33a   :  { %1431 = vmatpush.msra.mxu2 %v3709_v38  ;;  %1451 = vmatpush.msra.mxu3 %v3710_v22 }
 0x33b   :  { %1392 = vmatpush.msra.mxu0 %v3711_v41  ;;  %1412 = vmatpush.msra.mxu1 %v3712_v2  ;;  %v3729_v2 = vld [vmem:[#allocation63_spill] sm:$0xff] }
 0x33c   :  { %1432 = vmatpush.msra.mxu2 %v3713_v57  ;;  %1452 = vmatpush.msra.mxu3 %v3714_v0 }
 0x33d   :  { %1393 = vmatpush.msra.mxu0 %v3715_v51  ;;  %1413 = vmatpush.msra.mxu1 %v3716_v19  ;;  %v3726_v51 = vld [vmem:[#allocation64_spill] sm:$0xff]  ;;  %v3727_v19 = vld [vmem:[#allocation73_spill] sm:$0xff] }
 0x33e   :  { %1433 = vmatpush.msra.mxu2 %v3717_v35  ;;  %1453 = vmatpush.msra.mxu3 %v3718_v47  ;;  %v3728_v35 = vld [vmem:[#allocation51_spill] sm:$0xff] }
 0x33f   :  { %1394 = vmatpush.msra.mxu0 %v3719_v14  ;;  %1414 = vmatpush.msra.mxu1 %v3720_v46  ;;  %v221_v0 = vadd.f32 %v3728_v35, %v3727_v19 }
 0x340   :  { %1434 = vmatpush.msra.mxu2 %v3721_v31  ;;  %1454 = vmatpush.msra.mxu3 %v3722_v6 }
 0x341   :  { %1395 = vmatpush.msra.mxu0 %v3723_v56  ;;  %1415 = vmatpush.msra.mxu1 %v3724_v62  ;;  %v3730_v56 = vld [vmem:[#allocation70_spill] sm:$0xff] }
 0x342   :  { %1435 = vmatpush.msra.mxu2 %v3725_v55  ;;  %1455 = vmatpush.msra.mxu3 %v3726_v51 }
 0x39e   :  { %v1089_v47 = vpop.f32.mrf.mxu0  ;;  %v1109_v57 = vpop.f32.mrf.mxu1 }
 0x39f   :  { %v1152_v14 = vadd.f32 %v1089_v47, %v221_v0  ;;  %v1153_v46 = vadd.f32 %v1109_v57, %v3729_v2  ;;  %v3731_v2 = vld [vmem:[#allocation62_spill] sm:$0xff] }
 0x3a1   :  { %v1866_v41 = vmul.f32 -1.442695, %v1152_v14  ;;  %v1867_v31 = vmul.f32 -1.442695, %v1153_v46 }
 0x3a3   :  { %1964 = vpow2.f32 %v1866_v41 }
 0x3a4   :  { %1966 = vpow2.f32 %v1867_v31 }
 0x3a5   :  { %v1149_v6 = vpop.f32.mrf.mxu3  ;;  %v1129_v35 = vpop.f32.mrf.mxu2 }
 0x3a6   :  { %v1155_v22 = vadd.f32 %v1149_v6, %v3730_v56  ;;  %v1154_v57 = vadd.f32 %v1129_v35, %v3731_v2 }
 0x3a8   :  { %v1868_v62 = vmul.f32 -1.442695, %v1155_v22 }
 0x3a9   :  { %v1965_v38 = vpop.eup %1964 }
 0x3aa   :  { %v1967_v55 = vpop.eup %1966  ;;  %v1159_v42 = vadd.f32 1.0, %v1965_v38  ;;  %1968 = vpow2.f32 %v1868_v62 }
 0x3ab   :  { %v1178_v51 = vadd.f32 1.0, %v1967_v55 }
 0x3ac   :  { %1970 = vrcp.f32 %v1159_v42  ;;  %v1171_v22 = vand.u32 2147483648, %v1159_v42  ;;  %v1169_v55 = vand.u32 2147483647, %v1159_v42  ;;  %vm1165_vm3 = vweird.f32 %v1159_v42 }
 0x3ad   :  { %1972 = vrcp.f32 %v1178_v51  ;;  %v1190_v56 = vand.u32 2147483648, %v1178_v51  ;;  %v1188_v61 = vand.u32 2147483647, %v1178_v51  ;;  %vm1184_vm4 = vweird.f32 %v1178_v51 }
 0x3ae   :  { %v1172_v35 = vor.u32 1.1754944e-38, %v1171_v22  ;;  %vm1170_vm7 = vcmp.eq.f32.partialorder %v1169_v55, 8.507059e+37 }
 0x3af   :  { %vm1189_vm8 = vcmp.eq.f32.partialorder %v1188_v61, 8.507059e+37 }
 0x3b0   :  { %v1969_v19 = vpop.eup %1968 }
 0x3b1   :  { %v1198_v0 = vadd.f32 1.0, %v1969_v19 }
 0x3b2   :  { %v1971_v47 = vpop.eup %1970 }
 0x3b3   :  { %v1973_v14 = vpop.eup %1972  ;;  %v1161_v41 = vmul.f32 %v1971_v47, %v1159_v42  ;;  %1974 = vrcp.f32 %v1198_v0  ;;  %vm1166_vm1 = vweird.f32 %v1971_v47  ;;  %v1210_v22 = vand.u32 2147483648, %v1198_v0 }
 0x3b4   :  { %v1180_v46 = vmul.f32 %v1973_v14, %v1178_v51  ;;  %1976 = vtanh.f32 %v1154_v57  ;;  %vm1185_vm2 = vweird.f32 %v1973_v14  ;;  %vm1167_vm5 = vmor %vm1165_vm3, %vm1166_vm1  ;;  %vm1204_vm10 = vweird.f32 %v1198_v0 }
 0x3b5   :  { %v1162_v31 = vsub.f32 1.0, %v1161_v41  ;;  %vm1186_vm6 = vmor %vm1184_vm4, %vm1185_vm2  ;;  %v1191_v41 = vor.u32 1.1754944e-38, %v1190_v56  ;;  %v1211_v55 = vor.u32 1.1754944e-38, %v1210_v22 }
 0x3b6   :  { %v1181_v6 = vsub.f32 1.0, %v1180_v46 }
 0x3b7   :  { %v1163_v38 = vmul.f32 %v1971_v47, %v1162_v31 }
 0x3b8   :  { %v1182_v62 = vmul.f32 %v1973_v14, %v1181_v6 }
 0x3b9   :  { %v1975_v49 = vpop.eup %1974  ;;  %v1164_v19 = vadd.f32 %v1971_v47, %v1163_v38 }
 0x3ba   :  { %v1183_v2 = vadd.f32 %v1973_v14, %v1182_v62  ;;  %v1200_v9 = vmul.f32 %v1975_v49, %v1198_v0  ;;  %v1977_v57 = vpop.eup %1976  ;;  %vm1205_vm9 = vweird.f32 %v1975_v49 }
 0x3bb   :  { %v1168_v46 = vsel %vm1167_vm5, %v1971_v47, %v1164_v19  ;;  %v1208_v47 = vand.u32 2147483647, %v1198_v0  ;;  %vm1206_vm11 = vmor %vm1204_vm10, %vm1205_vm9 }
 0x3bc   :  { %v1173_v53 = vsel %vm1170_vm7, %v1172_v35, %v1168_v46  ;;  %v1187_v31 = vsel %vm1186_vm6, %v1973_v14, %v1183_v2  ;;  %v1201_v21 = vsub.f32 1.0, %v1200_v9  ;;  %v3762_v2 = vld [vmem:[#allocation65_spill] sm:$0xff] }
 0x3bd   :  { %v1192_v6 = vsel %vm1189_vm8, %v1191_v41, %v1187_v31  ;;  %v1215_v52 = vmul.f32 %v1977_v57, %v1173_v53  ;;  %vm1209_vm12 = vcmp.eq.f32.partialorder %v1208_v47, 8.507059e+37 }
 0x3be   :  { %v1214_v48 = vmul.f32 %v1192_v6, %v3255_v23  ;;  %v1202_v38 = vmul.f32 %v1975_v49, %v1201_v21 }
 0x3c0   :  { %v3334_v42 = vadd.f32 %v1215_v52, %v1214_v48  ;;  %v1203_v51 = vadd.f32 %v1975_v49, %v1202_v38 }
 0x3c2   :  { %1978 = vtanh.f32 %v3334_v42  ;;  %v1207_v56 = vsel %vm1206_vm11, %v1975_v49, %v1203_v51 }
 0x3c3   :  { %v1212_v9 = vsel %vm1209_vm12, %v1211_v55, %v1207_v56 }
 0x3c8   :  { %v1979_v61 = vpop.eup %1978 }
 0x3c9   :  { %v3337_v14 = vmul.f32 %v1979_v61, %v1212_v9 }
 0x3cb   :  { %1242 = vmatmul.f32.vlgmr.msrb.gmra.mxu0 %v3337_v14  ;;  %1262 = vmatmul.f32.vlgmr.msrb.gmra.mxu1 %v3337_v14 }
 0x3cc   :  { %1282 = vmatmul.f32.vlgmr.msrb.gmra.mxu2 %v3337_v14  ;;  %1302 = vmatmul.f32.vlgmr.msrb.gmra.mxu3 %v3337_v14 }
 0x3cd   :  { %1534 = vmatpush.msrb.mxu0 %v2978_v7  ;;  %1554 = vmatpush.msrb.mxu1 %v2981_v54  ;;  %v3732_v7 = vld [vmem:[#allocation49_spill] sm:$0xff] }
 0x3ce   :  { %1574 = vmatpush.msrb.mxu2 %v3147_v59  ;;  %1594 = vmatpush.msrb.mxu3 %v2985_v15  ;;  %v3733_v54 = vld [vmem:[#allocation45_spill] sm:$0xff] }
 0x3cf   :  { %1535 = vmatpush.msrb.mxu0 %v2988_v3  ;;  %1555 = vmatpush.msrb.mxu1 %v2991_v1  ;;  %v3734_v15 = vld [vmem:[#allocation33_spill] sm:$0xff]  ;;  %v3735_v3 = vld [vmem:[#allocation28_spill] sm:$0xff]  ;;  %v3736_v1 = vld [vmem:[#allocation43_spill] sm:$0xff] }
 0x3d0   :  { %1575 = vmatpush.msrb.mxu2 %v3153_v34  ;;  %1595 = vmatpush.msrb.mxu3 %v2995_v13  ;;  %v3737_v13 = vld [vmem:[#allocation31_spill] sm:$0xff] }
 0x3d1   :  { %1536 = vmatpush.msrb.mxu0 %v2998_v63  ;;  %1556 = vmatpush.msrb.mxu1 %v3001_v4  ;;  %v3738_v63 = vld [vmem:[#allocation46_spill] sm:$0xff]  ;;  %v3739_v4 = vld [vmem:[#allocation37_spill] sm:$0xff] }
 0x3d2   :  { %1576 = vmatpush.msrb.mxu2 %v3159_v27  ;;  %1596 = vmatpush.msrb.mxu3 %v3005_v60  ;;  %v3740_v60 = vld [vmem:[#allocation39_spill] sm:$0xff] }
 0x3d3   :  { %1537 = vmatpush.msrb.mxu0 %v3008_v16  ;;  %1557 = vmatpush.msrb.mxu1 %v3011_v5  ;;  %v3741_v16 = vld [vmem:[#allocation30_spill] sm:$0xff] }
 0x3d4   :  { %1577 = vmatpush.msrb.mxu2 %v3165_v8  ;;  %1597 = vmatpush.msrb.mxu3 %v3015_v24  ;;  %v3742_v5 = vld [vmem:[#allocation34_spill] sm:$0xff]  ;;  %v3743_v24 = vld [vmem:[#allocation47_spill] sm:$0xff] }
 0x3d5   :  { %1538 = vmatpush.msrb.mxu0 %v3018_v25  ;;  %1558 = vmatpush.msrb.mxu1 %v3021_v10  ;;  %v3744_v25 = vld [vmem:[#allocation40_spill] sm:$0xff]  ;;  %v3745_v10 = vld [vmem:[#allocation50_spill] sm:$0xff] }
 0x3d6   :  { %1578 = vmatpush.msrb.mxu2 %v3171_v58  ;;  %1598 = vmatpush.msrb.mxu3 %v3025_v26  ;;  %v3746_v26 = vld [vmem:[#allocation41_spill] sm:$0xff]  ;;  %v3760_v8 = vld [vmem:[#allocation66_spill] sm:$0xff] }
 0x3d7   :  { %1539 = vmatpush.msrb.mxu0 %v3028_v28  ;;  %1559 = vmatpush.msrb.mxu1 %v3031_v11  ;;  %v3747_v28 = vld [vmem:[#allocation32_spill] sm:$0xff] }
 0x3d8   :  { %1579 = vmatpush.msrb.mxu2 %v3177_v32  ;;  %1599 = vmatpush.msrb.mxu3 %v3035_v29  ;;  %v3748_v11 = vld [vmem:[#allocation44_spill] sm:$0xff]  ;;  %v3749_v29 = vld [vmem:[#allocation55_spill] sm:$0xff] }
 0x3d9   :  { %1540 = vmatpush.msrb.mxu0 %v3038_v30  ;;  %1560 = vmatpush.msrb.mxu1 %v3041_v12  ;;  %v3750_v30 = vld [vmem:[#allocation36_spill] sm:$0xff] }
 0x3da   :  { %1580 = vmatpush.msrb.mxu2 %v3183_v37  ;;  %1600 = vmatpush.msrb.mxu3 %v3045_v33  ;;  %v3751_v12 = vld [vmem:[#allocation48_spill] sm:$0xff]  ;;  %v3752_v33 = vld [vmem:[#allocation61_spill] sm:$0xff] }
 0x3db   :  { %1541 = vmatpush.msrb.mxu0 %v3048_v36  ;;  %1561 = vmatpush.msrb.mxu1 %v3051_v17  ;;  %v3753_v36 = vld [vmem:[#allocation54_spill] sm:$0xff] }
 0x3dc   :  { %1581 = vmatpush.msrb.mxu2 %v3189_v45  ;;  %1601 = vmatpush.msrb.mxu3 %v3055_v39  ;;  %v3754_v17 = vld [vmem:[#allocation42_spill] sm:$0xff]  ;;  %v3755_v39 = vld [vmem:[#allocation35_spill] sm:$0xff] }
 0x3dd   :  { %1542 = vmatpush.msrb.mxu0 %v3058_v40  ;;  %1562 = vmatpush.msrb.mxu1 %v3061_v18  ;;  %v3756_v40 = vld [vmem:[#allocation58_spill] sm:$0xff]  ;;  %v3757_v18 = vld [vmem:[#allocation64_spill] sm:$0xff] }
 0x3de   :  { %1582 = vmatpush.msrb.mxu2 %v3195_v50  ;;  %1602 = vmatpush.msrb.mxu3 %v3065_v43  ;;  %v3758_v43 = vld [vmem:[#allocation73_spill] sm:$0xff]  ;;  %v3761_v50 = vld [vmem:[#allocation74_spill] sm:$0xff] }
 0x3df   :  { %1543 = vmatpush.msrb.mxu0 %v3068_v44  ;;  %1563 = vmatpush.msrb.mxu1 %v3071_v20  ;;  %v3759_v44 = vld [vmem:[#allocation52_spill] sm:$0xff] }
 0x3e0   :  { %1583 = vmatpush.msrb.mxu2 %v3732_v7  ;;  %1603 = vmatpush.msrb.mxu3 %v3733_v54  ;;  %v224_v20 = vadd.f32 %v3759_v44, %v3758_v43  ;;  %v1704_v44 = vld [vmem:[#allocation15 + $0x58] sm:$0xff] }
 0x3e1   :  { %1544 = vmatpush.msrb.mxu0 %v3734_v15  ;;  %1564 = vmatpush.msrb.mxu1 %v3735_v3 }
 0x3e2   :  { %1584 = vmatpush.msrb.mxu2 %v3736_v1  ;;  %1604 = vmatpush.msrb.mxu3 %v3737_v13 }
 0x3e3   :  { %1545 = vmatpush.msrb.mxu0 %v3738_v63  ;;  %1565 = vmatpush.msrb.mxu1 %v3739_v4 }
 0x3e4   :  { %1585 = vmatpush.msrb.mxu2 %v3740_v60  ;;  %1605 = vmatpush.msrb.mxu3 %v3741_v16 }
 0x3e5   :  { %1546 = vmatpush.msrb.mxu0 %v3742_v5  ;;  %1566 = vmatpush.msrb.mxu1 %v3743_v24 }
 0x3e6   :  { %1586 = vmatpush.msrb.mxu2 %v3744_v25  ;;  %1606 = vmatpush.msrb.mxu3 %v3745_v10 }
 0x3e7   :  { %1547 = vmatpush.msrb.mxu0 %v3746_v26  ;;  %1567 = vmatpush.msrb.mxu1 %v3747_v28 }
 0x3e8   :  { %1587 = vmatpush.msrb.mxu2 %v3748_v11  ;;  %1607 = vmatpush.msrb.mxu3 %v3749_v29 }
 0x3e9   :  { %1548 = vmatpush.msrb.mxu0 %v3750_v30  ;;  %1568 = vmatpush.msrb.mxu1 %v3751_v12 }
 0x3ea   :  { %1588 = vmatpush.msrb.mxu2 %v3752_v33  ;;  %1608 = vmatpush.msrb.mxu3 %v3753_v36 }
 0x3eb   :  { %1549 = vmatpush.msrb.mxu0 %v3754_v17  ;;  %1569 = vmatpush.msrb.mxu1 %v3755_v39  ;;  %v1707_v39 = vld [vmem:[#allocation15 + $0x70] sm:$0xff] }
 0x3ec   :  { %1589 = vmatpush.msrb.mxu2 %v3756_v40  ;;  %1609 = vmatpush.msrb.mxu3 %v3757_v18  ;;  %v1706_v40 = vld [vmem:[#allocation15 + $0x68] sm:$0xff]  ;;  %v1705_v18 = vld [vmem:[#allocation15 + $0x60] sm:$0xff] }
 0x448   :  { %v1243_v59 = vpop.f32.mrf.mxu0  ;;  %v1263_v34 = vpop.f32.mrf.mxu1 }
 0x449   :  { %v1306_v27 = vadd.f32 %v1243_v59, %v224_v20  ;;  %v1307_v58 = vadd.f32 %v1263_v34, %v3760_v8  ;;  %v3763_v20 = vld [vmem:[#allocation53_spill] sm:$0xff]  ;;  %v1703_v8 = vld [vmem:[#allocation15 + $0x50] sm:$0xff] }
 0x44a   :  { %v227_v59 = vadd.f32 %v3763_v20, %v3758_v43 }
 0x44b   :  { %v1869_v32 = vmul.f32 -1.442695, %v1306_v27  ;;  %v1870_v37 = vmul.f32 -1.442695, %v1307_v58 }
 0x44d   :  { %1980 = vpow2.f32 %v1869_v32  ;;  %v3764_v32 = vld [vmem:[#allocation69_spill] sm:$0xff] }
 0x44e   :  { %1982 = vpow2.f32 %v1870_v37 }
 0x44f   :  { %v1303_v45 = vpop.f32.mrf.mxu3  ;;  %v1283_v0 = vpop.f32.mrf.mxu2 }
 0x450   :  { %v1309_v23 = vadd.f32 %v1303_v45, %v3761_v50  ;;  %v1308_v41 = vadd.f32 %v1283_v0, %v3762_v2  ;;  %v1702_v45 = vld [vmem:[#allocation15 + $0x48] sm:$0xff] }
 0x452   :  { %v1871_v48 = vmul.f32 -1.442695, %v1309_v23 }
 0x453   :  { %v1981_v52 = vpop.eup %1980 }
 0x454   :  { %v1983_v21 = vpop.eup %1982  ;;  %v1313_v53 = vadd.f32 1.0, %v1981_v52  ;;  %1984 = vpow2.f32 %v1871_v48  ;;  %v1701_v48 = vld [vmem:[#allocation15 + $0x40] sm:$0xff]  ;;  %v1700_v52 = vld [vmem:[#allocation15 + $0x38] sm:$0xff] }
 0x455   :  { %v1332_v49 = vadd.f32 1.0, %v1983_v21  ;;  %v1699_v21 = vld [vmem:[#allocation15 + $0x30] sm:$0xff] }
 0x456   :  { %1986 = vrcp.f32 %v1313_v53  ;;  %v1325_v51 = vand.u32 2147483648, %v1313_v53  ;;  %v1323_v56 = vand.u32 2147483647, %v1313_v53  ;;  %vm1319_vm15 = vweird.f32 %v1313_v53 }
 0x457   :  { %1988 = vrcp.f32 %v1332_v49  ;;  %v1344_v22 = vand.u32 2147483648, %v1332_v49  ;;  %v1342_v61 = vand.u32 2147483647, %v1332_v49  ;;  %vm1338_vm0 = vweird.f32 %v1332_v49 }
 0x458   :  { %v1326_v54 = vor.u32 1.1754944e-38, %v1325_v51  ;;  %vm1324_vm3 = vcmp.eq.f32.partialorder %v1323_v56, 8.507059e+37 }
 0x459   :  { %v1345_v1 = vor.u32 1.1754944e-38, %v1344_v22  ;;  %vm1343_vm4 = vcmp.eq.f32.partialorder %v1342_v61, 8.507059e+37  ;;  %v3766_v61 = vld [vmem:[#allocation68_spill] sm:$0xff] }
 0x45a   :  { %v1985_v62 = vpop.eup %1984 }
 0x45b   :  { %v1352_v19 = vadd.f32 1.0, %v1985_v62  ;;  %v1698_v62 = vld [vmem:[#allocation15 + $0x28] sm:$0xff] }
 0x45c   :  { %v1987_v35 = vpop.eup %1986 }
 0x45d   :  { %v1989_v46 = vpop.eup %1988  ;;  %v1315_v57 = vmul.f32 %v1987_v35, %v1313_v53  ;;  %1990 = vrcp.f32 %v1352_v19  ;;  %vm1320_vm13 = vweird.f32 %v1987_v35  ;;  %v1364_v11 = vand.u32 2147483648, %v1352_v19 }
 0x45e   :  { %v1334_v31 = vmul.f32 %v1989_v46, %v1332_v49  ;;  %1992 = vtanh.f32 %v1308_v41  ;;  %vm1339_vm14 = vweird.f32 %v1989_v46  ;;  %vm1321_vm1 = vmor %vm1319_vm15, %vm1320_vm13  ;;  %vm1358_vm6 = vweird.f32 %v1352_v19  ;;  %v3765_v49 = vld [vmem:[#allocation75_spill] sm:$0xff] }
 0x45f   :  { %v1316_v6 = vsub.f32 1.0, %v1315_v57  ;;  %vm1340_vm2 = vmor %vm1338_vm0, %vm1339_vm14  ;;  %v1362_v29 = vand.u32 2147483647, %v1352_v19  ;;  %v1365_v12 = vor.u32 1.1754944e-38, %v1364_v11 }
 0x460   :  { %v1335_v38 = vsub.f32 1.0, %v1334_v31  ;;  %v1696_v31 = vld [vmem:[#allocation15 + $0x18] sm:$0xff] }
 0x461   :  { %v1317_v47 = vmul.f32 %v1987_v35, %v1316_v6  ;;  %vm1363_vm8 = vcmp.eq.f32.partialorder %v1362_v29, 8.507059e+37  ;;  %v1695_v6 = vld [vmem:[#allocation15 + $0x10] sm:$0xff] }
 0x462   :  { %v1336_v55 = vmul.f32 %v1989_v46, %v1335_v38  ;;  %v1694_v38 = vld [vmem:[#allocation15 + $0x8] sm:$0xff] }
 0x463   :  { %v1991_v9 = vpop.eup %1990  ;;  %v1318_v7 = vadd.f32 %v1987_v35, %v1317_v47  ;;  %v1693_v47 = vld [vmem:[#allocation15] sm:$0xff] }
 0x464   :  { %v1337_v15 = vadd.f32 %v1989_v46, %v1336_v55  ;;  %v1354_v3 = vmul.f32 %v1991_v9, %v1352_v19  ;;  %v1993_v63 = vpop.eup %1992  ;;  %vm1359_vm5 = vweird.f32 %v1991_v9 }
 0x465   :  { %v1322_v13 = vsel %vm1321_vm1, %v1987_v35, %v1318_v7  ;;  %vm1360_vm7 = vmor %vm1358_vm6, %vm1359_vm5  ;;  %v1697_v35 = vld [vmem:[#allocation15 + $0x20] sm:$0xff] }
 0x466   :  { %v1327_v4 = vsel %vm1324_vm3, %v1326_v54, %v1322_v13  ;;  %v1341_v60 = vsel %vm1340_vm2, %v1989_v46, %v1337_v15  ;;  %v1355_v16 = vsub.f32 1.0, %v1354_v3 }
 0x467   :  { %v1346_v5 = vsel %vm1343_vm4, %v1345_v1, %v1341_v60  ;;  %v1369_v24 = vmul.f32 %v1993_v63, %v1327_v4 }
 0x468   :  { %v1368_v25 = vmul.f32 %v1346_v5, %v3334_v42  ;;  %v1356_v10 = vmul.f32 %v1991_v9, %v1355_v16  ;;  %v1708_v42 = vld [vmem:[#allocation15 + $0x78] sm:$0xff] }
 0x46a   :  { %v3413_v26 = vadd.f32 %v1369_v24, %v1368_v25  ;;  %v1357_v28 = vadd.f32 %v1991_v9, %v1356_v10 }
 0x46c   :  { %1994 = vtanh.f32 %v3413_v26  ;;  %v1361_v30 = vsel %vm1360_vm7, %v1991_v9, %v1357_v28 }
 0x46d   :  { %v1366_v36 = vsel %vm1363_vm8, %v1365_v12, %v1361_v30 }
 0x472   :  { %v1995_v33 = vpop.eup %1994 }
 0x473   :  { %v3416_v17 = vmul.f32 %v1995_v33, %v1366_v36 }
 0x475   :  { %1396 = vmatmul.f32.vlgmr.msra.gmra.mxu0 %v3416_v17  ;;  %1416 = vmatmul.f32.vlgmr.msra.gmra.mxu1 %v3416_v17 }
 0x476   :  { %1436 = vmatmul.f32.vlgmr.msra.gmra.mxu2 %v3416_v17  ;;  %1456 = vmatmul.f32.vlgmr.msra.gmra.mxu3 %v3416_v17 }
 0x477   :  { %1713 = vmatpush.msra.mxu0 %v1708_v42 }
 0x479   :  { %1714 = vmatpush.msra.mxu0 %v1707_v39 }
 0x47b   :  { %1715 = vmatpush.msra.mxu0 %v1706_v40 }
 0x47d   :  { %1716 = vmatpush.msra.mxu0 %v1705_v18 }
 0x47f   :  { %1717 = vmatpush.msra.mxu0 %v1704_v44 }
 0x481   :  { %1718 = vmatpush.msra.mxu0 %v1703_v8 }
 0x483   :  { %1719 = vmatpush.msra.mxu0 %v1702_v45 }
 0x485   :  { %1720 = vmatpush.msra.mxu0 %v1701_v48  ;;  %v3770_v48 = vld [vmem:[#allocation57_spill] sm:$0xff] }
 0x487   :  { %1721 = vmatpush.msra.mxu0 %v1700_v52  ;;  %v3771_v52 = vld [vmem:[#allocation56_spill] sm:$0xff] }
 0x489   :  { %1722 = vmatpush.msra.mxu0 %v1699_v21  ;;  %v230_v21 = vadd.f32 %v3771_v52, %v3758_v43 }
 0x48b   :  { %1723 = vmatpush.msra.mxu0 %v1698_v62  ;;  %v3772_v62 = vld [vmem:[#allocation72_spill] sm:$0xff] }
 0x48d   :  { %1724 = vmatpush.msra.mxu0 %v1697_v35 }
 0x48f   :  { %1725 = vmatpush.msra.mxu0 %v1696_v31 }
 0x491   :  { %1726 = vmatpush.msra.mxu0 %v1695_v6 }
 0x493   :  { %1727 = vmatpush.msra.mxu0 %v1694_v38 }
 0x495   :  { %1728 = vmatpush.msra.mxu0 %v1693_v47 }
 0x4f2   :  { %v1397_v34 = vpop.f32.mrf.mxu0  ;;  %v1417_v27 = vpop.f32.mrf.mxu1 }
 0x4f3   :  { %v1460_v58 = vadd.f32 %v1397_v34, %v227_v59  ;;  %v1461_v37 = vadd.f32 %v1417_v27, %v3764_v32 }
 0x4f5   :  { %v1872_v50 = vmul.f32 -1.442695, %v1460_v58  ;;  %v1873_v23 = vmul.f32 -1.442695, %v1461_v37 }
 0x4f7   :  { %1996 = vpow2.f32 %v1872_v50  ;;  %v3768_v50 = vld [vmem:[#allocation29_spill] sm:$0xff] }
 0x4f8   :  { %1998 = vpow2.f32 %v1873_v23  ;;  %v3769_v23 = vld [vmem:[#allocation38_spill] sm:$0xff] }
 0x4f9   :  { %v1457_v53 = vpop.f32.mrf.mxu3  ;;  %v1437_v51 = vpop.f32.mrf.mxu2 }
 0x4fa   :  { %v1463_v0 = vadd.f32 %v1457_v53, %v3765_v49  ;;  %v1462_v9 = vadd.f32 %v1437_v51, %v3766_v61 }
 0x4fc   :  { %v1874_v19 = vmul.f32 -1.442695, %v1463_v0 }
 0x4fd   :  { %v1997_v2 = vpop.eup %1996 }
 0x4fe   :  { %v1999_v41 = vpop.eup %1998  ;;  %v1467_v46 = vadd.f32 1.0, %v1997_v2  ;;  %2000 = vpow2.f32 %v1874_v19 }
 0x4ff   :  { %v1486_v57 = vadd.f32 1.0, %v1999_v41  ;;  %v3443_v41 = vld [vmem:[%s3475_s7] ss:$0 sm:$0xff]  ;;  %s2330_s7 = smov [#allocation18]  }
 0x500   :  { %2002 = vrcp.f32 %v1467_v46  ;;  %v1479_v13 = vand.u32 2147483648, %v1467_v46  ;;  %v1477_v60 = vand.u32 2147483647, %v1467_v46  ;;  %vm1473_vm11 = vweird.f32 %v1467_v46  ;;  %s1787_s24 = sshll.u32 %s2330_s7, 4  ;;  %s1788_s24 = int_to_ptr.vmem [resolvable:$true] %s1787_s24 }
 0x501   :  { %2004 = vrcp.f32 %v1486_v57  ;;  %v1498_v63 = vand.u32 2147483648, %v1486_v57  ;;  %v1496_v5 = vand.u32 2147483647, %v1486_v57  ;;  %vm1492_vm12 = vweird.f32 %v1486_v57 }
 0x502   :  { %v1480_v10 = vor.u32 1.1754944e-38, %v1479_v13  ;;  %vm1478_vm15 = vcmp.eq.f32.partialorder %v1477_v60, 8.507059e+37 }
 0x503   :  { %v1499_v29 = vor.u32 1.1754944e-38, %v1498_v63  ;;  %vm1497_vm0 = vcmp.eq.f32.partialorder %v1496_v5, 8.507059e+37 }
 0x504   :  { %v2001_v22 = vpop.eup %2000 }
 0x505   :  { %v1506_v56 = vadd.f32 1.0, %v2001_v22 }
 0x506   :  { %v2003_v55 = vpop.eup %2002 }
 0x507   :  { %v2005_v7 = vpop.eup %2004  ;;  %v1469_v54 = vmul.f32 %v2003_v55, %v1467_v46  ;;  %2006 = vrcp.f32 %v1506_v56  ;;  %vm1474_vm9 = vweird.f32 %v2003_v55  ;;  %v1518_v34 = vand.u32 2147483648, %v1506_v56 }
 0x508   :  { %v1488_v15 = vmul.f32 %v2005_v7, %v1486_v57  ;;  %2008 = vtanh.f32 %v1462_v9  ;;  %vm1493_vm10 = vweird.f32 %v2005_v7  ;;  %vm1475_vm13 = vmor %vm1473_vm11, %vm1474_vm9  ;;  %vm1512_vm2 = vweird.f32 %v1506_v56 }
 0x509   :  { %v1470_v3 = vsub.f32 1.0, %v1469_v54  ;;  %vm1494_vm14 = vmor %vm1492_vm12, %vm1493_vm10  ;;  %v1516_v27 = vand.u32 2147483647, %v1506_v56  ;;  %v1519_v58 = vor.u32 1.1754944e-38, %v1518_v34  ;;  %v3774_v54 = vld [vmem:[#allocation71_spill] sm:$0xff] }
 0x50a   :  { %v1489_v1 = vsub.f32 1.0, %v1488_v15 }
 0x50b   :  { %v1471_v4 = vmul.f32 %v2003_v55, %v1470_v3  ;;  %vm1517_vm4 = vcmp.eq.f32.partialorder %v1516_v27, 8.507059e+37 }
 0x50c   :  { %v1490_v16 = vmul.f32 %v2005_v7, %v1489_v1 }
 0x50d   :  { %v2007_v24 = vpop.eup %2006  ;;  %v1472_v25 = vadd.f32 %v2003_v55, %v1471_v4 }
 0x50e   :  { %v1491_v28 = vadd.f32 %v2005_v7, %v1490_v16  ;;  %v1508_v11 = vmul.f32 %v2007_v24, %v1506_v56  ;;  %v2009_v12 = vpop.eup %2008  ;;  %vm1513_vm1 = vweird.f32 %v2007_v24 }
 0x50f   :  { %v1476_v30 = vsel %vm1475_vm13, %v2003_v55, %v1472_v25  ;;  %vm1514_vm3 = vmor %vm1512_vm2, %vm1513_vm1 }
 0x510   :  { %v1481_v33 = vsel %vm1478_vm15, %v1480_v10, %v1476_v30  ;;  %v1495_v36 = vsel %vm1494_vm14, %v2005_v7, %v1491_v28  ;;  %v1509_v42 = vsub.f32 1.0, %v1508_v11 }
 0x511   :  { %v1500_v39 = vsel %vm1497_vm0, %v1499_v29, %v1495_v36  ;;  %v1523_v40 = vmul.f32 %v2009_v12, %v1481_v33 }
 0x512   :  { %v1522_v18 = vmul.f32 %v1500_v39, %v3413_v26  ;;  %v1510_v44 = vmul.f32 %v2007_v24, %v1509_v42  ;;  %v3767_v26 = vld [vmem:[#allocation77_spill] sm:$0xff] }
 0x514   :  { %v3428_v20 = vadd.f32 %v1523_v40, %v1522_v18  ;;  %v1511_v59 = vadd.f32 %v2007_v24, %v1510_v44 }
 0x516   :  { %2010 = vtanh.f32 %v3428_v20  ;;  %v1515_v8 = vsel %vm1514_vm3, %v2007_v24, %v1511_v59 }
 0x517   :  { %v1520_v37 = vsel %vm1517_vm4, %v1519_v58, %v1515_v8 }
 0x51c   :  { %v2011_v32 = vpop.eup %2010 }
 0x51d   :  { %v1526_v45 = vmul.f32 %v2011_v32, %v1520_v37 }
 0x51f   :  { %1550 = vmatmul.f32.vlgmr.msrb.gmra.mxu0 %v1526_v45  ;;  %1570 = vmatmul.f32.vlgmr.msrb.gmra.mxu1 %v1526_v45 }
 0x520   :  { %1590 = vmatmul.f32.vlgmr.msrb.gmra.mxu2 %v1526_v45  ;;  %1610 = vmatmul.f32.vlgmr.msrb.gmra.mxu3 %v1526_v45 }
 0x527   :  { %1729 = vmatmul.f32.vlgmr.msra.gmra.mxu0 %v3767_v26 }
 0x52f   :  { %1732 = vmatmul.f32.gmra.mxu0 %v3768_v50 }
 0x537   :  { %1735 = vmatmul.f32.gmra.mxu0 %v3769_v23 }
 0x53f   :  { %1738 = vmatmul.f32.gmra.mxu0 %v3770_v48 }
 0x547   :  { %1741 = vmatmul.f32.gmra.mxu0 %v3337_v14 }
 0x54f   :  { %1744 = vmatmul.f32.gmra.mxu0 %v3416_v17  ;;  %v3773_v17 = vld [vmem:[#allocation76_spill] sm:$0xff] }
 0x557   :  { %1747 = vmatmul.f32.gmra.mxu0 %v1526_v45 }
 0x59c   :  { %v1551_v53 = vpop.f32.mrf.mxu0  ;;  %v1571_v49 = vpop.f32.mrf.mxu1 }
 0x59d   :  { %v1614_v0 = vadd.f32 %v1551_v53, %v230_v21  ;;  %v1615_v19 = vadd.f32 %v1571_v49, %v3772_v62 }
 0x59f   :  { %v1875_v35 = vmul.f32 -1.442695, %v1614_v0  ;;  %v1876_v2 = vmul.f32 -1.442695, %v1615_v19 }
 0x5a1   :  { %2012 = vpow2.f32 %v1875_v35 }
 0x5a2   :  { %2014 = vpow2.f32 %v1876_v2 }
 0x5a3   :  { %v1611_v14 = vpop.f32.mrf.mxu3  ;;  %v1591_v56 = vpop.f32.mrf.mxu2 }
 0x5a4   :  { %v1617_v46 = vadd.f32 %v1611_v14, %v3773_v17  ;;  %v1730_v57 = vpop.f32.mrf.mxu0  ;;  %v1616_v15 = vadd.f32 %v1591_v56, %v3774_v54 }
 0x5a5   :  { %v1731_v43 = vadd.f32 %v3443_v41, %v1730_v57 }
 0x5a6   :  { %v1877_v31 = vmul.f32 -1.442695, %v1617_v46 }
 0x5a7   :  { %v2013_v6 = vpop.eup %2012  ;;  %1754 = vst [vmem:[#allocation17] sm:$0xff] %v1731_v43 }
 0x5a8   :  { %v2015_v38 = vpop.eup %2014  ;;  %v1621_v51 = vadd.f32 1.0, %v2013_v6  ;;  %2016 = vpow2.f32 %v1877_v31 }
 0x5a9   :  { %v1640_v22 = vadd.f32 1.0, %v2015_v38 }
 0x5aa   :  { %2018 = vrcp.f32 %v1621_v51  ;;  %v1631_v60 = vand.u32 2147483647, %v1621_v51  ;;  %v1633_v16 = vand.u32 2147483648, %v1621_v51  ;;  %vm1627_vm7 = vweird.f32 %v1621_v51 }
 0x5ab   :  { %2020 = vrcp.f32 %v1640_v22  ;;  %v1652_v24 = vand.u32 2147483648, %v1640_v22  ;;  %v1650_v11 = vand.u32 2147483647, %v1640_v22  ;;  %vm1646_vm8 = vweird.f32 %v1640_v22 }
 0x5ac   :  { %v1733_v47 = vpop.f32.mrf.mxu0  ;;  %v1634_v12 = vor.u32 1.1754944e-38, %v1633_v16  ;;  %vm1632_vm11 = vcmp.eq.f32.partialorder %v1631_v60, 8.507059e+37 }
 0x5ad   :  { %v1734_v55 = vadd.f32 %v3443_v41, %v1733_v47  ;;  %v1653_v42 = vor.u32 1.1754944e-38, %v1652_v24  ;;  %vm1651_vm12 = vcmp.eq.f32.partialorder %v1650_v11, 8.507059e+37 }
 0x5ae   :  { %v2017_v61 = vpop.eup %2016 }
 0x5af   :  { %v1660_v9 = vadd.f32 1.0, %v2017_v61  ;;  %1755 = vst [vmem:[#allocation17 + $0x8] sm:$0xff] %v1734_v55 }
 0x5b0   :  { %v2019_v7 = vpop.eup %2018 }
 0x5b1   :  { %v2021_v3 = vpop.eup %2020  ;;  %v1623_v1 = vmul.f32 %v2019_v7, %v1621_v51  ;;  %2022 = vrcp.f32 %v1660_v9  ;;  %vm1628_vm5 = vweird.f32 %v2019_v7  ;;  %v1672_v50 = vand.u32 2147483648, %v1660_v9 }
 0x5b2   :  { %v1642_v13 = vmul.f32 %v2021_v3, %v1640_v22  ;;  %2024 = vtanh.f32 %v1616_v15  ;;  %vm1647_vm6 = vweird.f32 %v2021_v3  ;;  %vm1629_vm9 = vmor %vm1627_vm7, %vm1628_vm5  ;;  %vm1666_vm14 = vweird.f32 %v1660_v9 }
 0x5b3   :  { %v1624_v63 = vsub.f32 1.0, %v1623_v1  ;;  %vm1648_vm10 = vmor %vm1646_vm8, %vm1647_vm6  ;;  %v1670_v23 = vand.u32 2147483647, %v1660_v9  ;;  %v1673_v21 = vor.u32 1.1754944e-38, %v1672_v50 }
 0x5b4   :  { %v1643_v4 = vsub.f32 1.0, %v1642_v13  ;;  %v1736_v5 = vpop.f32.mrf.mxu0 }
 0x5b5   :  { %v1625_v25 = vmul.f32 %v2019_v7, %v1624_v63  ;;  %v1737_v10 = vadd.f32 %v3443_v41, %v1736_v5  ;;  %vm1671_vm0 = vcmp.eq.f32.partialorder %v1670_v23, 8.507059e+37 }
 0x5b6   :  { %v1644_v28 = vmul.f32 %v2021_v3, %v1643_v4 }
 0x5b7   :  { %v2023_v29 = vpop.eup %2022  ;;  %v1626_v30 = vadd.f32 %v2019_v7, %v1625_v25  ;;  %1756 = vst [vmem:[#allocation17 + $0x10] sm:$0xff] %v1737_v10 }
 0x5b8   :  { %v1645_v33 = vadd.f32 %v2021_v3, %v1644_v28  ;;  %v1662_v36 = vmul.f32 %v2023_v29, %v1660_v9  ;;  %v2025_v40 = vpop.eup %2024  ;;  %vm1667_vm13 = vweird.f32 %v2023_v29 }
 0x5b9   :  { %v1630_v39 = vsel %vm1629_vm9, %v2019_v7, %v1626_v30  ;;  %vm1668_vm15 = vmor %vm1666_vm14, %vm1667_vm13 }
 0x5ba   :  { %v1635_v18 = vsel %vm1632_vm11, %v1634_v12, %v1630_v39  ;;  %v1649_v44 = vsel %vm1648_vm10, %v2021_v3, %v1645_v33  ;;  %v1663_v59 = vsub.f32 1.0, %v1662_v36 }
 0x5bb   :  { %v1654_v34 = vsel %vm1651_vm12, %v1653_v42, %v1649_v44  ;;  %v1677_v27 = vmul.f32 %v2025_v40, %v1635_v18 }
 0x5bc   :  { %v1676_v8 = vmul.f32 %v1654_v34, %v3428_v20  ;;  %v1739_v58 = vpop.f32.mrf.mxu0  ;;  %v1664_v32 = vmul.f32 %v2023_v29, %v1663_v59 }
 0x5bd   :  { %v1740_v37 = vadd.f32 %v3443_v41, %v1739_v58 }
 0x5be   :  { %v1678_v45 = vadd.f32 %v1677_v27, %v1676_v8  ;;  %v1665_v26 = vadd.f32 %v2023_v29, %v1664_v32 }
 0x5bf   :  { %1757 = vst [vmem:[#allocation17 + $0x18] sm:$0xff] %v1740_v37 }
 0x5c0   :  { %1768 = vst [vmem:[#allocation20] sm:$0xff] %v1678_v45  ;;  %2026 = vtanh.f32 %v1678_v45  ;;  %v1669_v48 = vsel %vm1668_vm15, %v2023_v29, %v1665_v26 }
 0x5c1   :  { %v1674_v49 = vsel %vm1671_vm0, %v1673_v21, %v1669_v48 }
 0x5c4   :  { %v1742_v52 = vpop.f32.mrf.mxu0 }
 0x5c5   :  { %v1743_v53 = vadd.f32 %v3443_v41, %v1742_v52 }
 0x5c6   :  { %v2027_v20 = vpop.eup %2026 }
 0x5c7   :  { %1758 = vst [vmem:[#allocation17 + $0x20] sm:$0xff] %v1743_v53  ;;  %v1680_v0 = vmul.f32 %v2027_v20, %v1674_v49 }
 0x5c9   :  { %1750 = vmatmul.f32.gmra.mxu0 %v1680_v0  ;;  %1766 = vst [vmem:[#allocation18] sm:$0xff] %v1680_v0 }
 0x5ca   :  { %1792 = dma.vmem_to_hbm [thread:$0]  %s1788_s24, 128, %s1790_s1, [#allocation19]  }
 0x5cb   :  { %1803 = dma.vmem_to_hbm [thread:$0]  %s1799_s28, 128, %s1801_s3, [#allocation19]  }
 0x5cc   :  { %v1745_v62 = vpop.f32.mrf.mxu0 }
 0x5cd   :  { %v1746_v19 = vadd.f32 %v3443_v41, %v1745_v62 }
 0x5cf   :  { %1759 = vst [vmem:[#allocation17 + $0x28] sm:$0xff] %v1746_v19 }
 0x5d4   :  { %v1748_v35 = vpop.f32.mrf.mxu0 }
 0x5d5   :  { %v1749_v2 = vadd.f32 %v3443_v41, %v1748_v35 }
 0x5d7   :  { %1760 = vst [vmem:[#allocation17 + $0x30] sm:$0xff] %v1749_v2 }
 0x646   :  { %v1751_v14 = vpop.f32.mrf.mxu0 }
 0x647   :  { %v1752_v17 = vadd.f32 %v3443_v41, %v1751_v14 }
 0x649   :  { %1761 = vst [vmem:[#allocation17 + $0x38] sm:$0xff] %v1752_v17 }
 0x64a   :  { %1781 = dma.vmem_to_hbm [thread:$0]  %s1774_s13, 1024, %s1776_s16, [#allocation8], %s2325_s11, %s2325_s11, %s2326_s12  }
 0x64b   :  { %2316 = dma.done.wait [#allocation8], 1024  }
 0x64c   :  { %2317 = vsyncadd [#allocation8], 4294966272 }
 0x64d   :  { %2318 = dma.done.wait [#allocation19], 256  }
 0x64e   :  { %2319 = vsyncadd [#allocation19], 4294967040 }
 0x64f   :  { %1816 = vsyncpa [#allocation7], 1 }
 0x650   :  { %1817 = vsyncpa [#allocation10], 1 }
 0x651   :  { %1818 = vsyncpa [#allocation13], 1 }
 0x652   :  { %1819 = vsyncpa [#allocation16], 1 }
 0x653   :  { %1820 = vsyncpa [#allocation8], 1 }
 0x654   :  { %1821 = vsyncpa [#allocation19], 1 }

</bundles_post_ra>
